<compile_context>
chip_gen: v7x
topology: tpu7x:2x2x1
jax: 0.10.0
libtpu: 0.0.40
codegen_flags: <defaults>
</compile_context>

<pallas_src>
import functools

import jax
import jax.numpy as jnp
from jax import lax
from jax.experimental import pallas as pl
from jax.experimental.pallas import tpu as pltpu


# ---------------------------------------------------------------------------
# fused Pallas kernel
# ---------------------------------------------------------------------------
def _residual_kernel(x_ref, w1_ref, w2_ref, ws_ref,
                     s1_ref, b1_ref, s2_ref, b2_ref, ss_ref, bs_ref,
                     o_ref, xp_ref, y1_ref, *, H, W, HT, has_proj):
    """Fused residual block for one (batch, row-tile) grid step.

    x_ref:  (1, H, W, Cip)      bf16 activation (channels padded to 128*)
    w1_ref: (3, 3, Cip, Cop)    bf16
    w2_ref: (3, 3, Cop, Cop)    bf16
    ws_ref: (Cip, Cop)          bf16 (1x1 projection; unused if not has_proj)
    s*/b*:  (1, Cop)            f32 folded BN scale / bias
    o_ref:  (1, HT*W, Cop)      f32 lane-dense output slab
    xp_ref: (H+4, W+16, Cip)    f32 zero-padded image (border: 2 rows, 8 cols)
    y1_ref: (HT+2, W+8, Cop)    f32 conv1 tile incl. the 1-row/1-col halo
    """
    h = pl.program_id(1)
    HT2 = HT + 2              # conv2 needs a 1-row halo of y1 on each side
    WV = W + 8                # conv1 window width, kept sublane-aligned
    Cip = xp_ref.shape[-1]
    Cop = o_ref.shape[-1]

    # ---- build the zero-padded input image in VMEM once per batch element --
    @pl.when(h == 0)
    def _():
        xp_ref[...] = jnp.zeros(xp_ref.shape, xp_ref.dtype)
        # interior at row offset 2 / col offset 8: aligned to the (8,128) tile
        xp_ref[2:2 + H, 8:8 + W, :] = x_ref[0].astype(xp_ref.dtype)

    r0 = pl.multiple_of(h * HT, HT)

    # ---- conv1 (3x3) + bn1 + relu over a (HT+2, W+8) window of y1 ----------
    acc1 = jnp.zeros((HT2 * WV, Cop), jnp.float32)
    for dy in range(3):
        for dx in range(3):
            patch = xp_ref[pl.ds(r0 + dy, HT2), pl.ds(dx + 6, WV), :]
            patch = patch.reshape(HT2 * WV, Cip).astype(jnp.bfloat16)
            acc1 += jnp.dot(patch, w1_ref[dy, dx],
                            preferred_element_type=jnp.float32)
    y1 = jnp.maximum(acc1 * s1_ref[0, :] + b1_ref[0, :], 0.0)
    y1 = y1.reshape(HT2, WV, Cop)

    # zero the rows/cols that fall outside the image: they are conv2's "SAME"
    # zero padding, not values conv1 would produce.  The mask is computed per
    # (row, col) and broadcast over the 128 channels in the where().
    ri = lax.broadcasted_iota(jnp.int32, (HT2, WV, 1), 0)
    ci = lax.broadcasted_iota(jnp.int32, (HT2, WV, 1), 1)
    g = h * HT - 1 + ri                      # global y1 row of local row ri
    valid = (g >= 0) & (g < H) & (ci >= 1) & (ci <= W)
    y1_ref[...] = jnp.where(valid, y1, 0.0).astype(y1_ref.dtype)

    # ---- conv2 (3x3) + bn2 --------------------------------------------------
    acc2 = jnp.zeros((HT * W, Cop), jnp.float32)
    for dy in range(3):
        for dx in range(3):
            p2 = y1_ref[dy:dy + HT, dx:dx + W, :]
            p2 = p2.reshape(HT * W, Cop).astype(jnp.bfloat16)
            acc2 += jnp.dot(p2, w2_ref[dy, dx],
                            preferred_element_type=jnp.float32)
    y2 = acc2 * s2_ref[0, :] + b2_ref[0, :]

    # ---- skip path (1x1 conv + bn, or identity) -----------------------------
    xs = xp_ref[pl.ds(r0 + 2, HT), pl.ds(8, W), :].reshape(HT * W, Cip)
    if has_proj:
        sk = jnp.dot(xs.astype(jnp.bfloat16), ws_ref[...],
                     preferred_element_type=jnp.float32)
        sk = sk * ss_ref[0, :] + bs_ref[0, :]
    else:
        sk = xs.astype(jnp.float32)          # Cip == Cop in this case

    o_ref[0, :, :] = jnp.maximum(y2 + sk, 0.0).astype(o_ref.dtype)


# ---------------------------------------------------------------------------
# wrapper
# ---------------------------------------------------------------------------
def _round_up(x, m):
    return (x + m - 1) // m * m


def _pad_axis(a, axis, target):
    if a.shape[axis] == target:
        return a
    widths = [(0, 0)] * a.ndim
    widths[axis] = (0, target - a.shape[axis])
    return jnp.pad(a, widths)


def _pick_h_tile(H, W, cop, budget_bytes=8 << 20):
    """Largest divisor of H whose tile-dependent working set fits the budget.

    Capped at H // 2 (when H allows) so the (N, H/H_TILE) grid has enough
    steps for the software pipeline; the 8 MiB budget is conservative w.r.t.
    v7x's 64 MiB physical / 32 MiB scoped VMEM.
    """
    cap = H if H < 16 else H // 2
    best = 1
    for t in range(1, cap + 1):
        if H % t:
            continue
        bytes_t = ((t + 2) * (W + 8) * cop * (4 + 4)   # conv1 f32 acc + y1 scratch
                   + t * W * cop * 4                   # conv2 f32 acc
                   + 2 * t * W * cop * 4)              # double-buffered out block
        if bytes_t <= budget_bytes:
            best = t
    return best


def residual_forward(x_nchw, params, stride=1):
    # TODO(synk): stride > 1 (strided conv1 / strided 1x1 skip) not implemented.
    assert stride == 1
    N, Cin, H, W = x_nchw.shape
    x = jnp.transpose(x_nchw, (0, 2, 3, 1))                      # NCHW -> NHWC

    w1, w2 = params["w1"], params["w2"]
    out_dim = w1.shape[-1]
    has_proj = "w_skip" in params

    Cip = _round_up(Cin, 128)
    Cop = _round_up(out_dim, 128)

    # lane-dense channels + bf16 activation in HBM
    xb = _pad_axis(x, 3, Cip).astype(jnp.bfloat16)
    w1p = _pad_axis(_pad_axis(w1, 2, Cip), 3, Cop).astype(jnp.bfloat16)
    w2p = _pad_axis(_pad_axis(w2, 2, Cop), 3, Cop).astype(jnp.bfloat16)

    def pad_sb(sb):
        s, b = sb
        return (_pad_axis(s.reshape(1, -1), 1, Cop).astype(jnp.float32),
                _pad_axis(b.reshape(1, -1), 1, Cop).astype(jnp.float32))

    s1, b1 = pad_sb(params["bn1"])
    s2, b2 = pad_sb(params["bn2"])
    if has_proj:
        wsp = _pad_axis(_pad_axis(params["w_skip"], 0, Cip), 1,
                        Cop).astype(jnp.bfloat16)
        ss, bs = pad_sb(params["bn_skip"])
    else:
        wsp = jnp.zeros((Cip, Cop), jnp.bfloat16)
        ss = jnp.ones((1, Cop), jnp.float32)
        bs = jnp.zeros((1, Cop), jnp.float32)

    HT = _pick_h_tile(H, W, Cop)
    grid = (N, H // HT)
    kernel = functools.partial(_residual_kernel, H=H, W=W, HT=HT,
                               has_proj=has_proj)

    out_flat = pl.pallas_call(
        kernel,
        out_shape=jax.ShapeDtypeStruct((N, H * W, Cop), jnp.float32),
        grid=grid,
        in_specs=[
            pl.BlockSpec((1, H, W, Cip), lambda n, h: (n, 0, 0, 0)),
            pl.BlockSpec((3, 3, Cip, Cop), lambda n, h: (0, 0, 0, 0)),
            pl.BlockSpec((3, 3, Cop, Cop), lambda n, h: (0, 0, 0, 0)),
            pl.BlockSpec((Cip, Cop), lambda n, h: (0, 0)),
            pl.BlockSpec((1, Cop), lambda n, h: (0, 0)),
            pl.BlockSpec((1, Cop), lambda n, h: (0, 0)),
            pl.BlockSpec((1, Cop), lambda n, h: (0, 0)),
            pl.BlockSpec((1, Cop), lambda n, h: (0, 0)),
            pl.BlockSpec((1, Cop), lambda n, h: (0, 0)),
            pl.BlockSpec((1, Cop), lambda n, h: (0, 0)),
        ],
        out_specs=pl.BlockSpec((1, HT * W, Cop), lambda n, h: (n, h, 0)),
        scratch_shapes=[
            pltpu.VMEM((H + 4, W + 16, Cip), jnp.float32),   # padded image
            pltpu.VMEM((HT + 2, W + 8, Cop), jnp.float32),   # y1 tile (+halo)
        ],
        compiler_params=pltpu.CompilerParams(
            dimension_semantics=("parallel", "arbitrary"),
            vmem_limit_bytes=32 * 1024 * 1024),
    )(xb, w1p, w2p, wsp, s1, b1, s2, b2, ss, bs)

    out = out_flat.reshape(N, H, W, Cop)[..., :out_dim]
    return jnp.transpose(out, (0, 3, 1, 2))                     # NHWC -> NCHW


# ---------------------------------------------------------------------------
# params (BN folded to inference-mode scale/bias) + pure-JAX reference
# ---------------------------------------------------------------------------
def _fold_bn(gamma, beta, mean, var, eps=1e-5):
    scale = gamma / jnp.sqrt(var + eps)
    bias = beta - mean * scale
    return scale.astype(jnp.float32), bias.astype(jnp.float32)


def init_residual_params(key, inp_dim, out_dim):
    ks = jax.random.split(key, 12)
    p = {}
    p["w1"] = 0.1 * jax.random.normal(ks[0], (3, 3, inp_dim, out_dim),
                                      jnp.float32)
    p["w2"] = 0.1 * jax.random.normal(ks[1], (3, 3, out_dim, out_dim),
                                      jnp.float32)
    p["bn1"] = _fold_bn(
        1.0 + 0.1 * jax.random.normal(ks[2], (out_dim,), jnp.float32),
        0.1 * jax.random.normal(ks[3], (out_dim,), jnp.float32),
        0.05 * jax.random.normal(ks[4], (out_dim,), jnp.float32),
        jnp.abs(1.0 + 0.1 * jax.random.normal(ks[5], (out_dim,), jnp.float32)))
    p["bn2"] = _fold_bn(
        1.0 + 0.1 * jax.random.normal(ks[6], (out_dim,), jnp.float32),
        0.1 * jax.random.normal(ks[7], (out_dim,), jnp.float32),
        0.05 * jax.random.normal(ks[8], (out_dim,), jnp.float32),
        jnp.abs(1.0 + 0.1 * jax.random.normal(ks[9], (out_dim,), jnp.float32)))
    if inp_dim != out_dim:
        p["w_skip"] = 0.1 * jax.random.normal(ks[10], (inp_dim, out_dim),
                                              jnp.float32)
        p["bn_skip"] = _fold_bn(
            1.0 + 0.1 * jax.random.normal(ks[11], (out_dim,), jnp.float32),
            jnp.zeros((out_dim,), jnp.float32),
            jnp.zeros((out_dim,), jnp.float32),
            jnp.ones((out_dim,), jnp.float32))
    return p


def residual_reference(x_nchw, params):
    """Pure-JAX reference with the same bf16-operand / f32-accumulate
    quantization points as the kernel (documented bf16 tolerance)."""
    x = jnp.transpose(x_nchw, (0, 2, 3, 1)).astype(jnp.bfloat16)
    dn = ("NHWC", "HWIO", "NHWC")

    def conv(v, w, pad):
        return lax.conv_general_dilated(
            v, w.astype(jnp.bfloat16), (1, 1), pad, dimension_numbers=dn,
            preferred_element_type=jnp.float32)

    s1, b1 = params["bn1"]
    y1 = jnp.maximum(conv(x, params["w1"], "SAME") * s1 + b1, 0.0)
    s2, b2 = params["bn2"]
    y2 = conv(y1.astype(jnp.bfloat16), params["w2"], "SAME") * s2 + b2
    if "w_skip" in params:
        ss, bs = params["bn_skip"]
        skip = conv(x, params["w_skip"][None, None], "VALID") * ss + bs
    else:
        skip = x.astype(jnp.float32)
    return jnp.transpose(jnp.maximum(y2 + skip, 0.0), (0, 3, 1, 2))


if __name__ == "__main__":
    key = jax.random.PRNGKey(0)
    k_x, k_p, k_x2, k_p2 = jax.random.split(key, 4)

    # projection-skip case (inp_dim != out_dim)
    N, inp_dim, out_dim, H, W = 2, 4, 8, 16, 16
    x = jax.random.normal(k_x, (N, inp_dim, H, W), jnp.float32)
    params = init_residual_params(k_p, inp_dim, out_dim)
    out = jax.block_until_ready(residual_forward(x, params, stride=1))
    ref = residual_reference(x, params)
    assert out.shape == (N, out_dim, H, W)
    err = float(jnp.max(jnp.abs(out - ref)))
    assert jnp.allclose(out, ref, atol=2e-2, rtol=2e-2), err

    # identity-skip case (inp_dim == out_dim)
    N2, dim2, H2, W2 = 2, 8, 8, 8
    x2 = jax.random.normal(k_x2, (N2, dim2, H2, W2), jnp.float32)
    params2 = init_residual_params(k_p2, dim2, dim2)
    out2 = jax.block_until_ready(residual_forward(x2, params2, stride=1))
    ref2 = residual_reference(x2, params2)
    assert out2.shape == (N2, dim2, H2, W2)
    err2 = float(jnp.max(jnp.abs(out2 - ref2)))
    assert jnp.allclose(out2, ref2, atol=2e-2, rtol=2e-2), err2

    print("KERNEL_OK")
</pallas_src>

<mosaic_0001>
module attributes {stable_mosaic.version = 11 : i64} {
  func.func @_residual_kernel(%arg0: i32, %arg1: i32, %arg2: memref<1x16x16x128xbf16, #tpu.memory_space<vmem>>, %arg3: memref<3x3x128x128xbf16, #tpu.memory_space<vmem>>, %arg4: memref<3x3x128x128xbf16, #tpu.memory_space<vmem>>, %arg5: memref<128x128xbf16, #tpu.memory_space<vmem>>, %arg6: memref<1x128xf32, #tpu.memory_space<vmem>>, %arg7: memref<1x128xf32, #tpu.memory_space<vmem>>, %arg8: memref<1x128xf32, #tpu.memory_space<vmem>>, %arg9: memref<1x128xf32, #tpu.memory_space<vmem>>, %arg10: memref<1x128xf32, #tpu.memory_space<vmem>>, %arg11: memref<1x128xf32, #tpu.memory_space<vmem>>, %arg12: memref<1x128x128xf32, #tpu.memory_space<vmem>>, %arg13: memref<20x32x128xf32, #tpu.memory_space<vmem>>, %arg14: memref<10x24x128xf32, #tpu.memory_space<vmem>>) attributes {dimension_semantics = [#tpu.dimension_semantics<parallel>, #tpu.dimension_semantics<arbitrary>], iteration_bounds = array<i64: 2, 2>, scalar_prefetch = 0 : i64, scratch_operands = 2 : i64, tpu.core_type = #tpu.core_type<tc>, window_params = [{transform_indices = @transform_0, window_bounds = array<i64: 1, 16, 16, 128>}, {pipeline_mode = #tpu.pipeline_mode<synchronous>, transform_indices = @transform_1, window_bounds = array<i64: 3, 3, 128, 128>}, {pipeline_mode = #tpu.pipeline_mode<synchronous>, transform_indices = @transform_2, window_bounds = array<i64: 3, 3, 128, 128>}, {pipeline_mode = #tpu.pipeline_mode<synchronous>, transform_indices = @transform_3, window_bounds = array<i64: 128, 128>}, {pipeline_mode = #tpu.pipeline_mode<synchronous>, transform_indices = @transform_4, window_bounds = array<i64: 1, 128>}, {pipeline_mode = #tpu.pipeline_mode<synchronous>, transform_indices = @transform_5, window_bounds = array<i64: 1, 128>}, {pipeline_mode = #tpu.pipeline_mode<synchronous>, transform_indices = @transform_6, window_bounds = array<i64: 1, 128>}, {pipeline_mode = #tpu.pipeline_mode<synchronous>, transform_indices = @transform_7, window_bounds = array<i64: 1, 128>}, {pipeline_mode = #tpu.pipeline_mode<synchronous>, transform_indices = @transform_8, window_bounds = array<i64: 1, 128>}, {pipeline_mode = #tpu.pipeline_mode<synchronous>, transform_indices = @transform_9, window_bounds = array<i64: 1, 128>}, {transform_indices = @transform_10, window_bounds = array<i64: 1, 128, 128>}]} {
    %c0_i32 = arith.constant 0 : i32
    %0 = arith.cmpi eq, %arg1, %c0_i32 : i32
    %1 = arith.extui %0 : i1 to i32
    %c0_i32_0 = arith.constant 0 : i32
    %2 = arith.cmpi ne, %1, %c0_i32_0 : i32
    scf.if %2 {
      %cst_170 = arith.constant 0.000000e+00 : f32
      %219 = vector.broadcast %cst_170 : f32 to vector<20x32x128xf32>
      %c0_171 = arith.constant 0 : index
      %c0_172 = arith.constant 0 : index
      %c0_173 = arith.constant 0 : index
      %220 = vector.load %arg13[%c0_171, %c0_172, %c0_173] : memref<20x32x128xf32, #tpu.memory_space<vmem>>, vector<20x32x128xf32>
      tpu.vector_store %arg13[%c0_171, %c0_172, %c0_173], %219 {strides = array<i32>} : memref<20x32x128xf32, #tpu.memory_space<vmem>>, vector<20x32x128xf32>,
      %c0_174 = arith.constant 0 : index
      %c0_175 = arith.constant 0 : index
      %c0_176 = arith.constant 0 : index
      %c0_177 = arith.constant 0 : index
      %221 = vector.load %arg2[%c0_174, %c0_175, %c0_176, %c0_177] : memref<1x16x16x128xbf16, #tpu.memory_space<vmem>>, vector<1x16x16x128xbf16>
      %222 = vector.shape_cast %221 : vector<1x16x16x128xbf16> to vector<16x16x128xbf16>
      %223 = arith.extf %222 : vector<16x16x128xbf16> to vector<16x16x128xf32>
      %c2_178 = arith.constant 2 : index
      %c8_179 = arith.constant 8 : index
      %c0_180 = arith.constant 0 : index
      %224 = vector.load %arg13[%c2_178, %c8_179, %c0_180] : memref<20x32x128xf32, #tpu.memory_space<vmem>>, vector<16x16x128xf32>
      tpu.vector_store %arg13[%c2_178, %c8_179, %c0_180], %223 {strides = array<i32>} : memref<20x32x128xf32, #tpu.memory_space<vmem>>, vector<16x16x128xf32>,
    } else {
    }
    %c8_i32 = arith.constant 8 : i32
    %3 = arith.muli %arg1, %c8_i32 : i32
    %4 = tpu.assume_multiple %3, 8 : i32
    %cst = arith.constant 0.000000e+00 : f32
    %5 = vector.broadcast %cst : f32 to vector<240x128xf32>
    %c0_i32_1 = arith.constant 0 : i32
    %6 = arith.addi %4, %c0_i32_1 : i32
    %7 = arith.index_cast %6 : i32 to index
    %c6 = arith.constant 6 : index
    %c0 = arith.constant 0 : index
    %8 = vector.load %arg13[%7, %c6, %c0] : memref<20x32x128xf32, #tpu.memory_space<vmem>>, vector<10x24x128xf32>
    %9 = vector.shape_cast %8 : vector<10x24x128xf32> to vector<240x128xf32>
    %10 = arith.truncf %9 : vector<240x128xf32> to vector<240x128xbf16>
    %c0_2 = arith.constant 0 : index
    %c0_3 = arith.constant 0 : index
    %c0_4 = arith.constant 0 : index
    %c0_5 = arith.constant 0 : index
    %11 = vector.load %arg3[%c0_2, %c0_3, %c0_4, %c0_5] : memref<3x3x128x128xbf16, #tpu.memory_space<vmem>>, vector<1x1x128x128xbf16>
    %12 = vector.shape_cast %11 : vector<1x1x128x128xbf16> to vector<128x128xbf16>
    %cst_6 = arith.constant dense<0.000000e+00> : vector<240x128xf32>
    %13 = tpu.matmul %10, %12, %cst_6 {dimension_numbers = #tpu.dot_dimension_numbers<[1], [0], [0], [1], [0, 0, 1, 1], [], []>} : vector<240x128xbf16>, vector<128x128xbf16>, vector<240x128xf32> -> vector<240x128xf32>
    %14 = arith.addf %5, %13 : vector<240x128xf32>
    %c0_i32_7 = arith.constant 0 : i32
    %15 = arith.addi %4, %c0_i32_7 : i32
    %16 = arith.index_cast %15 : i32 to index
    %c7 = arith.constant 7 : index
    %c0_8 = arith.constant 0 : index
    %17 = vector.load %arg13[%16, %c7, %c0_8] : memref<20x32x128xf32, #tpu.memory_space<vmem>>, vector<10x24x128xf32>
    %18 = vector.shape_cast %17 : vector<10x24x128xf32> to vector<240x128xf32>
    %19 = arith.truncf %18 : vector<240x128xf32> to vector<240x128xbf16>
    %c0_9 = arith.constant 0 : index
    %c1 = arith.constant 1 : index
    %c0_10 = arith.constant 0 : index
    %c0_11 = arith.constant 0 : index
    %20 = vector.load %arg3[%c0_9, %c1, %c0_10, %c0_11] : memref<3x3x128x128xbf16, #tpu.memory_space<vmem>>, vector<1x1x128x128xbf16>
    %21 = vector.shape_cast %20 : vector<1x1x128x128xbf16> to vector<128x128xbf16>
    %cst_12 = arith.constant dense<0.000000e+00> : vector<240x128xf32>
    %22 = tpu.matmul %19, %21, %cst_12 {dimension_numbers = #tpu.dot_dimension_numbers<[1], [0], [0], [1], [0, 0, 1, 1], [], []>} : vector<240x128xbf16>, vector<128x128xbf16>, vector<240x128xf32> -> vector<240x128xf32>
    %23 = arith.addf %14, %22 : vector<240x128xf32>
    %c0_i32_13 = arith.constant 0 : i32
    %24 = arith.addi %4, %c0_i32_13 : i32
    %25 = arith.index_cast %24 : i32 to index
    %c8 = arith.constant 8 : index
    %c0_14 = arith.constant 0 : index
    %26 = vector.load %arg13[%25, %c8, %c0_14] : memref<20x32x128xf32, #tpu.memory_space<vmem>>, vector<10x24x128xf32>
    %27 = vector.shape_cast %26 : vector<10x24x128xf32> to vector<240x128xf32>
    %28 = arith.truncf %27 : vector<240x128xf32> to vector<240x128xbf16>
    %c0_15 = arith.constant 0 : index
    %c2 = arith.constant 2 : index
    %c0_16 = arith.constant 0 : index
    %c0_17 = arith.constant 0 : index
    %29 = vector.load %arg3[%c0_15, %c2, %c0_16, %c0_17] : memref<3x3x128x128xbf16, #tpu.memory_space<vmem>>, vector<1x1x128x128xbf16>
    %30 = vector.shape_cast %29 : vector<1x1x128x128xbf16> to vector<128x128xbf16>
    %cst_18 = arith.constant dense<0.000000e+00> : vector<240x128xf32>
    %31 = tpu.matmul %28, %30, %cst_18 {dimension_numbers = #tpu.dot_dimension_numbers<[1], [0], [0], [1], [0, 0, 1, 1], [], []>} : vector<240x128xbf16>, vector<128x128xbf16>, vector<240x128xf32> -> vector<240x128xf32>
    %32 = arith.addf %23, %31 : vector<240x128xf32>
    %c1_i32 = arith.constant 1 : i32
    %33 = arith.addi %4, %c1_i32 : i32
    %34 = arith.index_cast %33 : i32 to index
    %c6_19 = arith.constant 6 : index
    %c0_20 = arith.constant 0 : index
    %35 = vector.load %arg13[%34, %c6_19, %c0_20] : memref<20x32x128xf32, #tpu.memory_space<vmem>>, vector<10x24x128xf32>
    %36 = vector.shape_cast %35 : vector<10x24x128xf32> to vector<240x128xf32>
    %37 = arith.truncf %36 : vector<240x128xf32> to vector<240x128xbf16>
    %c1_21 = arith.constant 1 : index
    %c0_22 = arith.constant 0 : index
    %c0_23 = arith.constant 0 : index
    %c0_24 = arith.constant 0 : index
    %38 = vector.load %arg3[%c1_21, %c0_22, %c0_23, %c0_24] : memref<3x3x128x128xbf16, #tpu.memory_space<vmem>>, vector<1x1x128x128xbf16>
    %39 = vector.shape_cast %38 : vector<1x1x128x128xbf16> to vector<128x128xbf16>
    %cst_25 = arith.constant dense<0.000000e+00> : vector<240x128xf32>
    %40 = tpu.matmul %37, %39, %cst_25 {dimension_numbers = #tpu.dot_dimension_numbers<[1], [0], [0], [1], [0, 0, 1, 1], [], []>} : vector<240x128xbf16>, vector<128x128xbf16>, vector<240x128xf32> -> vector<240x128xf32>
    %41 = arith.addf %32, %40 : vector<240x128xf32>
    %c1_i32_26 = arith.constant 1 : i32
    %42 = arith.addi %4, %c1_i32_26 : i32
    %43 = arith.index_cast %42 : i32 to index
    %c7_27 = arith.constant 7 : index
    %c0_28 = arith.constant 0 : index
    %44 = vector.load %arg13[%43, %c7_27, %c0_28] : memref<20x32x128xf32, #tpu.memory_space<vmem>>, vector<10x24x128xf32>
    %45 = vector.shape_cast %44 : vector<10x24x128xf32> to vector<240x128xf32>
    %46 = arith.truncf %45 : vector<240x128xf32> to vector<240x128xbf16>
    %c1_29 = arith.constant 1 : index
    %c1_30 = arith.constant 1 : index
    %c0_31 = arith.constant 0 : index
    %c0_32 = arith.constant 0 : index
    %47 = vector.load %arg3[%c1_29, %c1_30, %c0_31, %c0_32] : memref<3x3x128x128xbf16, #tpu.memory_space<vmem>>, vector<1x1x128x128xbf16>
    %48 = vector.shape_cast %47 : vector<1x1x128x128xbf16> to vector<128x128xbf16>
    %cst_33 = arith.constant dense<0.000000e+00> : vector<240x128xf32>
    %49 = tpu.matmul %46, %48, %cst_33 {dimension_numbers = #tpu.dot_dimension_numbers<[1], [0], [0], [1], [0, 0, 1, 1], [], []>} : vector<240x128xbf16>, vector<128x128xbf16>, vector<240x128xf32> -> vector<240x128xf32>
    %50 = arith.addf %41, %49 : vector<240x128xf32>
    %c1_i32_34 = arith.constant 1 : i32
    %51 = arith.addi %4, %c1_i32_34 : i32
    %52 = arith.index_cast %51 : i32 to index
    %c8_35 = arith.constant 8 : index
    %c0_36 = arith.constant 0 : index
    %53 = vector.load %arg13[%52, %c8_35, %c0_36] : memref<20x32x128xf32, #tpu.memory_space<vmem>>, vector<10x24x128xf32>
    %54 = vector.shape_cast %53 : vector<10x24x128xf32> to vector<240x128xf32>
    %55 = arith.truncf %54 : vector<240x128xf32> to vector<240x128xbf16>
    %c1_37 = arith.constant 1 : index
    %c2_38 = arith.constant 2 : index
    %c0_39 = arith.constant 0 : index
    %c0_40 = arith.constant 0 : index
    %56 = vector.load %arg3[%c1_37, %c2_38, %c0_39, %c0_40] : memref<3x3x128x128xbf16, #tpu.memory_space<vmem>>, vector<1x1x128x128xbf16>
    %57 = vector.shape_cast %56 : vector<1x1x128x128xbf16> to vector<128x128xbf16>
    %cst_41 = arith.constant dense<0.000000e+00> : vector<240x128xf32>
    %58 = tpu.matmul %55, %57, %cst_41 {dimension_numbers = #tpu.dot_dimension_numbers<[1], [0], [0], [1], [0, 0, 1, 1], [], []>} : vector<240x128xbf16>, vector<128x128xbf16>, vector<240x128xf32> -> vector<240x128xf32>
    %59 = arith.addf %50, %58 : vector<240x128xf32>
    %c2_i32 = arith.constant 2 : i32
    %60 = arith.addi %4, %c2_i32 : i32
    %61 = arith.index_cast %60 : i32 to index
    %c6_42 = arith.constant 6 : index
    %c0_43 = arith.constant 0 : index
    %62 = vector.load %arg13[%61, %c6_42, %c0_43] : memref<20x32x128xf32, #tpu.memory_space<vmem>>, vector<10x24x128xf32>
    %63 = vector.shape_cast %62 : vector<10x24x128xf32> to vector<240x128xf32>
    %64 = arith.truncf %63 : vector<240x128xf32> to vector<240x128xbf16>
    %c2_44 = arith.constant 2 : index
    %c0_45 = arith.constant 0 : index
    %c0_46 = arith.constant 0 : index
    %c0_47 = arith.constant 0 : index
    %65 = vector.load %arg3[%c2_44, %c0_45, %c0_46, %c0_47] : memref<3x3x128x128xbf16, #tpu.memory_space<vmem>>, vector<1x1x128x128xbf16>
    %66 = vector.shape_cast %65 : vector<1x1x128x128xbf16> to vector<128x128xbf16>
    %cst_48 = arith.constant dense<0.000000e+00> : vector<240x128xf32>
    %67 = tpu.matmul %64, %66, %cst_48 {dimension_numbers = #tpu.dot_dimension_numbers<[1], [0], [0], [1], [0, 0, 1, 1], [], []>} : vector<240x128xbf16>, vector<128x128xbf16>, vector<240x128xf32> -> vector<240x128xf32>
    %68 = arith.addf %59, %67 : vector<240x128xf32>
    %c2_i32_49 = arith.constant 2 : i32
    %69 = arith.addi %4, %c2_i32_49 : i32
    %70 = arith.index_cast %69 : i32 to index
    %c7_50 = arith.constant 7 : index
    %c0_51 = arith.constant 0 : index
    %71 = vector.load %arg13[%70, %c7_50, %c0_51] : memref<20x32x128xf32, #tpu.memory_space<vmem>>, vector<10x24x128xf32>
    %72 = vector.shape_cast %71 : vector<10x24x128xf32> to vector<240x128xf32>
    %73 = arith.truncf %72 : vector<240x128xf32> to vector<240x128xbf16>
    %c2_52 = arith.constant 2 : index
    %c1_53 = arith.constant 1 : index
    %c0_54 = arith.constant 0 : index
    %c0_55 = arith.constant 0 : index
    %74 = vector.load %arg3[%c2_52, %c1_53, %c0_54, %c0_55] : memref<3x3x128x128xbf16, #tpu.memory_space<vmem>>, vector<1x1x128x128xbf16>
    %75 = vector.shape_cast %74 : vector<1x1x128x128xbf16> to vector<128x128xbf16>
    %cst_56 = arith.constant dense<0.000000e+00> : vector<240x128xf32>
    %76 = tpu.matmul %73, %75, %cst_56 {dimension_numbers = #tpu.dot_dimension_numbers<[1], [0], [0], [1], [0, 0, 1, 1], [], []>} : vector<240x128xbf16>, vector<128x128xbf16>, vector<240x128xf32> -> vector<240x128xf32>
    %77 = arith.addf %68, %76 : vector<240x128xf32>
    %c2_i32_57 = arith.constant 2 : i32
    %78 = arith.addi %4, %c2_i32_57 : i32
    %79 = arith.index_cast %78 : i32 to index
    %c8_58 = arith.constant 8 : index
    %c0_59 = arith.constant 0 : index
    %80 = vector.load %arg13[%79, %c8_58, %c0_59] : memref<20x32x128xf32, #tpu.memory_space<vmem>>, vector<10x24x128xf32>
    %81 = vector.shape_cast %80 : vector<10x24x128xf32> to vector<240x128xf32>
    %82 = arith.truncf %81 : vector<240x128xf32> to vector<240x128xbf16>
    %c2_60 = arith.constant 2 : index
    %c2_61 = arith.constant 2 : index
    %c0_62 = arith.constant 0 : index
    %c0_63 = arith.constant 0 : index
    %83 = vector.load %arg3[%c2_60, %c2_61, %c0_62, %c0_63] : memref<3x3x128x128xbf16, #tpu.memory_space<vmem>>, vector<1x1x128x128xbf16>
    %84 = vector.shape_cast %83 : vector<1x1x128x128xbf16> to vector<128x128xbf16>
    %cst_64 = arith.constant dense<0.000000e+00> : vector<240x128xf32>
    %85 = tpu.matmul %82, %84, %cst_64 {dimension_numbers = #tpu.dot_dimension_numbers<[1], [0], [0], [1], [0, 0, 1, 1], [], []>} : vector<240x128xbf16>, vector<128x128xbf16>, vector<240x128xf32> -> vector<240x128xf32>
    %86 = arith.addf %77, %85 : vector<240x128xf32>
    %c0_65 = arith.constant 0 : index
    %c0_66 = arith.constant 0 : index
    %87 = vector.load %arg6[%c0_65, %c0_66] : memref<1x128xf32, #tpu.memory_space<vmem>>, vector<1x128xf32>
    %88 = vector.shape_cast %87 : vector<1x128xf32> to vector<128xf32>
    %89 = vector.shape_cast %88 : vector<128xf32> to vector<1x128xf32>
    %90 = vector.broadcast %89 : vector<1x128xf32> to vector<240x128xf32>
    %91 = arith.mulf %86, %90 : vector<240x128xf32>
    %c0_67 = arith.constant 0 : index
    %c0_68 = arith.constant 0 : index
    %92 = vector.load %arg7[%c0_67, %c0_68] : memref<1x128xf32, #tpu.memory_space<vmem>>, vector<1x128xf32>
    %93 = vector.shape_cast %92 : vector<1x128xf32> to vector<128xf32>
    %94 = vector.shape_cast %93 : vector<128xf32> to vector<1x128xf32>
    %95 = vector.broadcast %94 : vector<1x128xf32> to vector<240x128xf32>
    %96 = arith.addf %91, %95 : vector<240x128xf32>
    %cst_69 = arith.constant 0.000000e+00 : f32
    %97 = vector.broadcast %cst_69 : f32 to vector<240x128xf32>
    %98 = arith.maximumf %96, %97 : vector<240x128xf32>
    %99 = vector.shape_cast %98 : vector<240x128xf32> to vector<10x24x128xf32>
    %100 = tpu.iota {dimensions = array<i32: 0>} : vector<10x24x1xi32>
    %101 = tpu.iota {dimensions = array<i32: 1>} : vector<10x24x1xi32>
    %c8_i32_70 = arith.constant 8 : i32
    %102 = arith.muli %arg1, %c8_i32_70 : i32
    %c1_i32_71 = arith.constant 1 : i32
    %103 = arith.subi %102, %c1_i32_71 : i32
    %104 = vector.broadcast %103 : i32 to vector<10x24x1xi32>
    %105 = arith.addi %104, %100 : vector<10x24x1xi32>
    %c0_i32_72 = arith.constant 0 : i32
    %106 = vector.broadcast %c0_i32_72 : i32 to vector<10x24x1xi32>
    %107 = arith.cmpi sge, %105, %106 : vector<10x24x1xi32>
    %c16_i32 = arith.constant 16 : i32
    %108 = vector.broadcast %c16_i32 : i32 to vector<10x24x1xi32>
    %109 = arith.cmpi slt, %105, %108 : vector<10x24x1xi32>
    %110 = arith.andi %107, %109 : vector<10x24x1xi1>
    %c1_i32_73 = arith.constant 1 : i32
    %111 = vector.broadcast %c1_i32_73 : i32 to vector<10x24x1xi32>
    %112 = arith.cmpi sge, %101, %111 : vector<10x24x1xi32>
    %113 = arith.andi %110, %112 : vector<10x24x1xi1>
    %c16_i32_74 = arith.constant 16 : i32
    %114 = vector.broadcast %c16_i32_74 : i32 to vector<10x24x1xi32>
    %115 = arith.cmpi sle, %101, %114 : vector<10x24x1xi32>
    %116 = arith.andi %113, %115 : vector<10x24x1xi1>
    %cst_75 = arith.constant 0.000000e+00 : f32
    %117 = vector.shape_cast %116 : vector<10x24x1xi1> to vector<10x24x1xi1>
    %118 = vector.broadcast %117 : vector<10x24x1xi1> to vector<10x24x128xi1>
    %119 = vector.broadcast %cst_75 : f32 to vector<10x24x128xf32>
    %120 = arith.select %118, %99, %119 : vector<10x24x128xi1>, vector<10x24x128xf32>
    %c0_76 = arith.constant 0 : index
    %c0_77 = arith.constant 0 : index
    %c0_78 = arith.constant 0 : index
    %121 = vector.load %arg14[%c0_76, %c0_77, %c0_78] : memref<10x24x128xf32, #tpu.memory_space<vmem>>, vector<10x24x128xf32>
    tpu.vector_store %arg14[%c0_76, %c0_77, %c0_78], %120 {strides = array<i32>} : memref<10x24x128xf32, #tpu.memory_space<vmem>>, vector<10x24x128xf32>,
    %cst_79 = arith.constant 0.000000e+00 : f32
    %122 = vector.broadcast %cst_79 : f32 to vector<128x128xf32>
    %c0_80 = arith.constant 0 : index
    %c0_81 = arith.constant 0 : index
    %c0_82 = arith.constant 0 : index
    %123 = vector.load %arg14[%c0_80, %c0_81, %c0_82] : memref<10x24x128xf32, #tpu.memory_space<vmem>>, vector<8x16x128xf32>
    %124 = vector.shape_cast %123 : vector<8x16x128xf32> to vector<128x128xf32>
    %125 = arith.truncf %124 : vector<128x128xf32> to vector<128x128xbf16>
    %c0_83 = arith.constant 0 : index
    %c0_84 = arith.constant 0 : index
    %c0_85 = arith.constant 0 : index
    %c0_86 = arith.constant 0 : index
    %126 = vector.load %arg4[%c0_83, %c0_84, %c0_85, %c0_86] : memref<3x3x128x128xbf16, #tpu.memory_space<vmem>>, vector<1x1x128x128xbf16>
    %127 = vector.shape_cast %126 : vector<1x1x128x128xbf16> to vector<128x128xbf16>
    %cst_87 = arith.constant dense<0.000000e+00> : vector<128x128xf32>
    %128 = tpu.matmul %125, %127, %cst_87 {dimension_numbers = #tpu.dot_dimension_numbers<[1], [0], [0], [1], [0, 0, 1, 1], [], []>} : vector<128x128xbf16>, vector<128x128xbf16>, vector<128x128xf32> -> vector<128x128xf32>
    %129 = arith.addf %122, %128 : vector<128x128xf32>
    %c0_88 = arith.constant 0 : index
    %c1_89 = arith.constant 1 : index
    %c0_90 = arith.constant 0 : index
    %130 = vector.load %arg14[%c0_88, %c1_89, %c0_90] : memref<10x24x128xf32, #tpu.memory_space<vmem>>, vector<8x16x128xf32>
    %131 = vector.shape_cast %130 : vector<8x16x128xf32> to vector<128x128xf32>
    %132 = arith.truncf %131 : vector<128x128xf32> to vector<128x128xbf16>
    %c0_91 = arith.constant 0 : index
    %c1_92 = arith.constant 1 : index
    %c0_93 = arith.constant 0 : index
    %c0_94 = arith.constant 0 : index
    %133 = vector.load %arg4[%c0_91, %c1_92, %c0_93, %c0_94] : memref<3x3x128x128xbf16, #tpu.memory_space<vmem>>, vector<1x1x128x128xbf16>
    %134 = vector.shape_cast %133 : vector<1x1x128x128xbf16> to vector<128x128xbf16>
    %cst_95 = arith.constant dense<0.000000e+00> : vector<128x128xf32>
    %135 = tpu.matmul %132, %134, %cst_95 {dimension_numbers = #tpu.dot_dimension_numbers<[1], [0], [0], [1], [0, 0, 1, 1], [], []>} : vector<128x128xbf16>, vector<128x128xbf16>, vector<128x128xf32> -> vector<128x128xf32>
    %136 = arith.addf %129, %135 : vector<128x128xf32>
    %c0_96 = arith.constant 0 : index
    %c2_97 = arith.constant 2 : index
    %c0_98 = arith.constant 0 : index
    %137 = vector.load %arg14[%c0_96, %c2_97, %c0_98] : memref<10x24x128xf32, #tpu.memory_space<vmem>>, vector<8x16x128xf32>
    %138 = vector.shape_cast %137 : vector<8x16x128xf32> to vector<128x128xf32>
    %139 = arith.truncf %138 : vector<128x128xf32> to vector<128x128xbf16>
    %c0_99 = arith.constant 0 : index
    %c2_100 = arith.constant 2 : index
    %c0_101 = arith.constant 0 : index
    %c0_102 = arith.constant 0 : index
    %140 = vector.load %arg4[%c0_99, %c2_100, %c0_101, %c0_102] : memref<3x3x128x128xbf16, #tpu.memory_space<vmem>>, vector<1x1x128x128xbf16>
    %141 = vector.shape_cast %140 : vector<1x1x128x128xbf16> to vector<128x128xbf16>
    %cst_103 = arith.constant dense<0.000000e+00> : vector<128x128xf32>
    %142 = tpu.matmul %139, %141, %cst_103 {dimension_numbers = #tpu.dot_dimension_numbers<[1], [0], [0], [1], [0, 0, 1, 1], [], []>} : vector<128x128xbf16>, vector<128x128xbf16>, vector<128x128xf32> -> vector<128x128xf32>
    %143 = arith.addf %136, %142 : vector<128x128xf32>
    %c1_104 = arith.constant 1 : index
    %c0_105 = arith.constant 0 : index
    %c0_106 = arith.constant 0 : index
    %144 = vector.load %arg14[%c1_104, %c0_105, %c0_106] : memref<10x24x128xf32, #tpu.memory_space<vmem>>, vector<8x16x128xf32>
    %145 = vector.shape_cast %144 : vector<8x16x128xf32> to vector<128x128xf32>
    %146 = arith.truncf %145 : vector<128x128xf32> to vector<128x128xbf16>
    %c1_107 = arith.constant 1 : index
    %c0_108 = arith.constant 0 : index
    %c0_109 = arith.constant 0 : index
    %c0_110 = arith.constant 0 : index
    %147 = vector.load %arg4[%c1_107, %c0_108, %c0_109, %c0_110] : memref<3x3x128x128xbf16, #tpu.memory_space<vmem>>, vector<1x1x128x128xbf16>
    %148 = vector.shape_cast %147 : vector<1x1x128x128xbf16> to vector<128x128xbf16>
    %cst_111 = arith.constant dense<0.000000e+00> : vector<128x128xf32>
    %149 = tpu.matmul %146, %148, %cst_111 {dimension_numbers = #tpu.dot_dimension_numbers<[1], [0], [0], [1], [0, 0, 1, 1], [], []>} : vector<128x128xbf16>, vector<128x128xbf16>, vector<128x128xf32> -> vector<128x128xf32>
    %150 = arith.addf %143, %149 : vector<128x128xf32>
    %c1_112 = arith.constant 1 : index
    %c1_113 = arith.constant 1 : index
    %c0_114 = arith.constant 0 : index
    %151 = vector.load %arg14[%c1_112, %c1_113, %c0_114] : memref<10x24x128xf32, #tpu.memory_space<vmem>>, vector<8x16x128xf32>
    %152 = vector.shape_cast %151 : vector<8x16x128xf32> to vector<128x128xf32>
    %153 = arith.truncf %152 : vector<128x128xf32> to vector<128x128xbf16>
    %c1_115 = arith.constant 1 : index
    %c1_116 = arith.constant 1 : index
    %c0_117 = arith.constant 0 : index
    %c0_118 = arith.constant 0 : index
    %154 = vector.load %arg4[%c1_115, %c1_116, %c0_117, %c0_118] : memref<3x3x128x128xbf16, #tpu.memory_space<vmem>>, vector<1x1x128x128xbf16>
    %155 = vector.shape_cast %154 : vector<1x1x128x128xbf16> to vector<128x128xbf16>
    %cst_119 = arith.constant dense<0.000000e+00> : vector<128x128xf32>
    %156 = tpu.matmul %153, %155, %cst_119 {dimension_numbers = #tpu.dot_dimension_numbers<[1], [0], [0], [1], [0, 0, 1, 1], [], []>} : vector<128x128xbf16>, vector<128x128xbf16>, vector<128x128xf32> -> vector<128x128xf32>
    %157 = arith.addf %150, %156 : vector<128x128xf32>
    %c1_120 = arith.constant 1 : index
    %c2_121 = arith.constant 2 : index
    %c0_122 = arith.constant 0 : index
    %158 = vector.load %arg14[%c1_120, %c2_121, %c0_122] : memref<10x24x128xf32, #tpu.memory_space<vmem>>, vector<8x16x128xf32>
    %159 = vector.shape_cast %158 : vector<8x16x128xf32> to vector<128x128xf32>
    %160 = arith.truncf %159 : vector<128x128xf32> to vector<128x128xbf16>
    %c1_123 = arith.constant 1 : index
    %c2_124 = arith.constant 2 : index
    %c0_125 = arith.constant 0 : index
    %c0_126 = arith.constant 0 : index
    %161 = vector.load %arg4[%c1_123, %c2_124, %c0_125, %c0_126] : memref<3x3x128x128xbf16, #tpu.memory_space<vmem>>, vector<1x1x128x128xbf16>
    %162 = vector.shape_cast %161 : vector<1x1x128x128xbf16> to vector<128x128xbf16>
    %cst_127 = arith.constant dense<0.000000e+00> : vector<128x128xf32>
    %163 = tpu.matmul %160, %162, %cst_127 {dimension_numbers = #tpu.dot_dimension_numbers<[1], [0], [0], [1], [0, 0, 1, 1], [], []>} : vector<128x128xbf16>, vector<128x128xbf16>, vector<128x128xf32> -> vector<128x128xf32>
    %164 = arith.addf %157, %163 : vector<128x128xf32>
    %c2_128 = arith.constant 2 : index
    %c0_129 = arith.constant 0 : index
    %c0_130 = arith.constant 0 : index
    %165 = vector.load %arg14[%c2_128, %c0_129, %c0_130] : memref<10x24x128xf32, #tpu.memory_space<vmem>>, vector<8x16x128xf32>
    %166 = vector.shape_cast %165 : vector<8x16x128xf32> to vector<128x128xf32>
    %167 = arith.truncf %166 : vector<128x128xf32> to vector<128x128xbf16>
    %c2_131 = arith.constant 2 : index
    %c0_132 = arith.constant 0 : index
    %c0_133 = arith.constant 0 : index
    %c0_134 = arith.constant 0 : index
    %168 = vector.load %arg4[%c2_131, %c0_132, %c0_133, %c0_134] : memref<3x3x128x128xbf16, #tpu.memory_space<vmem>>, vector<1x1x128x128xbf16>
    %169 = vector.shape_cast %168 : vector<1x1x128x128xbf16> to vector<128x128xbf16>
    %cst_135 = arith.constant dense<0.000000e+00> : vector<128x128xf32>
    %170 = tpu.matmul %167, %169, %cst_135 {dimension_numbers = #tpu.dot_dimension_numbers<[1], [0], [0], [1], [0, 0, 1, 1], [], []>} : vector<128x128xbf16>, vector<128x128xbf16>, vector<128x128xf32> -> vector<128x128xf32>
    %171 = arith.addf %164, %170 : vector<128x128xf32>
    %c2_136 = arith.constant 2 : index
    %c1_137 = arith.constant 1 : index
    %c0_138 = arith.constant 0 : index
    %172 = vector.load %arg14[%c2_136, %c1_137, %c0_138] : memref<10x24x128xf32, #tpu.memory_space<vmem>>, vector<8x16x128xf32>
    %173 = vector.shape_cast %172 : vector<8x16x128xf32> to vector<128x128xf32>
    %174 = arith.truncf %173 : vector<128x128xf32> to vector<128x128xbf16>
    %c2_139 = arith.constant 2 : index
    %c1_140 = arith.constant 1 : index
    %c0_141 = arith.constant 0 : index
    %c0_142 = arith.constant 0 : index
    %175 = vector.load %arg4[%c2_139, %c1_140, %c0_141, %c0_142] : memref<3x3x128x128xbf16, #tpu.memory_space<vmem>>, vector<1x1x128x128xbf16>
    %176 = vector.shape_cast %175 : vector<1x1x128x128xbf16> to vector<128x128xbf16>
    %cst_143 = arith.constant dense<0.000000e+00> : vector<128x128xf32>
    %177 = tpu.matmul %174, %176, %cst_143 {dimension_numbers = #tpu.dot_dimension_numbers<[1], [0], [0], [1], [0, 0, 1, 1], [], []>} : vector<128x128xbf16>, vector<128x128xbf16>, vector<128x128xf32> -> vector<128x128xf32>
    %178 = arith.addf %171, %177 : vector<128x128xf32>
    %c2_144 = arith.constant 2 : index
    %c2_145 = arith.constant 2 : index
    %c0_146 = arith.constant 0 : index
    %179 = vector.load %arg14[%c2_144, %c2_145, %c0_146] : memref<10x24x128xf32, #tpu.memory_space<vmem>>, vector<8x16x128xf32>
    %180 = vector.shape_cast %179 : vector<8x16x128xf32> to vector<128x128xf32>
    %181 = arith.truncf %180 : vector<128x128xf32> to vector<128x128xbf16>
    %c2_147 = arith.constant 2 : index
    %c2_148 = arith.constant 2 : index
    %c0_149 = arith.constant 0 : index
    %c0_150 = arith.constant 0 : index
    %182 = vector.load %arg4[%c2_147, %c2_148, %c0_149, %c0_150] : memref<3x3x128x128xbf16, #tpu.memory_space<vmem>>, vector<1x1x128x128xbf16>
    %183 = vector.shape_cast %182 : vector<1x1x128x128xbf16> to vector<128x128xbf16>
    %cst_151 = arith.constant dense<0.000000e+00> : vector<128x128xf32>
    %184 = tpu.matmul %181, %183, %cst_151 {dimension_numbers = #tpu.dot_dimension_numbers<[1], [0], [0], [1], [0, 0, 1, 1], [], []>} : vector<128x128xbf16>, vector<128x128xbf16>, vector<128x128xf32> -> vector<128x128xf32>
    %185 = arith.addf %178, %184 : vector<128x128xf32>
    %c0_152 = arith.constant 0 : index
    %c0_153 = arith.constant 0 : index
    %186 = vector.load %arg8[%c0_152, %c0_153] : memref<1x128xf32, #tpu.memory_space<vmem>>, vector<1x128xf32>
    %187 = vector.shape_cast %186 : vector<1x128xf32> to vector<128xf32>
    %188 = vector.shape_cast %187 : vector<128xf32> to vector<1x128xf32>
    %189 = vector.broadcast %188 : vector<1x128xf32> to vector<128x128xf32>
    %190 = arith.mulf %185, %189 : vector<128x128xf32>
    %c0_154 = arith.constant 0 : index
    %c0_155 = arith.constant 0 : index
    %191 = vector.load %arg9[%c0_154, %c0_155] : memref<1x128xf32, #tpu.memory_space<vmem>>, vector<1x128xf32>
    %192 = vector.shape_cast %191 : vector<1x128xf32> to vector<128xf32>
    %193 = vector.shape_cast %192 : vector<128xf32> to vector<1x128xf32>
    %194 = vector.broadcast %193 : vector<1x128xf32> to vector<128x128xf32>
    %195 = arith.addf %190, %194 : vector<128x128xf32>
    %c2_i32_156 = arith.constant 2 : i32
    %196 = arith.addi %4, %c2_i32_156 : i32
    %197 = arith.index_cast %196 : i32 to index
    %c8_157 = arith.constant 8 : index
    %c0_158 = arith.constant 0 : index
    %198 = vector.load %arg13[%197, %c8_157, %c0_158] : memref<20x32x128xf32, #tpu.memory_space<vmem>>, vector<8x16x128xf32>
    %199 = vector.shape_cast %198 : vector<8x16x128xf32> to vector<128x128xf32>
    %200 = arith.truncf %199 : vector<128x128xf32> to vector<128x128xbf16>
    %c0_159 = arith.constant 0 : index
    %c0_160 = arith.constant 0 : index
    %201 = vector.load %arg5[%c0_159, %c0_160] : memref<128x128xbf16, #tpu.memory_space<vmem>>, vector<128x128xbf16>
    %cst_161 = arith.constant dense<0.000000e+00> : vector<128x128xf32>
    %202 = tpu.matmul %200, %201, %cst_161 {dimension_numbers = #tpu.dot_dimension_numbers<[1], [0], [0], [1], [0, 0, 1, 1], [], []>} : vector<128x128xbf16>, vector<128x128xbf16>, vector<128x128xf32> -> vector<128x128xf32>
    %c0_162 = arith.constant 0 : index
    %c0_163 = arith.constant 0 : index
    %203 = vector.load %arg10[%c0_162, %c0_163] : memref<1x128xf32, #tpu.memory_space<vmem>>, vector<1x128xf32>
    %204 = vector.shape_cast %203 : vector<1x128xf32> to vector<128xf32>
    %205 = vector.shape_cast %204 : vector<128xf32> to vector<1x128xf32>
    %206 = vector.broadcast %205 : vector<1x128xf32> to vector<128x128xf32>
    %207 = arith.mulf %202, %206 : vector<128x128xf32>
    %c0_164 = arith.constant 0 : index
    %c0_165 = arith.constant 0 : index
    %208 = vector.load %arg11[%c0_164, %c0_165] : memref<1x128xf32, #tpu.memory_space<vmem>>, vector<1x128xf32>
    %209 = vector.shape_cast %208 : vector<1x128xf32> to vector<128xf32>
    %210 = vector.shape_cast %209 : vector<128xf32> to vector<1x128xf32>
    %211 = vector.broadcast %210 : vector<1x128xf32> to vector<128x128xf32>
    %212 = arith.addf %207, %211 : vector<128x128xf32>
    %213 = arith.addf %195, %212 : vector<128x128xf32>
    %cst_166 = arith.constant 0.000000e+00 : f32
    %214 = vector.broadcast %cst_166 : f32 to vector<128x128xf32>
    %215 = arith.maximumf %213, %214 : vector<128x128xf32>
    %c0_167 = arith.constant 0 : index
    %c0_168 = arith.constant 0 : index
    %c0_169 = arith.constant 0 : index
    %216 = vector.load %arg12[%c0_167, %c0_168, %c0_169] : memref<1x128x128xf32, #tpu.memory_space<vmem>>, vector<1x128x128xf32>
    %217 = vector.shape_cast %216 : vector<1x128x128xf32> to vector<128x128xf32>
    %218 = vector.shape_cast %215 : vector<128x128xf32> to vector<1x128x128xf32>
    tpu.vector_store %arg12[%c0_167, %c0_168, %c0_169], %218 {strides = array<i32>} : memref<1x128x128xf32, #tpu.memory_space<vmem>>, vector<1x128x128xf32>,
    return
  }
  func.func @transform_0(%arg0: i32, %arg1: i32) -> (i32, i32, i32, i32) {
    %c0_i32 = arith.constant 0 : i32
    %c0_i32_0 = arith.constant 0 : i32
    %c0_i32_1 = arith.constant 0 : i32
    %c0_i32_2 = arith.constant 0 : i32
    return %arg0, %c0_i32, %c0_i32_0, %c0_i32_1 : i32, i32, i32, i32
  }
  func.func @transform_1(%arg0: i32, %arg1: i32) -> (i32, i32, i32, i32) {
    %c0_i32 = arith.constant 0 : i32
    %c0_i32_0 = arith.constant 0 : i32
    %c0_i32_1 = arith.constant 0 : i32
    %c0_i32_2 = arith.constant 0 : i32
    %c0_i32_3 = arith.constant 0 : i32
    return %c0_i32, %c0_i32_0, %c0_i32_1, %c0_i32_2 : i32, i32, i32, i32
  }
  func.func @transform_2(%arg0: i32, %arg1: i32) -> (i32, i32, i32, i32) {
    %c0_i32 = arith.constant 0 : i32
    %c0_i32_0 = arith.constant 0 : i32
    %c0_i32_1 = arith.constant 0 : i32
    %c0_i32_2 = arith.constant 0 : i32
    %c0_i32_3 = arith.constant 0 : i32
    return %c0_i32, %c0_i32_0, %c0_i32_1, %c0_i32_2 : i32, i32, i32, i32
  }
  func.func @transform_3(%arg0: i32, %arg1: i32) -> (i32, i32) {
    %c0_i32 = arith.constant 0 : i32
    %c0_i32_0 = arith.constant 0 : i32
    %c0_i32_1 = arith.constant 0 : i32
    return %c0_i32, %c0_i32_0 : i32, i32
  }
  func.func @transform_4(%arg0: i32, %arg1: i32) -> (i32, i32) {
    %c0_i32 = arith.constant 0 : i32
    %c0_i32_0 = arith.constant 0 : i32
    %c0_i32_1 = arith.constant 0 : i32
    return %c0_i32, %c0_i32_0 : i32, i32
  }
  func.func @transform_5(%arg0: i32, %arg1: i32) -> (i32, i32) {
    %c0_i32 = arith.constant 0 : i32
    %c0_i32_0 = arith.constant 0 : i32
    %c0_i32_1 = arith.constant 0 : i32
    return %c0_i32, %c0_i32_0 : i32, i32
  }
  func.func @transform_6(%arg0: i32, %arg1: i32) -> (i32, i32) {
    %c0_i32 = arith.constant 0 : i32
    %c0_i32_0 = arith.constant 0 : i32
    %c0_i32_1 = arith.constant 0 : i32
    return %c0_i32, %c0_i32_0 : i32, i32
  }
  func.func @transform_7(%arg0: i32, %arg1: i32) -> (i32, i32) {
    %c0_i32 = arith.constant 0 : i32
    %c0_i32_0 = arith.constant 0 : i32
    %c0_i32_1 = arith.constant 0 : i32
    return %c0_i32, %c0_i32_0 : i32, i32
  }
  func.func @transform_8(%arg0: i32, %arg1: i32) -> (i32, i32) {
    %c0_i32 = arith.constant 0 : i32
    %c0_i32_0 = arith.constant 0 : i32
    %c0_i32_1 = arith.constant 0 : i32
    return %c0_i32, %c0_i32_0 : i32, i32
  }
  func.func @transform_9(%arg0: i32, %arg1: i32) -> (i32, i32) {
    %c0_i32 = arith.constant 0 : i32
    %c0_i32_0 = arith.constant 0 : i32
    %c0_i32_1 = arith.constant 0 : i32
    return %c0_i32, %c0_i32_0 : i32, i32
  }
  func.func @transform_10(%arg0: i32, %arg1: i32) -> (i32, i32, i32) {
    %c0_i32 = arith.constant 0 : i32
    %c0_i32_0 = arith.constant 0 : i32
    return %arg0, %arg1, %c0_i32 : i32, i32, i32
  }
}

</mosaic_0001>

<bundles_post_ra>
// kernel: tpu_custom_call.1
= control target key start
LH: loop header
LB: loop body
LE: loop exit
PB: predicated region body
PF: predicated region fallthrough
CT: control target
= control target key end

     0   :  { %s10973_s0 = inlined_call_operand.hbm [shape: bf16[2,16,16,128], index: 0, kind: input, shape index: {}]   ;;  %s10974_s1 = inlined_call_operand.hbm [shape: bf16[3,3,128,128], index: 1, kind: input, shape index: {}]   ;;  %s10975_s2 = inlined_call_operand.hbm [shape: bf16[3,3,128,128], index: 2, kind: input, shape index: {}]   ;;  %s10976_s3 = inlined_call_operand.hbm [shape: bf16[128,128], index: 3, kind: input, shape index: {}]   ;;  %s10977_s4 = inlined_call_operand.vmem [shape: f32[1,128], index: 4, kind: input, shape index: {}]   ;;  %s10978_s5 = inlined_call_operand.vmem [shape: f32[1,128], index: 5, kind: input, shape index: {}]   ;;  %s10979_s6 = inlined_call_operand.vmem [shape: f32[1,128], index: 6, kind: input, shape index: {}]   ;;  %s10980_s7 = inlined_call_operand.vmem [shape: f32[1,128], index: 7, kind: input, shape index: {}]   ;;  %s10981_s8 = inlined_call_operand.vmem [shape: f32[1,128], index: 8, kind: input, shape index: {}]   ;;  %s10982_s9 = inlined_call_operand.vmem [shape: f32[1,128], index: 9, kind: input, shape index: {}]   ;;  %s10983_s10 = inlined_call_operand.hbm [shape: f32[2,256,128], index: 10, kind: output, shape index: {}]  }
   0x1   :  { %11044 = sst [smem:[#allocation22_spill]] %s10974_s1 }
   0x2   :  { %11045 = sst [smem:[#allocation23_spill]] %s10975_s2 }
   0x3   :  { %11046 = sst [smem:[#allocation24_spill]] %s10977_s4 }
   0x4   :  { %11047 = sst [smem:[#allocation25_spill]] %s10978_s5 }
   0x5   :  { %11048 = sst [smem:[#allocation26_spill]] %s10979_s6 }
   0x6   :  { %11049 = sst [smem:[#allocation27_spill]] %s10980_s7 }
   0x7   :  { %11050 = sst [smem:[#allocation28_spill]] %s10981_s8 }
   0x8   :  { %11051 = sst [smem:[#allocation29_spill]] %s10982_s9 }
   0x9   :  { %11052 = sst [smem:[#allocation30_spill]] %s10983_s10 }
   0xa   :  { %15 = vsyncpa [#allocation5], 0 }
   0xb   :  { %17 = vsyncpa [#allocation5 + $0x1], 0 }
   0xc   :  { %18 = vsyncpa [#allocation8], 0 }
   0xd   :  { %19 = vsyncpa [#allocation11], 0 }
   0xe   :  { %20 = vsyncpa [#allocation6], 0 }
   0xf   :  { %22 = vsyncpa [#allocation6 + $0x1], 0  ;;  %s8872_s13 = smov 0   ;;  %s8874_s14 = smov 0  }
  0x10   :  { %s8876_s15 = smov 0   ;;  %s8878_s16 = smov 0  }
  0x11   :  { %s8880_s17 = smov 0   ;;  %s8882_s18 = smov 0  }
  0x12   :  { %s8884_s19 = smov 0   ;;  %s8886_s20 = smov 0  }
  0x13   :  { %s8888_s21 = smov 0   ;;  %s8890_s22 = smov 0  }
  0x14   :  { %s8892_s23 = smov 0  }
  0x15 LB: > { %11053 = sst [smem:[#allocation17_spill]] %s8763_s13  ;;  %s5793_s24 = sadd.s32 4294967295, %s8803_s23   ;;  %s8803_s23 = sphi %s8892_s23, %s28_s23   ;;  %s8799_s22 = sphi %s8890_s22, %s11189_s22   ;;  %s8795_s21 = sphi %s8888_s21, %s11188_s21   ;;  %s8791_s20 = sphi %s8886_s20, %s11187_s20   ;;  %s8787_s19 = sphi %s8884_s19, %s11186_s19   ;;  %s8783_s18 = sphi %s8882_s18, %s11185_s18   ;;  %s8779_s17 = sphi %s8880_s17, %s11184_s17   ;;  %s8775_s16 = sphi %s8878_s16, %s11183_s16   ;;  %s8771_s15 = sphi %s8876_s15, %s11182_s15   ;;  %s8767_s14 = sphi %s8874_s14, %s11181_s14   ;;  %s8763_s13 = sphi %s8872_s13, %s11180_s13  }
  0x16   : > { %11054 = sst [smem:[#allocation18_spill]] %s8791_s20  ;;  %s5794_s25 = sadd.s32 4294967294, %s8803_s23  }
  0x17   : > { %p60_p0 = scmp.ne.s32.totalorder %s8779_s17, %s8775_s16  ;;  %p8928_p1 = scmp.eq.s32.totalorder %s5793_s24, 0 }
  0x18   : > { %p274_p2 = scmp.ne.s32.totalorder %s8771_s15, %s8767_s14  ;;  %p275_p4 = scmp.eq.s32.totalorder %s5793_s24, 3 }
  0x19   : > { %s11055_s26 = scalar_select %p8928_p1, 1, 0 }
  0x1a   : > { %p8937_p3 = por %p8928_p1, %p60_p0  ;;  %p280_p5 = scmp.ne.s32.totalorder %s8767_s14, %s8763_s13 }
  0x1b   : > { %p281_p6 = scmp.eq.s32.totalorder %s5794_s25, 3  ;;  %p8943_p7 = por %p275_p4, %p274_p2 }
  0x1c   : > { %s11056_s28 = scalar_select %p8937_p3, 1, 0 }
  0x1d   : > { %s11057_s29 = scalar_select %p8943_p7, 1, 0 }
  0x1e   : > { %p5795_p8 = scmp.ge.s32.totalorder %s8803_s23, 1  ;;  %p8948_p9 = por %p281_p6, %p280_p5 }
  0x1f   : > { %11058 = sst [smem:[#allocation19_spill]] %s11057_s29  ;;  %p288_p10 = scmp.lt.s32.totalorder %s8803_s23, 5 }
  0x20   : > { %s11059_s30 = scalar_select %p8948_p9, 1, 0 }
  0x21   : > { %p8953_p11 = pnand %p5795_p8, %p288_p10  ;;  %s8805_s12 = smov [#allocation7]  }
  0x22   : > { %11060 = sst [smem:[#allocation20_spill]] %s11059_s30  ;;  %s300_s16 = sshll.u32 %s8805_s12, 4  ;;  %s8957_s16 = int_to_ptr.vmem [resolvable:$true] %s300_s16 }
  0x23   : > { %s11061_s11 = scalar_select %p8953_p11, 1, 0 }
  0x24   : > { %p8225_p12 = pneg %p8953_p11  ;;  %s8806_s25 = smov [#allocation9]  }
  0x25   : > { %s313_s27 = sshll.u32 %s8806_s25, 4  ;;  %s8807_s30 = smov [#allocation10]   ;;  %s8967_s27 = int_to_ptr.vmem [resolvable:$true] %s313_s27 }
  0x26   : > { %p8963_p13 = pnand %p8225_p12, %p8928_p1  ;;  %s8969_s13 = sshll.u32 %s8807_s30, 4  ;;  %s327_s13 = int_to_ptr.vmem [resolvable:$true] %s8969_s13 }
  0x27   : > { %s11063_s1 = sld [smem:[#allocation22_spill]] }
  0x28   : > { %p8979_p2 = pneg %p8963_p13 }
  0x2d   : > { %s8559_s12 = scalar_lea.hbm %s11063_s1, 9216 }
  0x2e   : > { %p8560_p0 = scmp.ne.s32.totalorder %s11063_s1, %s8559_s12  ;;  %p8566_p6 = scmp.lt.u32.totalorder %s8559_s12, %s11063_s1 }
  0x30   : > { %p8562_p4 = pnand %p8979_p2, %p8560_p0 }
  0x32   : > { %p8563_p5 = pneg %p8562_p4 }
  0x34   : > { %p8568_p8 = pnand %p8566_p6, %p8563_p5 }
  0x36   : > { %8571 = shalt.err (!%p8568_p8)
}
  0x37   : > { %s8572_s9 = scalar_lea.vmem %s8957_s16, 9216  ;;  %p8580_p7 = scmp.lt.s32.totalorder %s8957_s16, %s8957_s16 }
  0x38   : > { %p8573_p10 = scmp.ne.s32.totalorder %s8957_s16, %s8572_s9  ;;  %p8581_p1 = scmp.lt.s32.totalorder %s8572_s9, %s8572_s9 }
  0x3a   : > { %p8575_p12 = pnand %p8573_p10, %p8979_p2  ;;  %p8582_p0 = por %p8581_p1, %p8580_p7 }
  0x3c   : > { %p8576_p9 = pneg %p8575_p12 }
  0x3e   : > { %p8583_p4 = pnand %p8582_p0, %p8576_p9 }
  0x40   : > { %8586 = shalt.err (!%p8583_p4)
}
  0x41   : > { %s10994_s10 = smov 64   ;;  %s10995_s20 = smov 4  }
  0x42   : > { %8228 = dma.hbm_to_vmem [thread:$0]  (!%p8963_p13), %s11063_s1, 9216, %s8957_s16, [#allocation8], %s10994_s10, %s10994_s10, %s10995_s20  }
  0x43   : > { %s11065_s2 = sld [smem:[#allocation23_spill]] }
  0x49   : > { %s8587_s9 = scalar_lea.hbm %s11065_s2, 9216 }
  0x4a   : > { %p8588_p1 = scmp.ne.s32.totalorder %s11065_s2, %s8587_s9  ;;  %p8594_p5 = scmp.lt.u32.totalorder %s8587_s9, %s11065_s2 }
  0x4c   : > { %p8590_p7 = pnand %p8588_p1, %p8979_p2 }
  0x4e   : > { %p8591_p9 = pneg %p8590_p7 }
  0x50   : > { %p8596_p6 = pnand %p8594_p5, %p8591_p9 }
  0x52   : > { %8599 = shalt.err (!%p8596_p6)
}
  0x53   : > { %s8600_s16 = scalar_lea.vmem %s8967_s27, 9216  ;;  %p8608_p0 = scmp.lt.s32.totalorder %s8967_s27, %s8967_s27 }
  0x54   : > { %p8601_p8 = scmp.ne.s32.totalorder %s8967_s27, %s8600_s16  ;;  %p8609_p4 = scmp.lt.s32.totalorder %s8600_s16, %s8600_s16 }
  0x56   : > { %p8603_p10 = pnand %p8601_p8, %p8979_p2  ;;  %p8610_p1 = por %p8609_p4, %p8608_p0 }
  0x58   : > { %p8604_p12 = pneg %p8603_p10 }
  0x5a   : > { %p8611_p7 = pnand %p8610_p1, %p8604_p12 }
  0x5c   : > { %8614 = shalt.err (!%p8611_p7)
}
  0x5d   : > { %8231 = dma.hbm_to_vmem [thread:$0]  (!%p8963_p13), %s11065_s2, 9216, %s8967_s27, [#allocation8], %s10994_s10, %s10994_s10, %s10995_s20  }
  0x5e   : > { %s8615_s29 = scalar_lea.hbm %s10976_s3, 1024 }
  0x5f   : > { %p8616_p9 = scmp.ne.s32.totalorder %s10976_s3, %s8615_s29  ;;  %p8622_p8 = scmp.lt.u32.totalorder %s8615_s29, %s10976_s3 }
  0x61   : > { %p8618_p5 = pnand %p8616_p9, %p8979_p2 }
  0x63   : > { %p8619_p6 = pneg %p8618_p5 }
  0x65   : > { %p8624_p10 = pnand %p8622_p8, %p8619_p6 }
  0x67   : > { %8627 = shalt.err (!%p8624_p10)
}
  0x68   : > { %s8628_s16 = scalar_lea.vmem %s327_s13, 1024  ;;  %p8636_p1 = scmp.lt.s32.totalorder %s327_s13, %s327_s13 }
  0x69   : > { %p8629_p12 = scmp.ne.s32.totalorder %s327_s13, %s8628_s16  ;;  %p8637_p7 = scmp.lt.s32.totalorder %s8628_s16, %s8628_s16 }
  0x6b   : > { %p8631_p0 = pnand %p8629_p12, %p8979_p2  ;;  %p8638_p3 = por %p8637_p7, %p8636_p1 }
  0x6d   : > { %p8632_p4 = pneg %p8631_p0 }
  0x6f   : > { %p8639_p11 = pnand %p8638_p3, %p8632_p4 }
  0x71   : > { %8642 = shalt.err (!%p8639_p11)
}
  0x72   : > { %8234 = dma.hbm_to_vmem [thread:$0]  (!%p8963_p13), %s10976_s3, 1024, %s327_s13, [#allocation11], %s10994_s10, %s10994_s10, %s10995_s20  }
  0x73   : > { %s37_s7 = sadd.s32 1, %s8795_s21  ;;  %s40_s24 = sadd.s32 1, %s8799_s22 }
  0x74   : > { %p38_p3 = scmp.ge.s32.totalorder %s37_s7, 2  ;;  %s47_s5 = sadd.s32 1, %s8783_s18 }
  0x75   : > { %p54_p11 = scmp.ne.s32.totalorder %s8783_s18, %s8779_s17  ;;  %p55_p2 = scmp.eq.s32.totalorder %s8803_s23, 0 }
  0x76   : > { %s11191_s7 = smov (%p38_p3, %s37_s7), 0  ;;  %s11193_s24 = smov (!%p38_p3, %s40_s24), %s8799_s22 }
  0x77   : > { %s260_s6 = ssub.s32 %s8795_s21, %s11191_s7  ;;  %p42_p9 = scmp.ge.s32.totalorder %s11193_s24, 2 }
  0x78   : > { %p8246_p5 = scmp.lt.s32.totalorder %s8803_s23, 4  ;;  %p9063_p13 = por %p55_p2, %p54_p11 }
  0x79   : > { %s358_s8 = sand.u32 1, %s8783_s18   ;;  %s11195_s24 = smov (%p42_p9, %s11193_s24), 0 }
  0x7a   : > { %s5800_s29 = sshll.u32 %s358_s8, 7  ;;  %s44_s12 = ssub.s32 %s8799_s22, %s11195_s24 }
  0x7b   : > { %p45_p6 = scmp.eq.s32.totalorder %s44_s12, 0  ;;  %s261_s25 = sor.u32 %s260_s6, %s44_s12 }
  0x7c   : > { %p262_p8 = scmp.eq.s32.totalorder %s261_s25, 0  ;;  %s6177_s30 = sshll.u32 %s8799_s22, 11 }
  0x7d   : > { %s9074_s9 = scalar_select %p45_p6, %s8783_s18, %s47_s5  }
  0x7e   : > { %s11067_s16 = sadd.s32 1, %s8771_s15  ;;  %s9084_s20 = scalar_lea.hbm %s10973_s0, %s6177_s30 }
  0x7f   : > { %s9079_s27 = scalar_select %p262_p8, %s8771_s15, %s11067_s16  }
  0x80   : > { %s362_s1 = scalar_lea.vmem [#allocation4], %s5800_s29  ;;  %p9092_p10 = pnand %p8246_p5, %p9063_p13 }
  0x81   : > { %s369_s2 = sshll.u32 %s362_s1, 4  ;;  %s9096_s6 = scalar_lea.sflag [#allocation5], %s358_s8  ;;  %s9086_s2 = int_to_ptr.vmem [resolvable:$true] %s369_s2 }
  0x82   : > { %s8643_s10 = scalar_lea.hbm %s9084_s20, 2048  ;;  %p8645_p0 = pneg %p9092_p10 }
  0x83   : > { %p8644_p12 = scmp.ne.s32.totalorder %s9084_s20, %s8643_s10  ;;  %s8648_s13 = scalar_lea.hbm %s10973_s0, 4096 }
  0x84   : > { %p8649_p7 = scmp.lt.u32.totalorder %s9084_s20, %s10973_s0  ;;  %p8650_p3 = scmp.lt.u32.totalorder %s8648_s13, %s8643_s10 }
  0x85   : > { %p8646_p4 = pnand %p8645_p0, %p8644_p12  ;;  %p8652_p2 = scmp.lt.u32.totalorder %s8643_s10, %s9084_s20 }
  0x86   : > { %p8651_p11 = por %p8650_p3, %p8649_p7 }
  0x87   : > { %p8647_p1 = pneg %p8646_p4 }
  0x88   : > { %p8653_p9 = por %p8652_p2, %p8651_p11 }
  0x8a   : > { %p8654_p5 = pnand %p8653_p9, %p8647_p1 }
  0x8c   : > { %8657 = shalt.err (!%p8654_p5)
}
  0x8d   : > { %s8658_s8 = scalar_lea.vmem %s9086_s2, 2048  ;;  %s8810_s30 = smov [#allocation4]  }
  0x8e   : > { %p8659_p13 = scmp.ne.s32.totalorder %s9086_s2, %s8658_s8  ;;  %s8663_s16 = sshll.u32 %s8810_s30, 4  ;;  %s8664_s16 = int_to_ptr.vmem [resolvable:$false] %s8663_s16 }
  0x8f   : > { %s8665_s4 = scalar_lea.vmem %s8664_s16, 4096  ;;  %p8666_p12 = scmp.lt.s32.totalorder %s9086_s2, %s8664_s16 }
  0x90   : > { %p8661_p6 = pnand %p8659_p13, %p8645_p0  ;;  %p8667_p4 = scmp.lt.s32.totalorder %s8665_s4, %s8658_s8 }
  0x92   : > { %p8662_p8 = pneg %p8661_p6  ;;  %p8668_p7 = por %p8667_p4, %p8666_p12 }
  0x94   : > { %p8669_p3 = pnand %p8668_p7, %p8662_p8 }
  0x96   : > { %8672 = shalt.err (!%p8669_p3)
}
  0x97   : > { %s11069_s10 = smov 4   ;;  %s11070_s1 = smov 64  }
  0x98   : > { %8238 = dma.hbm_to_vmem [thread:$0]  (!%p9092_p10), %s9084_s20, 2048, %s9086_s2, %s9096_s6, %s11070_s1, %s11070_s1, %s11069_s10  }
  0x99   : > { %p11071_p0 = scmp.ne.s32.totalorder %s11061_s11, 0 }
  0x9b   : > { %381 = sbr.rel (%p11071_p0) target bundleno = 1693 (0x69d), region = 60 }
  0xa2   : > { %s383_s29 = sand.u32 1, %s8779_s17   ;;  %p11072_p1 = scmp.ne.s32.totalorder %s11056_s28, 0 }
  0xa3   : > { %s5804_s13 = sshll.u32 %s383_s29, 7  ;;  %s384_s12 = scalar_lea.sflag [#allocation5], %s383_s29 }
  0xa4   : > { %s9130_s25 = scalar_lea.vmem [#allocation4], %s5804_s13 }
  0xa5   : > { %8746 = dma.done.wait (%p11072_p1), %s384_s12, 2048  }
  0xa6   : > { %8748 = vsyncadd (%p11072_p1), %s384_s12, 4294965248  ;;  %p11073_p11 = scmp.ne.s32.totalorder %s11055_s26, 0 }
  0xa8   : > { %8750 = dma.done.wait (%p11073_p11), [#allocation8], 18432  }
  0xa9   : > { %8752 = vsyncadd (%p11073_p11), [#allocation8], 4294948864 }
  0xaa   : > { %8754 = dma.done.wait (%p11073_p11), [#allocation11], 1024  }
  0xab   : > { %8756 = vsyncadd (%p11073_p11), [#allocation11], 4294966272  ;;  %s433_s2 = sand.u32 1, %s8767_s14   ;;  %p5809_p10 = scmp.ne.s32.totalorder %s8787_s19, 0 }
  0xac   : > { %s5808_s11 = sshll.u32 %s433_s2, 7  ;;  %v9151_v0 = vld [vmem:[%s9130_s25] sm:$0xff] (!%p5809_p10)   ;;  %v9154_v1 = vld [vmem:[%s9130_s25 + $0x8] sm:$0xff] (!%p5809_p10)   ;;  %v9157_v2 = vld [vmem:[%s9130_s25 + $0x10] sm:$0xff] (!%p5809_p10)   ;;  %v8811_v3 = vmov (!%p5809_p10), 0.0  }
  0xad   : > { %s9147_s20 = scalar_lea.vmem [#allocation12], %s5808_s11  ;;  %441 = sbr.rel (%p5809_p10) target bundleno = 213 (0xd5), region = 80  ;;  %442 = vst [vmem:[#allocation2] sm:$0xff] (!%p5809_p10), %v8811_v3  ;;  %443 = vst [vmem:[#allocation2 + $0x8] sm:$0xff] (!%p5809_p10), %v8811_v3  ;;  %v6183_v4 = vunpack.c.l.bf16 (!%p5809_p10), %v9151_v0  ;;  %v6184_v5 = vunpack.c.h.bf16 (!%p5809_p10), %v9151_v0  ;;  %v6187_v6 = vunpack.c.l.bf16 (!%p5809_p10), %v9154_v1  ;;  %v6188_v7 = vunpack.c.h.bf16 (!%p5809_p10), %v9154_v1  ;;  %v6247_v8 = vld [vmem:[%s9130_s25 + $0x18] sm:$0xff] (!%p5809_p10)   ;;  %v6248_v9 = vld [vmem:[%s9130_s25 + $0x20] sm:$0xff] (!%p5809_p10)  }
  0xae   : > { %444 = vst [vmem:[#allocation2 + $0x10] sm:$0xff] (!%p5809_p10), %v8811_v3  ;;  %445 = vst [vmem:[#allocation2 + $0x18] sm:$0xff] (!%p5809_p10), %v8811_v3  ;;  %v6249_v10 = vld [vmem:[%s9130_s25 + $0x28] sm:$0xff] (!%p5809_p10)   ;;  %v6191_v11 = vunpack.c.l.bf16 (!%p5809_p10), %v9157_v2  ;;  %v6192_v12 = vunpack.c.h.bf16 (!%p5809_p10), %v9157_v2  ;;  %v6195_v13 = vunpack.c.l.bf16 (!%p5809_p10), %v6247_v8  ;;  %v6196_v14 = vunpack.c.h.bf16 (!%p5809_p10), %v6247_v8  ;;  %v6250_v15 = vld [vmem:[%s9130_s25 + $0x30] sm:$0xff] (!%p5809_p10)  }
  0xaf   : > { %446 = vst [vmem:[#allocation2 + $0x20] sm:$0xff] (!%p5809_p10), %v8811_v3  ;;  %447 = vst [vmem:[#allocation2 + $0x28] sm:$0xff] (!%p5809_p10), %v8811_v3  ;;  %v6251_v16 = vld [vmem:[%s9130_s25 + $0x38] sm:$0xff] (!%p5809_p10)   ;;  %v6252_v17 = vld [vmem:[%s9130_s25 + $0x40] sm:$0xff] (!%p5809_p10)   ;;  %v6199_v18 = vunpack.c.l.bf16 (!%p5809_p10), %v6248_v9  ;;  %v6200_v19 = vunpack.c.h.bf16 (!%p5809_p10), %v6248_v9  ;;  %v6203_v20 = vunpack.c.l.bf16 (!%p5809_p10), %v6249_v10  ;;  %v6204_v21 = vunpack.c.h.bf16 (!%p5809_p10), %v6249_v10 }
  0xb0   : > { %448 = vst [vmem:[#allocation2 + $0x30] sm:$0xff] (!%p5809_p10), %v8811_v3  ;;  %449 = vst [vmem:[#allocation2 + $0x38] sm:$0xff] (!%p5809_p10), %v8811_v3  ;;  %v6253_v22 = vld [vmem:[%s9130_s25 + $0x48] sm:$0xff] (!%p5809_p10)   ;;  %v6254_v23 = vld [vmem:[%s9130_s25 + $0x50] sm:$0xff] (!%p5809_p10)   ;;  %v6207_v25 = vunpack.c.l.bf16 (!%p5809_p10), %v6250_v15  ;;  %v6208_v26 = vunpack.c.h.bf16 (!%p5809_p10), %v6250_v15  ;;  %v6211_v27 = vunpack.c.l.bf16 (!%p5809_p10), %v6251_v16  ;;  %v6212_v28 = vunpack.c.h.bf16 (!%p5809_p10), %v6251_v16 }
  0xb1   : > { %450 = vst [vmem:[#allocation2 + $0x40] sm:$0xff] (!%p5809_p10), %v8811_v3  ;;  %453 = vst [vmem:[#allocation2 + $0x58] sm:$0xff] (!%p5809_p10), %v8811_v3  ;;  %v6255_v24 = vld [vmem:[%s9130_s25 + $0x58] sm:$0xff] (!%p5809_p10)   ;;  %v6256_v29 = vld [vmem:[%s9130_s25 + $0x60] sm:$0xff] (!%p5809_p10)   ;;  %v6215_v31 = vunpack.c.l.bf16 (!%p5809_p10), %v6252_v17  ;;  %v6216_v32 = vunpack.c.h.bf16 (!%p5809_p10), %v6252_v17  ;;  %v6219_v33 = vunpack.c.l.bf16 (!%p5809_p10), %v6253_v22  ;;  %v6220_v34 = vunpack.c.h.bf16 (!%p5809_p10), %v6253_v22 }
  0xb2   : > { %454 = vst [vmem:[#allocation2 + $0x60] sm:$0xff] (!%p5809_p10), %v8811_v3  ;;  %457 = vst [vmem:[#allocation2 + $0x78] sm:$0xff] (!%p5809_p10), %v8811_v3  ;;  %v6257_v30 = vld [vmem:[%s9130_s25 + $0x68] sm:$0xff] (!%p5809_p10)   ;;  %v6258_v35 = vld [vmem:[%s9130_s25 + $0x70] sm:$0xff] (!%p5809_p10)   ;;  %v6223_v37 = vunpack.c.l.bf16 (!%p5809_p10), %v6254_v23  ;;  %v6224_v38 = vunpack.c.h.bf16 (!%p5809_p10), %v6254_v23  ;;  %v6227_v39 = vunpack.c.l.bf16 (!%p5809_p10), %v6255_v24  ;;  %v6228_v40 = vunpack.c.h.bf16 (!%p5809_p10), %v6255_v24 }
  0xb3   : > { %458 = vst [vmem:[#allocation2 + $0x80] sm:$0xff] (!%p5809_p10), %v8811_v3  ;;  %461 = vst [vmem:[#allocation2 + $0x98] sm:$0xff] (!%p5809_p10), %v8811_v3  ;;  %v6259_v36 = vld [vmem:[%s9130_s25 + $0x78] sm:$0xff] (!%p5809_p10)   ;;  %v6231_v41 = vunpack.c.l.bf16 (!%p5809_p10), %v6256_v29  ;;  %v6232_v42 = vunpack.c.h.bf16 (!%p5809_p10), %v6256_v29  ;;  %v6235_v43 = vunpack.c.l.bf16 (!%p5809_p10), %v6257_v30  ;;  %v6236_v44 = vunpack.c.h.bf16 (!%p5809_p10), %v6257_v30 }
  0xb4   : > { %462 = vst [vmem:[#allocation2 + $0xa0] sm:$0xff] %v8811_v3  ;;  %465 = vst [vmem:[#allocation2 + $0xb8] sm:$0xff] %v8811_v3  ;;  %v6239_v45 = vunpack.c.l.bf16 %v6258_v35  ;;  %v6240_v46 = vunpack.c.h.bf16 %v6258_v35  ;;  %v6243_v47 = vunpack.c.l.bf16 %v6259_v36  ;;  %v6244_v48 = vunpack.c.h.bf16 %v6259_v36 }
  0xb5   : > { %466 = vst [vmem:[#allocation2 + $0xc0] sm:$0xff] %v8811_v3  ;;  %469 = vst [vmem:[#allocation2 + $0xd8] sm:$0xff] %v8811_v3 }
  0xb6   : > { %470 = vst [vmem:[#allocation2 + $0xe0] sm:$0xff] %v8811_v3  ;;  %473 = vst [vmem:[#allocation2 + $0xf8] sm:$0xff] %v8811_v3 }
  0xb7   : > { %474 = vst [vmem:[#allocation2 + $0x100] sm:$0xff] %v8811_v3  ;;  %477 = vst [vmem:[#allocation2 + $0x118] sm:$0xff] %v8811_v3 }
  0xb8   : > { %478 = vst [vmem:[#allocation2 + $0x120] sm:$0xff] %v8811_v3  ;;  %481 = vst [vmem:[#allocation2 + $0x138] sm:$0xff] %v8811_v3 }
  0xb9   : > { %482 = vst [vmem:[#allocation2 + $0x140] sm:$0xff] %v8811_v3  ;;  %485 = vst [vmem:[#allocation2 + $0x158] sm:$0xff] %v8811_v3 }
  0xba   : > { %486 = vst [vmem:[#allocation2 + $0x160] sm:$0xff] %v8811_v3  ;;  %489 = vst [vmem:[#allocation2 + $0x178] sm:$0xff] %v8811_v3 }
  0xbb   : > { %490 = vst [vmem:[#allocation2 + $0x180] sm:$0xff] %v8811_v3  ;;  %493 = vst [vmem:[#allocation2 + $0x198] sm:$0xff] %v8811_v3 }
  0xbc   : > { %494 = vst [vmem:[#allocation2 + $0x1a0] sm:$0xff] %v8811_v3  ;;  %497 = vst [vmem:[#allocation2 + $0x1b8] sm:$0xff] %v8811_v3 }
  0xbd   : > { %498 = vst [vmem:[#allocation2 + $0x1c0] sm:$0xff] %v8811_v3  ;;  %501 = vst [vmem:[#allocation2 + $0x1d8] sm:$0xff] %v8811_v3 }
  0xbe   : > { %502 = vst [vmem:[#allocation2 + $0x1e0] sm:$0xff] %v8811_v3  ;;  %505 = vst [vmem:[#allocation2 + $0x1f8] sm:$0xff] %v8811_v3 }
  0xbf   : > { %506 = vst [vmem:[#allocation2 + $0x200] sm:$0xff] %v8811_v3  ;;  %509 = vst [vmem:[#allocation2 + $0x218] sm:$0xff] %v8811_v3 }
  0xc0   : > { %510 = vst [vmem:[#allocation2 + $0x220] sm:$0xff] %v8811_v3  ;;  %513 = vst [vmem:[#allocation2 + $0x238] sm:$0xff] %v8811_v3 }
  0xc1   : > { %514 = vst [vmem:[#allocation2 + $0x240] sm:$0xff] %v8811_v3  ;;  %515 = vst [vmem:[#allocation2 + $0x248] sm:$0xff] %v8811_v3 }
  0xc2   : > { %516 = vst [vmem:[#allocation2 + $0x250] sm:$0xff] %v8811_v3  ;;  %517 = vst [vmem:[#allocation2 + $0x258] sm:$0xff] %v8811_v3 }
  0xc3   : > { %518 = vst [vmem:[#allocation2 + $0x260] sm:$0xff] %v8811_v3  ;;  %519 = vst [vmem:[#allocation2 + $0x268] sm:$0xff] %v8811_v3 }
  0xc4   : > { %520 = vst [vmem:[#allocation2 + $0x270] sm:$0xff] %v8811_v3  ;;  %521 = vst [vmem:[#allocation2 + $0x278] sm:$0xff] %v8811_v3 }
  0xc5   : > { %587 = vst [vmem:[#allocation2 + $0x48] sm:$0xff] %v6183_v4  ;;  %588 = vst [vmem:[#allocation2 + $0x50] sm:$0xff] %v6184_v5 }
  0xc6   : > { %589 = vst [vmem:[#allocation2 + $0x68] sm:$0xff] %v6187_v6  ;;  %590 = vst [vmem:[#allocation2 + $0x70] sm:$0xff] %v6188_v7 }
  0xc7   : > { %591 = vst [vmem:[#allocation2 + $0x88] sm:$0xff] %v6191_v11  ;;  %592 = vst [vmem:[#allocation2 + $0x90] sm:$0xff] %v6192_v12 }
  0xc8   : > { %593 = vst [vmem:[#allocation2 + $0xa8] sm:$0xff] %v6195_v13  ;;  %594 = vst [vmem:[#allocation2 + $0xb0] sm:$0xff] %v6196_v14 }
  0xc9   : > { %595 = vst [vmem:[#allocation2 + $0xc8] sm:$0xff] %v6199_v18  ;;  %596 = vst [vmem:[#allocation2 + $0xd0] sm:$0xff] %v6200_v19 }
  0xca   : > { %597 = vst [vmem:[#allocation2 + $0xe8] sm:$0xff] %v6203_v20  ;;  %598 = vst [vmem:[#allocation2 + $0xf0] sm:$0xff] %v6204_v21 }
  0xcb   : > { %599 = vst [vmem:[#allocation2 + $0x108] sm:$0xff] %v6207_v25  ;;  %600 = vst [vmem:[#allocation2 + $0x110] sm:$0xff] %v6208_v26 }
  0xcc   : > { %601 = vst [vmem:[#allocation2 + $0x128] sm:$0xff] %v6211_v27  ;;  %602 = vst [vmem:[#allocation2 + $0x130] sm:$0xff] %v6212_v28 }
  0xcd   : > { %603 = vst [vmem:[#allocation2 + $0x148] sm:$0xff] %v6215_v31  ;;  %604 = vst [vmem:[#allocation2 + $0x150] sm:$0xff] %v6216_v32 }
  0xce   : > { %605 = vst [vmem:[#allocation2 + $0x168] sm:$0xff] %v6219_v33  ;;  %606 = vst [vmem:[#allocation2 + $0x170] sm:$0xff] %v6220_v34 }
  0xcf   : > { %607 = vst [vmem:[#allocation2 + $0x188] sm:$0xff] %v6223_v37  ;;  %608 = vst [vmem:[#allocation2 + $0x190] sm:$0xff] %v6224_v38 }
  0xd0   : > { %609 = vst [vmem:[#allocation2 + $0x1a8] sm:$0xff] %v6227_v39  ;;  %610 = vst [vmem:[#allocation2 + $0x1b0] sm:$0xff] %v6228_v40 }
  0xd1   : > { %611 = vst [vmem:[#allocation2 + $0x1c8] sm:$0xff] %v6231_v41  ;;  %612 = vst [vmem:[#allocation2 + $0x1d0] sm:$0xff] %v6232_v42 }
  0xd2   : > { %613 = vst [vmem:[#allocation2 + $0x1e8] sm:$0xff] %v6235_v43  ;;  %614 = vst [vmem:[#allocation2 + $0x1f0] sm:$0xff] %v6236_v44 }
  0xd3   : > { %615 = vst [vmem:[#allocation2 + $0x208] sm:$0xff] %v6239_v45  ;;  %616 = vst [vmem:[#allocation2 + $0x210] sm:$0xff] %v6240_v46 }
  0xd4   : > { %617 = vst [vmem:[#allocation2 + $0x228] sm:$0xff] %v6243_v47  ;;  %618 = vst [vmem:[#allocation2 + $0x230] sm:$0xff] %v6244_v48 }
  0xd5 PF: > { %v8349_v49 = vld [vmem:[#allocation7 + $0xc0] sm:$0xff]   ;;  %v8812_v50 = vmov 0.0   ;;  %v8350_v51 = vld [vmem:[#allocation7 + $0xc8] sm:$0xff]   ;;  %vm8813_vm0 = vmmov 0   ;;  %v8351_v52 = vld [vmem:[#allocation7 + $0xd0] sm:$0xff]   ;;  %s6178_s26 = sshll.u32 %s8787_s19, 8 }
  0xd6   : > { %6855 = vmatprep.subr.bf16.mxu0 %v8812_v50  ;;  %6627 = vmatprep.subr.bf16.mxu1 %v8812_v50  ;;  %v8352_v53 = vld [vmem:[#allocation7 + $0xd8] sm:$0xff]   ;;  %v8353_v54 = vld [vmem:[#allocation7 + $0xe0] sm:$0xff]   ;;  %v8354_v55 = vld [vmem:[#allocation7 + $0xe8] sm:$0xff]   ;;  %s9192_s28 = scalar_lea.vmem [#allocation2], %s6178_s26  ;;  %s5810_s5 = sshll.u32 %s8787_s19, 3 }
  0xd7   : > { %6856 = vmatpush3.bf16.msra.mxu0 %v8349_v49  ;;  %6871 = vmatprep.mubr.msk.bf16.mxu0 %vm8813_vm0, %v8812_v50  ;;  %v8355_v56 = vld [vmem:[#allocation7 + $0xf0] sm:$0xff]   ;;  %v8363_v57 = vld [vmem:[#allocation7 + $0x40] sm:$0xff]   ;;  %v8364_v58 = vld [vmem:[#allocation7 + $0x48] sm:$0xff]   ;;  %s6070_s6 = sadd.s32 4294967295, %s5810_s5  ;;  %s11081_s16 = sld [smem:[#allocation24_spill]] }
  0xd8   : > { %6857 = vmatprep.subr.bf16.mxu0 %v8812_v50  ;;  %6643 = vmatprep.mubr.msk.bf16.mxu1 %vm8813_vm0, %v8812_v50  ;;  %v8356_v59 = vld [vmem:[#allocation7 + $0xf8] sm:$0xff]   ;;  %v8366_v62 = vld [vmem:[#allocation7 + $0x50] sm:$0xff]   ;;  %v8357_v0 = vld [vmem:[#allocation7 + $0x100] sm:$0xff]   ;;  %s11082_s1 = sld [smem:[#allocation25_spill]]  ;;  %s11169_s12 = sld [smem:[#allocation26_spill]] }
  0xd9   : > { %6628 = vmatpush3.bf16.msra.mxu1 %v8363_v57  ;;  %v8367_v1 = vld [vmem:[#allocation7 + $0x58] sm:$0xff]   ;;  %v8358_v4 = vld [vmem:[#allocation7 + $0x108] sm:$0xff]   ;;  %v8359_v7 = vld [vmem:[#allocation7 + $0x110] sm:$0xff]   ;;  %s11170_s26 = sld [smem:[#allocation28_spill]]  ;;  %s11173_s4 = sld [smem:[#allocation18_spill]] }
  0xda   : > { %6629 = vmatprep.subr.bf16.mxu1 %v8812_v50  ;;  %v8368_v8 = vld [vmem:[#allocation7 + $0x60] sm:$0xff]   ;;  %v8370_v15 = vld [vmem:[#allocation7 + $0x68] sm:$0xff]   ;;  %v8360_v20 = vld [vmem:[#allocation7 + $0x118] sm:$0xff]   ;;  %s6172_s10 = sshll.u32 %s8787_s19, 4  ;;  %s5667_s13 = sshll.u32 %s9147_s20, 4  ;;  %s10905_s13 = int_to_ptr.vmem [resolvable:$true] %s5667_s13 }
  0xdb   : > { %6858 = vmatpush3.bf16.msra.mxu0 %v8350_v51  ;;  %v5838_v60 = vld [vmem:[%s9192_s28 + $0x26] sm:$0xff]  ;;  %v5839_v61 = vld [vmem:[%s9192_s28 + $0x2e] sm:$0xff]  ;;  %v5840_v2 = vld [vmem:[%s9192_s28 + $0x36] sm:$0xff]  ;;  %s10912_s5 = scalar_lea.sflag [#allocation6], %s433_s2  ;;  %s8814_s8 = smov [#allocation12]  }
  0xdc   : > { %6859 = vmatprep.subr.bf16.mxu0 %v8812_v50  ;;  %v1473_v63 = vpack.c.bf16 %v5839_v61, %v5838_v60  ;;  %v5841_v3 = vld [vmem:[%s9192_s28 + $0x46] sm:$0xff]  ;;  %v9209_v6 = vld [vmem:[%s9192_s28 + $0x2f] sm:$0xff]  ;;  %v9214_v10 = vld [vmem:[%s9192_s28 + $0x37] sm:$0xff]  ;;  %s8677_s30 = sshll.u32 %s8814_s8, 4  ;;  %s8678_s30 = int_to_ptr.vmem [resolvable:$false] %s8677_s30 }
  0xdd   : > { %6630 = vmatpush3.bf16.msra.mxu1 %v8364_v58  ;;  %v9205_v5 = vld [vmem:[%s9192_s28 + $0x27] sm:$0xff]  ;;  %v1474_v11 = vpack.c.bf16 %v5841_v3, %v5840_v2  ;;  %v9221_v13 = vld [vmem:[%s9192_s28 + $0x4f] sm:$0xff]  ;;  %v9224_v14 = vld [vmem:[%s9192_s28 + $0x57] sm:$0xff]  ;;  %p8680_p6 = scmp.lt.s32.totalorder %s10905_s13, %s8678_s30 }
  0xde   : > { %6631 = vmatprep.subr.bf16.mxu1 %v8812_v50  ;;  %v1766_v9 = vpack.c.bf16 %v9209_v6, %v9205_v5  ;;  %v9218_v12 = vld [vmem:[%s9192_s28 + $0x47] sm:$0xff]  ;;  %v1768_v17 = vpack.c.bf16 %v9224_v14, %v9221_v13  ;;  %v9235_v19 = vld [vmem:[%s9192_s28 + $0x56] sm:$0xff] }
  0xdf   : > { %6860 = vmatpush3.bf16.msra.mxu0 %v8351_v52  ;;  %v1767_v16 = vpack.c.bf16 %v9218_v12, %v9214_v10  ;;  %v9232_v18 = vld [vmem:[%s9192_s28 + $0x4e] sm:$0xff]  ;;  %v8371_v21 = vld [vmem:[#allocation7 + $0x70] sm:$0xff]   ;;  %v8362_v32 = vld [vmem:[#allocation7 + $0x128] sm:$0xff]   ;;  %v716_v60 = vpack.c.bf16 %v9221_v13, %v9218_v12 }
  0xe0   : > { %6861 = vmatprep.subr.bf16.mxu0 %v8812_v50  ;;  %v9241_v22 = vld [vmem:[%s9192_s28 + $0x67] sm:$0xff]  ;;  %v9244_v23 = vld [vmem:[%s9192_s28 + $0x6f] sm:$0xff]  ;;  %v1475_v26 = vpack.c.bf16 %v9235_v19, %v9232_v18  ;;  %v9265_v33 = vld [vmem:[%s9192_s28 + $0x77] sm:$0xff] }
  0xe1   : > { %6632 = vmatpush3.bf16.msra.mxu1 %v8366_v62  ;;  %v1769_v24 = vpack.c.bf16 %v9244_v23, %v9241_v22  ;;  %v8361_v25 = vld [vmem:[#allocation7 + $0x120] sm:$0xff]   ;;  %v8372_v27 = vld [vmem:[#allocation7 + $0x78] sm:$0xff]   ;;  %v8365_v37 = vld [vmem:[#allocation7 + $0x130] sm:$0xff]   ;;  %v717_v3 = vpack.c.bf16 %v9241_v22, %v9224_v14 }
  0xe2   : > { %6633 = vmatprep.subr.bf16.mxu1 %v8812_v50  ;;  %v683_v28 = vld [vmem:[%s9192_s28 + $0x7] sm:$0xff]  ;;  %v684_v29 = vld [vmem:[%s9192_s28 + $0xf] sm:$0xff]  ;;  %v685_v39 = vld [vmem:[%s9192_s28 + $0x17] sm:$0xff] }
  0xe3   : > { %6862 = vmatpush3.bf16.msra.mxu0 %v8352_v53  ;;  %v9256_v30 = vld [vmem:[%s9192_s28 + $0x66] sm:$0xff]  ;;  %v9259_v31 = vld [vmem:[%s9192_s28 + $0x6e] sm:$0xff]  ;;  %v713_v35 = vpack.c.bf16 %v684_v29, %v683_v28  ;;  %v9279_v40 = vld [vmem:[%s9192_s28 + $0x76] sm:$0xff]  ;;  %v714_v45 = vpack.c.bf16 %v9205_v5, %v685_v39  ;;  %v715_v53 = vpack.c.bf16 %v9214_v10, %v9209_v6 }
  0xe4   : > { %6863 = vmatprep.subr.bf16.mxu0 %v8812_v50  ;;  %v9268_v34 = vld [vmem:[%s9192_s28 + $0x87] sm:$0xff]  ;;  %v1476_v38 = vpack.c.bf16 %v9259_v31, %v9256_v30  ;;  %v9289_v43 = vld [vmem:[%s9192_s28 + $0x8f] sm:$0xff]  ;;  %v9292_v44 = vld [vmem:[%s9192_s28 + $0x97] sm:$0xff] }
  0xe5   : > { %6634 = vmatpush3.bf16.msra.mxu1 %v8367_v1  ;;  %v1770_v36 = vpack.c.bf16 %v9268_v34, %v9265_v33  ;;  %v9282_v41 = vld [vmem:[%s9192_s28 + $0x86] sm:$0xff]  ;;  %v1771_v46 = vpack.c.bf16 %v9292_v44, %v9289_v43  ;;  %v9302_v48 = vld [vmem:[%s9192_s28 + $0x8e] sm:$0xff]  ;;  %v9307_v49 = vld [vmem:[%s9192_s28 + $0x96] sm:$0xff] }
  0xe6   : > { %6635 = vmatprep.subr.bf16.mxu1 %v8812_v50  ;;  %v8369_v42 = vld [vmem:[#allocation7 + $0x138] sm:$0xff]   ;;  %v1477_v47 = vpack.c.bf16 %v9282_v41, %v9279_v40  ;;  %v9334_v58 = vld [vmem:[%s9192_s28 + $0xb7] sm:$0xff] }
  0xe7   : > { %6864 = vmatpush3.bf16.msra.mxu0 %v8353_v54  ;;  %v9312_v51 = vld [vmem:[%s9192_s28 + $0xa7] sm:$0xff]  ;;  %v9315_v52 = vld [vmem:[%s9192_s28 + $0xaf] sm:$0xff]  ;;  %v9359_v2 = vld [vmem:[%s9192_s28 + $0xd7] sm:$0xff] }
  0xe8   : > { %6865 = vmatprep.subr.bf16.mxu0 %v8812_v50  ;;  %v9327_v57 = vld [vmem:[%s9192_s28 + $0xae] sm:$0xff]  ;;  %v9400_v29 = vld [vmem:[%s9192_s28 + $0xf7] sm:$0xff]  ;;  %v622_v10 = vld [vmem:[%s9192_s28 + $0x6] sm:$0xff] }
  0xe9   : > { %6636 = vmatpush3.bf16.msra.mxu1 %v8368_v8  ;;  %v9356_v1 = vld [vmem:[%s9192_s28 + $0xcf] sm:$0xff]  ;;  %v9521_v6 = vld [vmem:[%s9192_s28 + $0x137] sm:$0xff] }
  0xea   : > { %6637 = vmatprep.subr.bf16.mxu1 %v8812_v50  ;;  %v9368_v8 = vld [vmem:[%s9192_s28 + $0xce] sm:$0xff]  ;;  %v9412_v39 = vld [vmem:[%s9192_s28 + $0xf6] sm:$0xff] }
  0xeb   : > { %6866 = vmatpush3.bf16.msra.mxu0 %v8354_v55  ;;  %v1478_v55 = vpack.c.bf16 %v9307_v49, %v9302_v48  ;;  %v9395_v28 = vld [vmem:[%s9192_s28 + $0xee] sm:$0xff]  ;;  %v5867_v54 = vld [vmem:[%s9192_s28 + $0x156] sm:$0xff] }
  0xec   : > { %6867 = vmatprep.subr.bf16.mxu0 %v8812_v50  ;;  %v8376_v5 = vld [vmem:[#allocation7 + $0x158] sm:$0xff]   ;;  %v624_v13 = vld [vmem:[%s9192_s28 + $0x16] sm:$0xff] }
  0xed   : > { %6638 = vmatpush3.bf16.msra.mxu1 %v8370_v15  ;;  %v9378_v15 = vld [vmem:[%s9192_s28 + $0xe7] sm:$0xff] }
  0xee   : > { %6639 = vmatprep.subr.bf16.mxu1 %v8812_v50  ;;  %v623_v12 = vld [vmem:[%s9192_s28 + $0xe] sm:$0xff] }
  0xef   : > { %6868 = vmatpush3.bf16.msra.mxu0 %v8355_v56  ;;  %v9324_v56 = vld [vmem:[%s9192_s28 + $0xa6] sm:$0xff]  ;;  %v8502_v22 = vld [vmem:[%s9192_s28 + $0x2e] sm:$0xff] }
  0xf0   : > { %6869 = vmatprep.subr.bf16.mxu0 %v8812_v50  ;;  %v1479_v62 = vpack.c.bf16 %v9327_v57, %v9324_v56  ;;  %v8385_v14 = vld [vmem:[#allocation7 + $0x178] sm:$0xff]  }
  0xf1   : > { %6640 = vmatpush3.bf16.msra.mxu1 %v8371_v21  ;;  %v718_v21 = vpack.c.bf16 %v9265_v33, %v9244_v23  ;;  %v8503_v23 = vld [vmem:[%s9192_s28 + $0x36] sm:$0xff] }
  0xf2   : > { %6641 = vmatprep.subr.bf16.mxu1 %v8812_v50 }
  0xf3   : > { %6870 = vmatpush3.bf16.msra.mxu0 %v8356_v59  ;;  %v9337_v59 = vld [vmem:[%s9192_s28 + $0xc7] sm:$0xff] }
  0xf4   : > { %6931 = vmatprep.subr.bf16.mxu0 %v8812_v50 }
  0xf5   : > { %6642 = vmatpush3.bf16.msra.mxu1 %v8372_v27  ;;  %v9390_v27 = vld [vmem:[%s9192_s28 + $0xe6] sm:$0xff] }
  0xf6   : > { %6872 = vmatmul.mubr.bf16.vlgmr.msra.gmra.mrb[0].mxu0 %v1473_v63  ;;  %6703 = vmatprep.subr.bf16.mxu1 %v8812_v50  ;;  %v9346_v63 = vld [vmem:[%s9192_s28 + $0xb6] sm:$0xff] }
  0xf7   : > { %6932 = vmatpush3.bf16.msra.mxu0 %v8357_v0  ;;  %6875 = vmatprep.mubr.msk.bf16.mxu0 %vm8813_vm0, %v8812_v50  ;;  %v9351_v0 = vld [vmem:[%s9192_s28 + $0xc6] sm:$0xff] }
  0xf8   : > { %6933 = vmatprep.subr.bf16.mxu0 %v8812_v50  ;;  %6644 = vmatmul.mubr.bf16.vlgmr.msra.gmra.mrb[0].mxu1 %v713_v35  ;;  %v719_v35 = vpack.c.bf16 %v9289_v43, %v9268_v34  ;;  %v11074_v34 = vpack.c.bf16 %v9315_v52, %v9312_v51  ;;  %v657_v43 = vpack.c.bf16 %v9279_v40, %v9259_v31  ;;  %v8395_v40 = vld [vmem:[#allocation7 + $0x80] sm:$0xff]  }
  0xf9   : > { %6647 = vmatprep.mubr.msk.bf16.mxu1 %vm8813_vm0, %v8812_v50 }
  0xfb   : > { %6934 = vmatpush3.bf16.msra.mxu0 %v8358_v4  ;;  %v8387_v4 = vld [vmem:[#allocation7 + $0x30] sm:$0xff]  }
  0xfc   : > { %6935 = vmatprep.subr.bf16.mxu0 %v8812_v50 }
  0xfe   : > { %6876 = vmatmul.mubr.bf16.gmra.mrb[4].mxu0 %v1474_v11  ;;  %v9371_v11 = vld [vmem:[%s9192_s28 + $0xd6] sm:$0xff] }
  0xff   : > { %6879 = vmatprep.mubr.msk.bf16.mxu0 %vm8813_vm0, %v8812_v50  ;;  %6936 = vmatpush3.bf16.msra.mxu0 %v8359_v7  ;;  %v1480_v7 = vpack.c.bf16 %v9351_v0, %v9346_v63 }
 0x100   : > { %6937 = vmatprep.subr.bf16.mxu0 %v8812_v50  ;;  %6648 = vmatmul.mubr.bf16.gmra.mrb[4].mxu1 %v714_v45  ;;  %v8379_v45 = vld [vmem:[#allocation7] sm:$0xff]  }
 0x101   : > { %6651 = vmatprep.mubr.msk.bf16.mxu1 %vm8813_vm0, %v8812_v50  ;;  %6704 = vmatpush3.bf16.msra.mxu1 %v8379_v45  ;;  %v721_v45 = vpack.c.bf16 %v9334_v58, %v9315_v52  ;;  %v8399_v52 = vld [vmem:[#allocation7 + $0x98] sm:$0xff]  }
 0x102   : > { %6705 = vmatprep.subr.bf16.mxu1 %v8812_v50 }
 0x103   : > { %6938 = vmatpush3.bf16.msra.mxu0 %v8360_v20  ;;  %v9381_v20 = vld [vmem:[%s9192_s28 + $0xef] sm:$0xff] }
 0x104   : > { %6939 = vmatprep.subr.bf16.mxu0 %v8812_v50  ;;  %v11077_v31 = vpack.c.bf16 %v9381_v20, %v9378_v15 }
 0x106   : > { %6880 = vmatmul.mubr.bf16.gmra.mrb[8].mxu0 %v1475_v26  ;;  %v1481_v26 = vpack.c.bf16 %v9371_v11, %v9368_v8 }
 0x107   : > { %6883 = vmatprep.mubr.msk.bf16.mxu0 %vm8813_vm0, %v8812_v50  ;;  %6940 = vmatpush3.bf16.msra.mxu0 %v8361_v25  ;;  %v8386_v25 = vld [vmem:[#allocation7 + $0x28] sm:$0xff]  }
 0x108   : > { %6941 = vmatprep.subr.bf16.mxu0 %v8812_v50  ;;  %6652 = vmatmul.mubr.bf16.gmra.mrb[8].mxu1 %v715_v53  ;;  %v9425_v53 = vld [vmem:[%s9192_s28 + $0x117] sm:$0xff] }
 0x109   : > { %6655 = vmatprep.mubr.msk.bf16.mxu1 %vm8813_vm0, %v8812_v50 }
 0x10b   : > { %6942 = vmatpush3.bf16.msra.mxu0 %v8362_v32  ;;  %v9403_v32 = vld [vmem:[%s9192_s28 + $0x107] sm:$0xff] }
 0x10c   : > { %6943 = vmatprep.subr.bf16.mxu0 %v8812_v50 }
 0x10e   : > { %6884 = vmatmul.mubr.bf16.gmra.mrb[12].mxu0 %v1476_v38  ;;  %v1482_v38 = vpack.c.bf16 %v9395_v28, %v9390_v27 }
 0x10f   : > { %6887 = vmatprep.mubr.msk.bf16.mxu0 %vm8813_vm0, %v8812_v50  ;;  %6944 = vmatpush3.bf16.msra.mxu0 %v8365_v37  ;;  %v8384_v37 = vld [vmem:[#allocation7 + $0x20] sm:$0xff]  }
 0x110   : > { %6945 = vmatprep.subr.bf16.mxu0 %v8812_v50  ;;  %6656 = vmatmul.mubr.bf16.gmra.mrb[12].mxu1 %v716_v60  ;;  %v9460_v60 = vld [vmem:[%s9192_s28 + $0x126] sm:$0xff] }
 0x111   : > { %6659 = vmatprep.mubr.msk.bf16.mxu1 %vm8813_vm0, %v8812_v50 }
 0x113   : > { %6946 = vmatpush3.bf16.msra.mxu0 %v8369_v42  ;;  %v9415_v42 = vld [vmem:[%s9192_s28 + $0x106] sm:$0xff] }
 0x114   : > { %7007 = vmatprep.subr.bf16.mxu0 %v8812_v50 }
 0x116   : > { %6888 = vmatmul.mubr.bf16.gmra.mrb[16].mxu0 %v1477_v47  ;;  %v9422_v47 = vld [vmem:[%s9192_s28 + $0x10f] sm:$0xff] }
 0x117   : > { %6891 = vmatprep.mubr.msk.bf16.mxu0 %vm8813_vm0, %v8812_v50 }
 0x118   : > { %6660 = vmatmul.mubr.bf16.gmra.mrb[16].mxu1 %v717_v3  ;;  %v9437_v3 = vld [vmem:[%s9192_s28 + $0x10e] sm:$0xff] }
 0x119   : > { %6663 = vmatprep.mubr.msk.bf16.mxu1 %vm8813_vm0, %v8812_v50 }
 0x11e   : > { %6892 = vmatmul.mubr.bf16.gmra.mrb[20].mxu0 %v1478_v55  ;;  %v720_v55 = vpack.c.bf16 %v9312_v51, %v9292_v44  ;;  %v659_v44 = vpack.c.bf16 %v9324_v56, %v9307_v49  ;;  %v8398_v49 = vld [vmem:[#allocation7 + $0x90] sm:$0xff]   ;;  %v11079_v51 = vpack.c.bf16 %v9425_v53, %v9422_v47  ;;  %v661_v56 = vpack.c.bf16 %v9368_v8, %v9351_v0  ;;  %v8404_v8 = vld [vmem:[#allocation7 + $0xb8] sm:$0xff]  }
 0x11f   : > { %6895 = vmatprep.mubr.msk.bf16.mxu0 %vm8813_vm0, %v8812_v50  ;;  %v662_v0 = vpack.c.bf16 %v9390_v27, %v9371_v11  ;;  %v5904_v11 = vld [vmem:[%s9192_s28 + $0x14f] sm:$0xff] }
 0x120   : > { %6664 = vmatmul.mubr.bf16.gmra.mrb[20].mxu1 %v718_v21  ;;  %v8380_v21 = vld [vmem:[#allocation7 + $0x8] sm:$0xff]  }
 0x121   : > { %6667 = vmatprep.mubr.msk.bf16.mxu1 %vm8813_vm0, %v8812_v50  ;;  %6706 = vmatpush3.bf16.msra.mxu1 %v8380_v21  ;;  %v8383_v21 = vld [vmem:[#allocation7 + $0x18] sm:$0xff]  }
 0x122   : > { %6707 = vmatprep.subr.bf16.mxu1 %v8812_v50 }
 0x126   : > { %6896 = vmatmul.mubr.bf16.gmra.mrb[24].mxu0 %v1479_v62  ;;  %v1483_v62 = vpack.c.bf16 %v9415_v42, %v9412_v39 }
 0x127   : > { %6899 = vmatprep.mubr.msk.bf16.mxu0 %vm8813_vm0, %v8812_v50 }
 0x128   : > { %6668 = vmatmul.mubr.bf16.gmra.mrb[24].mxu1 %v719_v35  ;;  %v9445_v35 = vld [vmem:[%s9192_s28 + $0x127] sm:$0xff] }
 0x129   : > { %6671 = vmatprep.mubr.msk.bf16.mxu1 %vm8813_vm0, %v8812_v50 }
 0x12e   : > { %6900 = vmatmul.mubr.bf16.gmra.mrb[28].mxu0 %v1480_v7  ;;  %v9440_v7 = vld [vmem:[%s9192_s28 + $0x116] sm:$0xff] }
 0x12f   : > { %6903 = vmatprep.mubr.msk.bf16.mxu0 %vm8813_vm0, %v8812_v50 }
 0x130   : > { %6672 = vmatmul.mubr.bf16.gmra.mrb[28].mxu1 %v720_v55  ;;  %v9466_v55 = vld [vmem:[%s9192_s28 + $0x12e] sm:$0xff] }
 0x131   : > { %6675 = vmatprep.mubr.msk.bf16.mxu1 %vm8813_vm0, %v8812_v50 }
 0x136   : > { %6904 = vmatmul.mubr.bf16.gmra.mrb[32].mxu0 %v1481_v26  ;;  %v8382_v26 = vld [vmem:[#allocation7 + $0x10] sm:$0xff]  }
 0x137   : > { %6907 = vmatprep.mubr.msk.bf16.mxu0 %vm8813_vm0, %v8812_v50  ;;  %6708 = vmatpush3.bf16.msra.mxu1 %v8382_v26  ;;  %v1485_v26 = vpack.c.bf16 %v9466_v55, %v9460_v60 }
 0x138   : > { %6676 = vmatmul.mubr.bf16.gmra.mrb[32].mxu1 %v721_v45  ;;  %6709 = vmatprep.subr.bf16.mxu1 %v8812_v50  ;;  %v722_v45 = vpack.c.bf16 %v9356_v1, %v9337_v59 }
 0x139   : > { %6679 = vmatprep.mubr.msk.bf16.mxu1 %vm8813_vm0, %v8812_v50 }
 0x13b   : > { %6710 = vmatpush3.bf16.msra.mxu1 %v8383_v21  ;;  %v5865_v21 = vld [vmem:[%s9192_s28 + $0x146] sm:$0xff] }
 0x13c   : > { %6711 = vmatprep.subr.bf16.mxu1 %v8812_v50 }
 0x13e   : > { %6908 = vmatmul.mubr.bf16.gmra.mrb[36].mxu0 %v1482_v38  ;;  %v9448_v38 = vld [vmem:[%s9192_s28 + $0x12f] sm:$0xff] }
 0x13f   : > { %6911 = vmatprep.mubr.msk.bf16.mxu0 %vm8813_vm0, %v8812_v50  ;;  %6712 = vmatpush3.bf16.msra.mxu1 %v8384_v37  ;;  %v8388_v37 = vld [vmem:[#allocation7 + $0x38] sm:$0xff]  }
 0x140   : > { %6680 = vmatmul.mubr.bf16.gmra.mrb[36].mxu1 %v722_v45  ;;  %6713 = vmatprep.subr.bf16.mxu1 %v8812_v50  ;;  %v723_v45 = vpack.c.bf16 %v9378_v15, %v9359_v2  ;;  %v5905_v15 = vld [vmem:[%s9192_s28 + $0x157] sm:$0xff] }
 0x141   : > { %6683 = vmatprep.mubr.msk.bf16.mxu1 %vm8813_vm0, %v8812_v50  ;;  %v1780_v27 = vpack.c.bf16 %v5905_v15, %v5904_v11  ;;  %v5938_v11 = vld [vmem:[%s9192_s28 + $0x128] sm:$0xff]  ;;  %v5939_v15 = vld [vmem:[%s9192_s28 + $0x130] sm:$0xff] }
 0x143   : > { %6714 = vmatpush3.bf16.msra.mxu1 %v8386_v25  ;;  %v724_v25 = vpack.c.bf16 %v9400_v29, %v9381_v20  ;;  %v663_v20 = vpack.c.bf16 %v9412_v39, %v9395_v28  ;;  %v8389_v39 = vld [vmem:[#allocation7 + $0x180] sm:$0xff]  }
 0x144   : > { %6715 = vmatprep.subr.bf16.mxu1 %v8812_v50 }
 0x146   : > { %6912 = vmatmul.mubr.bf16.gmra.mrb[40].mxu0 %v1483_v62  ;;  %v1484_v62 = vpack.c.bf16 %v9440_v7, %v9437_v3 }
 0x147   : > { %6915 = vmatprep.mubr.msk.bf16.mxu0 %vm8813_vm0, %v8812_v50  ;;  %6716 = vmatpush3.bf16.msra.mxu1 %v8387_v4  ;;  %v8373_v4 = vld [vmem:[#allocation7 + $0x140] sm:$0xff]  }
 0x148   : > { %6684 = vmatmul.mubr.bf16.gmra.mrb[40].mxu1 %v723_v45  ;;  %6717 = vmatprep.subr.bf16.mxu1 %v8812_v50  ;;  %v726_v45 = vpack.c.bf16 %v9445_v35, %v9425_v53  ;;  %v5916_v53 = vld [vmem:[%s9192_s28 + $0x38] sm:$0xff] }
 0x149   : > { %6687 = vmatprep.mubr.msk.bf16.mxu1 %vm8813_vm0, %v8812_v50 }
 0x14b   : > { %6718 = vmatpush3.bf16.msra.mxu1 %v8388_v37  ;;  %v8375_v37 = vld [vmem:[#allocation7 + $0x150] sm:$0xff]  }
 0x14c   : > { %6779 = vmatprep.subr.bf16.mxu1 %v8812_v50 }
 0x14e   : > { %6916 = vmatmul.mubr.bf16.gmra.mrb[44].mxu0 %v1484_v62  ;;  %v9476_v62 = vld [vmem:[%s9192_s28 + $0x136] sm:$0xff] }
 0x14f   : > { %6919 = vmatprep.mubr.msk.bf16.mxu0 %vm8813_vm0, %v8812_v50  ;;  %v1486_v61 = vpack.c.bf16 %v5865_v21, %v9476_v62 }
 0x150   : > { %6688 = vmatmul.mubr.bf16.gmra.mrb[44].mxu1 %v724_v25  ;;  %v652_v25 = vpack.c.bf16 %v623_v12, %v622_v10  ;;  %v5920_v10 = vld [vmem:[%s9192_s28 + $0x68] sm:$0xff] }
 0x151   : > { %6691 = vmatprep.mubr.msk.bf16.mxu1 %vm8813_vm0, %v8812_v50 }
 0x156   : > { %6920 = vmatmul.mubr.bf16.gmra.mrb[48].mxu0 %v1485_v26  ;;  %v5866_v26 = vld [vmem:[%s9192_s28 + $0x14e] sm:$0xff] }
 0x157   : > { %6923 = vmatprep.mubr.msk.bf16.mxu0 %vm8813_vm0, %v8812_v50  ;;  %v1487_v21 = vpack.c.bf16 %v5867_v54, %v5866_v26  ;;  %v8374_v54 = vld [vmem:[#allocation7 + $0x148] sm:$0xff]   ;;  %v8377_v26 = vld [vmem:[#allocation7 + $0x160] sm:$0xff]  }
 0x15e   : > { %6924 = vmatmul.mubr.bf16.gmra.mrb[52].mxu0 %v1486_v61  ;;  %v725_v61 = vpack.c.bf16 %v9422_v47, %v9403_v32  ;;  %v664_v47 = vpack.c.bf16 %v9437_v3, %v9415_v42  ;;  %v665_v42 = vpack.c.bf16 %v9460_v60, %v9440_v7  ;;  %v8392_v60 = vld [vmem:[#allocation7 + $0x198] sm:$0xff]   ;;  %v666_v7 = vpack.c.bf16 %v9476_v62, %v9466_v55  ;;  %v5921_v55 = vld [vmem:[%s9192_s28 + $0x70] sm:$0xff]  ;;  %v8394_v62 = vld [vmem:[#allocation7 + $0x1a8] sm:$0xff]  }
 0x15f   : > { %6927 = vmatprep.mubr.msk.bf16.mxu0 %vm8813_vm0, %v8812_v50 }
 0x160   : > { %6692 = vmatmul.mubr.bf16.gmra.mrb[48].mxu1 %v725_v61 }
 0x161   : > { %6695 = vmatprep.mubr.msk.bf16.mxu1 %vm8813_vm0, %v8812_v50 }
 0x166   : > { %6928 = vmatmul.mubr.bf16.gmra.mrb[56].mxu0 %v1487_v21  ;;  %v8381_v21 = vld [vmem:[#allocation7 + $0x170] sm:$0xff]  }
 0x167   : > { %6947 = vmatprep.mubr.msk.bf16.mxu0 %vm8813_vm0, %v8812_v50 }
 0x168   : > { %6696 = vmatmul.mubr.bf16.gmra.mrb[52].mxu1 %v726_v45  ;;  %v5918_v45 = vld [vmem:[%s9192_s28 + $0x50] sm:$0xff] }
 0x169   : > { %6699 = vmatprep.mubr.msk.bf16.mxu1 %vm8813_vm0, %v8812_v50 }
 0x16e   : > { %6948 = vmatmul.mubr.bf16.vlgmr.msra.gmra.mrb[0].mxu0 %v1766_v9  ;;  %v727_v9 = vpack.c.bf16 %v9521_v6, %v9448_v38 }
 0x16f   : > { %7008 = vmatpush3.bf16.msra.mxu0 %v8373_v4  ;;  %6951 = vmatprep.mubr.msk.bf16.mxu0 %vm8813_vm0, %v8812_v50  ;;  %v8504_v4 = vld [vmem:[%s9192_s28 + $0x46] sm:$0xff] }
 0x170   : > { %7009 = vmatprep.subr.bf16.mxu0 %v8812_v50  ;;  %6700 = vmatmul.mubr.bf16.gmra.mrb[56].mxu1 %v727_v9  ;;  %v655_v33 = vpack.c.bf16 %v9232_v18, %v8504_v4  ;;  %v11075_v18 = vpack.c.bf16 %v9337_v59, %v9334_v58  ;;  %v11080_v58 = vpack.c.bf16 %v9448_v38, %v9445_v35  ;;  %v8402_v59 = vld [vmem:[#allocation7 + $0xa8] sm:$0xff]   ;;  %v9667_v35 = vld [vmem:[%s9192_s28 + $0x48] sm:$0xff] }
 0x171   : > { %6719 = vmatprep.mubr.msk.bf16.mxu1 %vm8813_vm0, %v8812_v50  ;;  %v8390_v38 = vld [vmem:[#allocation7 + $0x188] sm:$0xff]   ;;  %v2060_v3 = vpack.c.bf16 %v9667_v35, %v5916_v53  ;;  %v1147_v9 = vld [vmem:[%s9192_s28 + $0x8] sm:$0xff] }
 0x173   : > { %7010 = vmatpush3.bf16.msra.mxu0 %v8374_v54  ;;  %v8391_v54 = vld [vmem:[#allocation7 + $0x190] sm:$0xff]  }
 0x174   : > { %7011 = vmatprep.subr.bf16.mxu0 %v8812_v50 }
 0x176   : > { %6952 = vmatmul.mubr.bf16.gmra.mrb[4].mxu0 %v1767_v16  ;;  %v8378_v16 = vld [vmem:[#allocation7 + $0x168] sm:$0xff]  }
 0x177   : > { %6955 = vmatprep.mubr.msk.bf16.mxu0 %vm8813_vm0, %v8812_v50  ;;  %7012 = vmatpush3.bf16.msra.mxu0 %v8375_v37  ;;  %v9680_v37 = vld [vmem:[%s9192_s28 + $0x58] sm:$0xff] }
 0x178   : > { %7013 = vmatprep.subr.bf16.mxu0 %v8812_v50  ;;  %6720 = vmatmul.mubr.bf16.vlgmr.msra.gmra.mrb[0].mxu1 %v652_v25  ;;  %v8397_v25 = vld [vmem:[#allocation7 + $0x1b0] sm:$0xff]  }
 0x179   : > { %6723 = vmatprep.mubr.msk.bf16.mxu1 %vm8813_vm0, %v8812_v50  ;;  %6780 = vmatpush3.bf16.msra.mxu1 %v8395_v40 }
 0x17a   : > { %6781 = vmatprep.subr.bf16.mxu1 %v8812_v50 }
 0x17b   : > { %7014 = vmatpush3.bf16.msra.mxu0 %v8376_v5  ;;  %v2061_v5 = vpack.c.bf16 %v9680_v37, %v5918_v45 }
 0x17c   : > { %7015 = vmatprep.subr.bf16.mxu0 %v8812_v50 }
 0x17e   : > { %6956 = vmatmul.mubr.bf16.gmra.mrb[8].mxu0 %v1768_v17  ;;  %v8501_v17 = vld [vmem:[%s9192_s28 + $0x26] sm:$0xff] }
 0x17f   : > { %6959 = vmatprep.mubr.msk.bf16.mxu0 %vm8813_vm0, %v8812_v50  ;;  %7016 = vmatpush3.bf16.msra.mxu0 %v8377_v26  ;;  %v653_v61 = vpack.c.bf16 %v8501_v17, %v624_v13  ;;  %v1148_v26 = vld [vmem:[%s9192_s28 + $0x10] sm:$0xff]  ;;  %v9703_v13 = vld [vmem:[%s9192_s28 + $0x78] sm:$0xff]  ;;  %v8401_v17 = vld [vmem:[#allocation7 + $0x1b8] sm:$0xff]  }
 0x180   : > { %7017 = vmatprep.subr.bf16.mxu0 %v8812_v50  ;;  %v1177_v12 = vpack.c.bf16 %v1148_v26, %v1147_v9  ;;  %v8407_v26 = vld [vmem:[#allocation7 + $0x1d0] sm:$0xff]  }
 0x181   : > { %6724 = vmatmul.mubr.bf16.gmra.mrb[4].mxu1 %v653_v61 }
 0x182   : > { %6727 = vmatprep.mubr.msk.bf16.mxu1 %vm8813_vm0, %v8812_v50 }
 0x183   : > { %7018 = vmatpush3.bf16.msra.mxu0 %v8378_v16  ;;  %v2062_v16 = vpack.c.bf16 %v5921_v55, %v5920_v10 }
 0x184   : > { %7019 = vmatprep.subr.bf16.mxu0 %v8812_v50 }
 0x186   : > { %6960 = vmatmul.mubr.bf16.gmra.mrb[12].mxu0 %v1769_v24  ;;  %v654_v24 = vpack.c.bf16 %v8503_v23, %v8502_v22  ;;  %v9715_v23 = vld [vmem:[%s9192_s28 + $0x90] sm:$0xff] }
 0x187   : > { %6963 = vmatprep.mubr.msk.bf16.mxu0 %vm8813_vm0, %v8812_v50  ;;  %7020 = vmatpush3.bf16.msra.mxu0 %v8381_v21  ;;  %v1149_v21 = vld [vmem:[%s9192_s28 + $0x18] sm:$0xff] }
 0x188   : > { %7021 = vmatprep.subr.bf16.mxu0 %v8812_v50 }
 0x189   : > { %6728 = vmatmul.mubr.bf16.gmra.mrb[8].mxu1 %v654_v24  ;;  %v5925_v24 = vld [vmem:[%s9192_s28 + $0x98] sm:$0xff] }
 0x18a   : > { %6731 = vmatprep.mubr.msk.bf16.mxu1 %vm8813_vm0, %v8812_v50 }
 0x18b   : > { %7022 = vmatpush3.bf16.msra.mxu0 %v8385_v14  ;;  %v5923_v14 = vld [vmem:[%s9192_s28 + $0x88] sm:$0xff] }
 0x18c   : > { %7083 = vmatprep.subr.bf16.mxu0 %v8812_v50  ;;  %v2063_v22 = vpack.c.bf16 %v5923_v14, %v9703_v13 }
 0x18e   : > { %6964 = vmatmul.mubr.bf16.gmra.mrb[16].mxu0 %v1770_v36  ;;  %v656_v36 = vpack.c.bf16 %v9256_v30, %v9235_v19  ;;  %v11076_v19 = vpack.c.bf16 %v9359_v2, %v9356_v1  ;;  %v658_v30 = vpack.c.bf16 %v9302_v48, %v9282_v41  ;;  %v11078_v41 = vpack.c.bf16 %v9403_v32, %v9400_v29  ;;  %v8403_v1 = vld [vmem:[#allocation7 + $0xb0] sm:$0xff]   ;;  %v9652_v29 = vld [vmem:[%s9192_s28 + $0x28] sm:$0xff]  ;;  %v9655_v32 = vld [vmem:[%s9192_s28 + $0x30] sm:$0xff] }
 0x18f   : > { %6967 = vmatprep.mubr.msk.bf16.mxu0 %vm8813_vm0, %v8812_v50  ;;  %v660_v48 = vpack.c.bf16 %v9346_v63, %v9327_v57  ;;  %v8400_v57 = vld [vmem:[#allocation7 + $0xa0] sm:$0xff]   ;;  %v5903_v63 = vld [vmem:[%s9192_s28 + $0x147] sm:$0xff]  ;;  %v2059_v28 = vpack.c.bf16 %v9655_v32, %v9652_v29  ;;  %v1178_v61 = vpack.c.bf16 %v9652_v29, %v1149_v21  ;;  %v1179_v4 = vpack.c.bf16 %v5916_v53, %v9655_v32  ;;  %v5940_v29 = vld [vmem:[%s9192_s28 + $0x138] sm:$0xff] }
 0x190   : > { %v1779_v2 = vpack.c.bf16 %v5903_v63, %v9521_v6  ;;  %v8393_v6 = vld [vmem:[#allocation7 + $0x1a0] sm:$0xff]   ;;  %v9782_v32 = vld [vmem:[%s9192_s28 + $0x148] sm:$0xff]  ;;  %v9796_v53 = vld [vmem:[%s9192_s28 + $0x158] sm:$0xff] }
 0x191   : > { %6732 = vmatmul.mubr.bf16.gmra.mrb[12].mxu1 %v655_v33  ;;  %v2064_v33 = vpack.c.bf16 %v5925_v24, %v9715_v23  ;;  %v5960_v21 = vld [vmem:[%s9192_s28 + $0x86] sm:$0xff] }
 0x192   : > { %6735 = vmatprep.mubr.msk.bf16.mxu1 %vm8813_vm0, %v8812_v50 }
 0x196   : > { %6968 = vmatmul.mubr.bf16.gmra.mrb[20].mxu0 %v1771_v46  ;;  %v8396_v46 = vld [vmem:[#allocation7 + $0x88] sm:$0xff]  }
 0x197   : > { %6971 = vmatprep.mubr.msk.bf16.mxu0 %vm8813_vm0, %v8812_v50  ;;  %6782 = vmatpush3.bf16.msra.mxu1 %v8396_v46  ;;  %v1182_v46 = vpack.c.bf16 %v9703_v13, %v5921_v55  ;;  %v5959_v55 = vld [vmem:[%s9192_s28 + $0x76] sm:$0xff] }
 0x198   : > { %6783 = vmatprep.subr.bf16.mxu1 %v8812_v50 }
 0x199   : > { %6736 = vmatmul.mubr.bf16.gmra.mrb[16].mxu1 %v656_v36  ;;  %v5927_v36 = vld [vmem:[%s9192_s28 + $0xb0] sm:$0xff] }
 0x19a   : > { %6739 = vmatprep.mubr.msk.bf16.mxu1 %vm8813_vm0, %v8812_v50 }
 0x19b   : > { %6784 = vmatpush3.bf16.msra.mxu1 %v8398_v49  ;;  %v5932_v49 = vld [vmem:[%s9192_s28 + $0xe8] sm:$0xff] }
 0x19c   : > { %6785 = vmatprep.subr.bf16.mxu1 %v8812_v50 }
 0x19e   : > { %6972 = vmatmul.mubr.bf16.gmra.mrb[24].mxu0 %v11074_v34  ;;  %v9725_v34 = vld [vmem:[%s9192_s28 + $0xa8] sm:$0xff] }
 0x19f   : > { %6975 = vmatprep.mubr.msk.bf16.mxu0 %vm8813_vm0, %v8812_v50  ;;  %6786 = vmatpush3.bf16.msra.mxu1 %v8399_v52  ;;  %v1183_v52 = vpack.c.bf16 %v9715_v23, %v5923_v14  ;;  %v5961_v14 = vld [vmem:[%s9192_s28 + $0x8e] sm:$0xff] }
 0x1a0   : > { %6787 = vmatprep.subr.bf16.mxu1 %v8812_v50 }
 0x1a1   : > { %6740 = vmatmul.mubr.bf16.gmra.mrb[20].mxu1 %v657_v43  ;;  %v2065_v43 = vpack.c.bf16 %v5927_v36, %v9725_v34 }
 0x1a2   : > { %6743 = vmatprep.mubr.msk.bf16.mxu1 %vm8813_vm0, %v8812_v50 }
 0x1a3   : > { %6788 = vmatpush3.bf16.msra.mxu1 %v8400_v57  ;;  %v5934_v57 = vld [vmem:[%s9192_s28 + $0xf8] sm:$0xff] }
 0x1a4   : > { %6789 = vmatprep.subr.bf16.mxu1 %v8812_v50 }
 0x1a6   : > { %6976 = vmatmul.mubr.bf16.gmra.mrb[28].mxu0 %v11075_v18  ;;  %v1180_v18 = vpack.c.bf16 %v5918_v45, %v9667_v35 }
 0x1a7   : > { %6979 = vmatprep.mubr.msk.bf16.mxu0 %vm8813_vm0, %v8812_v50  ;;  %6790 = vmatpush3.bf16.msra.mxu1 %v8402_v59  ;;  %v1184_v59 = vpack.c.bf16 %v9725_v34, %v5925_v24  ;;  %v5962_v24 = vld [vmem:[%s9192_s28 + $0x96] sm:$0xff] }
 0x1a8   : > { %6791 = vmatprep.subr.bf16.mxu1 %v8812_v50 }
 0x1a9   : > { %6744 = vmatmul.mubr.bf16.gmra.mrb[24].mxu1 %v658_v30  ;;  %v5929_v30 = vld [vmem:[%s9192_s28 + $0xc8] sm:$0xff] }
 0x1aa   : > { %6747 = vmatprep.mubr.msk.bf16.mxu1 %vm8813_vm0, %v8812_v50 }
 0x1ab   : > { %6792 = vmatpush3.bf16.msra.mxu1 %v8403_v1  ;;  %v5937_v1 = vld [vmem:[%s9192_s28 + $0x118] sm:$0xff] }
 0x1ac   : > { %6793 = vmatprep.subr.bf16.mxu1 %v8812_v50 }
 0x1ae   : > { %6980 = vmatmul.mubr.bf16.gmra.mrb[32].mxu0 %v11076_v19  ;;  %v5928_v19 = vld [vmem:[%s9192_s28 + $0xb8] sm:$0xff] }
 0x1af   : > { %6983 = vmatprep.mubr.msk.bf16.mxu0 %vm8813_vm0, %v8812_v50  ;;  %6794 = vmatpush3.bf16.msra.mxu1 %v8404_v8  ;;  %v2066_v40 = vpack.c.bf16 %v5929_v30, %v5928_v19 }
 0x1b1   : > { %6748 = vmatmul.mubr.bf16.gmra.mrb[28].mxu1 %v659_v44  ;;  %v5930_v44 = vld [vmem:[%s9192_s28 + $0xd0] sm:$0xff] }
 0x1b2   : > { %6751 = vmatprep.mubr.msk.bf16.mxu1 %vm8813_vm0, %v8812_v50 }
 0x1b6   : > { %6984 = vmatmul.mubr.bf16.gmra.mrb[36].mxu0 %v11077_v31  ;;  %v1181_v31 = vpack.c.bf16 %v5920_v10, %v9680_v37  ;;  %v8405_v37 = vld [vmem:[#allocation7 + $0x1c0] sm:$0xff]  }
 0x1b7   : > { %6987 = vmatprep.mubr.msk.bf16.mxu0 %vm8813_vm0, %v8812_v50  ;;  %v5958_v10 = vld [vmem:[%s9192_s28 + $0x6e] sm:$0xff] }
 0x1b9   : > { %6752 = vmatmul.mubr.bf16.gmra.mrb[32].mxu1 %v660_v48 }
 0x1ba   : > { %6755 = vmatprep.mubr.msk.bf16.mxu1 %vm8813_vm0, %v8812_v50 }
 0x1be   : > { %6988 = vmatmul.mubr.bf16.gmra.mrb[40].mxu0 %v11078_v41  ;;  %v5931_v41 = vld [vmem:[%s9192_s28 + $0xd8] sm:$0xff] }
 0x1bf   : > { %6991 = vmatprep.mubr.msk.bf16.mxu0 %vm8813_vm0, %v8812_v50  ;;  %v2067_v48 = vpack.c.bf16 %v5931_v41, %v5930_v44 }
 0x1c1   : > { %6756 = vmatmul.mubr.bf16.gmra.mrb[36].mxu1 %v661_v56 }
 0x1c2   : > { %6759 = vmatprep.mubr.msk.bf16.mxu1 %vm8813_vm0, %v8812_v50 }
 0x1c6   : > { %6992 = vmatmul.mubr.bf16.gmra.mrb[44].mxu0 %v11079_v51  ;;  %v5933_v51 = vld [vmem:[%s9192_s28 + $0xf0] sm:$0xff] }
 0x1c7   : > { %6995 = vmatprep.mubr.msk.bf16.mxu0 %vm8813_vm0, %v8812_v50  ;;  %v2068_v56 = vpack.c.bf16 %v5933_v51, %v5932_v49  ;;  %v9798_v35 = vpack.c.bf16 %v5934_v57, %v5933_v51 }
 0x1c9   : > { %6760 = vmatmul.mubr.bf16.gmra.mrb[40].mxu1 %v662_v0  ;;  %v5936_v0 = vld [vmem:[%s9192_s28 + $0x110] sm:$0xff] }
 0x1ca   : > { %6763 = vmatprep.mubr.msk.bf16.mxu1 %vm8813_vm0, %v8812_v50  ;;  %v2070_v8 = vpack.c.bf16 %v5937_v1, %v5936_v0 }
 0x1ce   : > { %6996 = vmatmul.mubr.bf16.gmra.mrb[48].mxu0 %v11080_v58  ;;  %v5935_v58 = vld [vmem:[%s9192_s28 + $0x108] sm:$0xff] }
 0x1cf   : > { %6999 = vmatprep.mubr.msk.bf16.mxu0 %vm8813_vm0, %v8812_v50  ;;  %v2069_v63 = vpack.c.bf16 %v5935_v58, %v5934_v57 }
 0x1d1   : > { %6764 = vmatmul.mubr.bf16.gmra.mrb[44].mxu1 %v663_v20  ;;  %v9773_v20 = vpack.c.bf16 %v5930_v44, %v5929_v30  ;;  %v5966_v30 = vld [vmem:[%s9192_s28 + $0xc6] sm:$0xff]  ;;  %v5968_v44 = vld [vmem:[%s9192_s28 + $0xd6] sm:$0xff] }
 0x1d2   : > { %6767 = vmatprep.mubr.msk.bf16.mxu1 %vm8813_vm0, %v8812_v50 }
 0x1d6   : > { %7000 = vmatmul.mubr.bf16.gmra.mrb[52].mxu0 %v1779_v2  ;;  %v9764_v2 = vpack.c.bf16 %v5928_v19, %v5927_v36 }
 0x1d7   : > { %7003 = vmatprep.mubr.msk.bf16.mxu0 %vm8813_vm0, %v8812_v50 }
 0x1d9   : > { %6768 = vmatmul.mubr.bf16.gmra.mrb[48].mxu1 %v664_v47  ;;  %v9784_v47 = vpack.c.bf16 %v5932_v49, %v5931_v41  ;;  %v5969_v41 = vld [vmem:[%s9192_s28 + $0xe6] sm:$0xff]  ;;  %v5971_v49 = vld [vmem:[%s9192_s28 + $0xf6] sm:$0xff] }
 0x1da   : > { %6771 = vmatprep.mubr.msk.bf16.mxu1 %vm8813_vm0, %v8812_v50 }
 0x1de   : > { %7004 = vmatmul.mubr.bf16.gmra.mrb[56].mxu0 %v1780_v27  ;;  %v2071_v27 = vpack.c.bf16 %v5939_v15, %v5938_v11 }
 0x1df   : > { %7023 = vmatprep.mubr.msk.bf16.mxu0 %vm8813_vm0, %v8812_v50 }
 0x1e1   : > { %6772 = vmatmul.mubr.bf16.gmra.mrb[52].mxu1 %v665_v42  ;;  %v5954_v42 = vld [vmem:[%s9192_s28 + $0x46] sm:$0xff] }
 0x1e2   : > { %6775 = vmatprep.mubr.msk.bf16.mxu1 %vm8813_vm0, %v8812_v50 }
 0x1e6   : > { %7024 = vmatmul.mubr.bf16.vlgmr.msra.gmra.mrb[0].mxu0 %v2059_v28  ;;  %v2072_v28 = vpack.c.bf16 %v9782_v32, %v5940_v29 }
 0x1e7   : > { %7084 = vmatpush3.bf16.msra.mxu0 %v8389_v39  ;;  %7027 = vmatprep.mubr.msk.bf16.mxu0 %vm8813_vm0, %v8812_v50  ;;  %v9793_v39 = vld [vmem:[%s9192_s28 + $0x150] sm:$0xff] }
 0x1e8   : > { %7085 = vmatprep.subr.bf16.mxu0 %v8812_v50 }
 0x1e9   : > { %6776 = vmatmul.mubr.bf16.gmra.mrb[56].mxu1 %v666_v7  ;;  %v5957_v7 = vld [vmem:[%s9192_s28 + $0x66] sm:$0xff] }
 0x1ea   : > { %6795 = vmatprep.mubr.msk.bf16.mxu1 %vm8813_vm0, %v8812_v50 }
 0x1eb   : > { %7086 = vmatpush3.bf16.msra.mxu0 %v8390_v38  ;;  %v2073_v38 = vpack.c.bf16 %v9796_v53, %v9793_v39 }
 0x1ec   : > { %7087 = vmatprep.subr.bf16.mxu0 %v8812_v50 }
 0x1ee   : > { %7028 = vmatmul.mubr.bf16.gmra.mrb[4].mxu0 %v2060_v3  ;;  %v5955_v3 = vld [vmem:[%s9192_s28 + $0x4e] sm:$0xff] }
 0x1ef   : > { %7031 = vmatprep.mubr.msk.bf16.mxu0 %vm8813_vm0, %v8812_v50  ;;  %7088 = vmatpush3.bf16.msra.mxu0 %v8391_v54  ;;  %v9809_v54 = vpack.c.bf16 %v5936_v0, %v5935_v58  ;;  %v2355_v45 = vpack.c.bf16 %v5955_v3, %v5954_v42  ;;  %v5974_v58 = vld [vmem:[%s9192_s28 + $0x116] sm:$0xff]  ;;  %v5976_v0 = vld [vmem:[%s9192_s28 + $0x12e] sm:$0xff] }
 0x1f0   : > { %7089 = vmatprep.subr.bf16.mxu0 %v8812_v50  ;;  %v5982_v42 = vld [vmem:[%s9192_s28 + $0x16e] sm:$0xff]  ;;  %v5983_v3 = vld [vmem:[%s9192_s28 + $0x176] sm:$0xff] }
 0x1f1   : > { %6796 = vmatmul.mubr.bf16.vlgmr.msra.gmra.mrb[0].mxu1 %v1177_v12  ;;  %v9830_v12 = vpack.c.bf16 %v5940_v29, %v5939_v15  ;;  %v5979_v15 = vld [vmem:[%s9192_s28 + $0x14e] sm:$0xff]  ;;  %v5980_v29 = vld [vmem:[%s9192_s28 + $0x156] sm:$0xff] }
 0x1f2   : > { %6799 = vmatprep.mubr.msk.bf16.mxu1 %vm8813_vm0, %v8812_v50 }
 0x1f3   : > { %7090 = vmatpush3.bf16.msra.mxu0 %v8392_v60  ;;  %v5956_v60 = vld [vmem:[%s9192_s28 + $0x56] sm:$0xff] }
 0x1f4   : > { %7091 = vmatprep.subr.bf16.mxu0 %v8812_v50  ;;  %v2356_v9 = vpack.c.bf16 %v5957_v7, %v5956_v60  ;;  %v5993_v60 = vld [vmem:[%s9192_s28 + $0x4f] sm:$0xff] }
 0x1f6   : > { %7032 = vmatmul.mubr.bf16.gmra.mrb[8].mxu0 %v2061_v5  ;;  %v8406_v5 = vld [vmem:[#allocation7 + $0x1c8] sm:$0xff]  }
 0x1f7   : > { %7035 = vmatprep.mubr.msk.bf16.mxu0 %vm8813_vm0, %v8812_v50  ;;  %7092 = vmatpush3.bf16.msra.mxu0 %v8393_v6  ;;  %v9819_v6 = vpack.c.bf16 %v5938_v11, %v5937_v1  ;;  %v5977_v1 = vld [vmem:[%s9192_s28 + $0x136] sm:$0xff]  ;;  %v5978_v11 = vld [vmem:[%s9192_s28 + $0x146] sm:$0xff] }
 0x1f8   : > { %7093 = vmatprep.subr.bf16.mxu0 %v8812_v50 }
 0x1f9   : > { %6800 = vmatmul.mubr.bf16.gmra.mrb[4].mxu1 %v1178_v61  ;;  %v2358_v61 = vpack.c.bf16 %v5961_v14, %v5960_v21 }
 0x1fa   : > { %6803 = vmatprep.mubr.msk.bf16.mxu1 %vm8813_vm0, %v8812_v50 }
 0x1fb   : > { %7094 = vmatpush3.bf16.msra.mxu0 %v8394_v62  ;;  %v8408_v62 = vld [vmem:[#allocation7 + $0x1d8] sm:$0xff]  }
 0x1fc   : > { %7095 = vmatprep.subr.bf16.mxu0 %v8812_v50 }
 0x1fe   : > { %7036 = vmatmul.mubr.bf16.gmra.mrb[12].mxu0 %v2062_v16  ;;  %v2357_v16 = vpack.c.bf16 %v5959_v55, %v5958_v10  ;;  %v8413_v55 = vld [vmem:[#allocation7 + $0x200] sm:$0xff]  }
 0x1ff   : > { %7039 = vmatprep.mubr.msk.bf16.mxu0 %vm8813_vm0, %v8812_v50  ;;  %7096 = vmatpush3.bf16.msra.mxu0 %v8397_v25  ;;  %v8409_v25 = vld [vmem:[#allocation7 + $0x1e0] sm:$0xff]  }
 0x200   : > { %7097 = vmatprep.subr.bf16.mxu0 %v8812_v50 }
 0x201   : > { %6804 = vmatmul.mubr.bf16.gmra.mrb[8].mxu1 %v1179_v4  ;;  %v5963_v4 = vld [vmem:[%s9192_s28 + $0xa6] sm:$0xff] }
 0x202   : > { %6807 = vmatprep.mubr.msk.bf16.mxu1 %vm8813_vm0, %v8812_v50  ;;  %v2359_v36 = vpack.c.bf16 %v5963_v4, %v5962_v24  ;;  %v8415_v24 = vld [vmem:[#allocation7 + $0x210] sm:$0xff]   ;;  %v5996_v4 = vld [vmem:[%s9192_s28 + $0x6f] sm:$0xff] }
 0x203   : > { %7098 = vmatpush3.bf16.msra.mxu0 %v8401_v17  ;;  %v8410_v17 = vld [vmem:[#allocation7 + $0x1e8] sm:$0xff]  }
 0x204   : > { %7159 = vmatprep.subr.bf16.mxu0 %v8812_v50 }
 0x206   : > { %7040 = vmatmul.mubr.bf16.gmra.mrb[16].mxu0 %v2063_v22  ;;  %v8411_v22 = vld [vmem:[#allocation7 + $0x1f0] sm:$0xff]  }
 0x207   : > { %7043 = vmatprep.mubr.msk.bf16.mxu0 %vm8813_vm0, %v8812_v50 }
 0x209   : > { %6808 = vmatmul.mubr.bf16.gmra.mrb[12].mxu1 %v1180_v18  ;;  %v5964_v18 = vld [vmem:[%s9192_s28 + $0xae] sm:$0xff] }
 0x20a   : > { %6811 = vmatprep.mubr.msk.bf16.mxu1 %vm8813_vm0, %v8812_v50 }
 0x20e   : > { %7044 = vmatmul.mubr.bf16.gmra.mrb[20].mxu0 %v2064_v33  ;;  %v8412_v33 = vld [vmem:[#allocation7 + $0x1f8] sm:$0xff]  }
 0x20f   : > { %7047 = vmatprep.mubr.msk.bf16.mxu0 %vm8813_vm0, %v8812_v50 }
 0x211   : > { %6812 = vmatmul.mubr.bf16.gmra.mrb[16].mxu1 %v1181_v31  ;;  %v5967_v31 = vld [vmem:[%s9192_s28 + $0xce] sm:$0xff] }
 0x212   : > { %6815 = vmatprep.mubr.msk.bf16.mxu1 %vm8813_vm0, %v8812_v50 }
 0x216   : > { %7048 = vmatmul.mubr.bf16.gmra.mrb[24].mxu0 %v2065_v43  ;;  %v5965_v43 = vld [vmem:[%s9192_s28 + $0xb6] sm:$0xff] }
 0x217   : > { %7051 = vmatprep.mubr.msk.bf16.mxu0 %vm8813_vm0, %v8812_v50  ;;  %v2360_v19 = vpack.c.bf16 %v5965_v43, %v5964_v18 }
 0x219   : > { %6816 = vmatmul.mubr.bf16.gmra.mrb[20].mxu1 %v1182_v46  ;;  %v2362_v46 = vpack.c.bf16 %v5969_v41, %v5968_v44  ;;  %v5998_v44 = vld [vmem:[%s9192_s28 + $0x87] sm:$0xff]  ;;  %v5999_v41 = vld [vmem:[%s9192_s28 + $0x8f] sm:$0xff] }
 0x21a   : > { %6819 = vmatprep.mubr.msk.bf16.mxu1 %vm8813_vm0, %v8812_v50 }
 0x21e   : > { %7052 = vmatmul.mubr.bf16.gmra.mrb[28].mxu0 %v2066_v40  ;;  %v2361_v40 = vpack.c.bf16 %v5967_v31, %v5966_v30 }
 0x21f   : > { %7055 = vmatprep.mubr.msk.bf16.mxu0 %vm8813_vm0, %v8812_v50 }
 0x221   : > { %6820 = vmatmul.mubr.bf16.gmra.mrb[24].mxu1 %v1183_v52  ;;  %v5972_v52 = vld [vmem:[%s9192_s28 + $0x106] sm:$0xff] }
 0x222   : > { %6823 = vmatprep.mubr.msk.bf16.mxu1 %vm8813_vm0, %v8812_v50 }
 0x226   : > { %7056 = vmatmul.mubr.bf16.gmra.mrb[32].mxu0 %v2067_v48  ;;  %v5970_v48 = vld [vmem:[%s9192_s28 + $0xee] sm:$0xff] }
 0x227   : > { %7059 = vmatprep.mubr.msk.bf16.mxu0 %vm8813_vm0, %v8812_v50  ;;  %v2363_v51 = vpack.c.bf16 %v5971_v49, %v5970_v48 }
 0x229   : > { %6824 = vmatmul.mubr.bf16.gmra.mrb[28].mxu1 %v1184_v59  ;;  %v5975_v59 = vld [vmem:[%s9192_s28 + $0x126] sm:$0xff] }
 0x22a   : > { %6827 = vmatprep.mubr.msk.bf16.mxu1 %vm8813_vm0, %v8812_v50 }
 0x22e   : > { %7060 = vmatmul.mubr.bf16.gmra.mrb[36].mxu0 %v2068_v56  ;;  %v5973_v56 = vld [vmem:[%s9192_s28 + $0x10e] sm:$0xff] }
 0x22f   : > { %7063 = vmatprep.mubr.msk.bf16.mxu0 %vm8813_vm0, %v8812_v50  ;;  %v2364_v57 = vpack.c.bf16 %v5973_v56, %v5972_v52  ;;  %v2651_v52 = vpack.c.bf16 %v5999_v41, %v5998_v44  ;;  %v6010_v41 = vld [vmem:[%s9192_s28 + $0x107] sm:$0xff] }
 0x231   : > { %6828 = vmatmul.mubr.bf16.gmra.mrb[32].mxu1 %v9764_v2 }
 0x232   : > { %6831 = vmatprep.mubr.msk.bf16.mxu1 %vm8813_vm0, %v8812_v50 }
 0x236   : > { %7064 = vmatmul.mubr.bf16.gmra.mrb[40].mxu0 %v2069_v63  ;;  %v2365_v63 = vpack.c.bf16 %v5975_v59, %v5974_v58  ;;  %v6000_v58 = vld [vmem:[%s9192_s28 + $0x97] sm:$0xff]  ;;  %v6001_v59 = vld [vmem:[%s9192_s28 + $0xa7] sm:$0xff] }
 0x237   : > { %7067 = vmatprep.mubr.msk.bf16.mxu0 %vm8813_vm0, %v8812_v50 }
 0x239   : > { %6832 = vmatmul.mubr.bf16.gmra.mrb[36].mxu1 %v9773_v20 }
 0x23a   : > { %6835 = vmatprep.mubr.msk.bf16.mxu1 %vm8813_vm0, %v8812_v50 }
 0x23e   : > { %7068 = vmatmul.mubr.bf16.gmra.mrb[44].mxu0 %v2070_v8  ;;  %v2366_v8 = vpack.c.bf16 %v5977_v1, %v5976_v0 }
 0x23f   : > { %7071 = vmatprep.mubr.msk.bf16.mxu0 %vm8813_vm0, %v8812_v50 }
 0x241   : > { %6836 = vmatmul.mubr.bf16.gmra.mrb[40].mxu1 %v9784_v47 }
 0x242   : > { %6839 = vmatprep.mubr.msk.bf16.mxu1 %vm8813_vm0, %v8812_v50 }
 0x246   : > { %7072 = vmatmul.mubr.bf16.gmra.mrb[48].mxu0 %v2071_v27  ;;  %v2367_v27 = vpack.c.bf16 %v5979_v15, %v5978_v11  ;;  %v2652_v11 = vpack.c.bf16 %v6001_v59, %v6000_v58  ;;  %v6012_v59 = vld [vmem:[%s9192_s28 + $0x117] sm:$0xff] }
 0x247   : > { %7075 = vmatprep.mubr.msk.bf16.mxu0 %vm8813_vm0, %v8812_v50 }
 0x249   : > { %6840 = vmatmul.mubr.bf16.gmra.mrb[44].mxu1 %v9798_v35 }
 0x24a   : > { %6843 = vmatprep.mubr.msk.bf16.mxu1 %vm8813_vm0, %v8812_v50 }
 0x24e   : > { %7076 = vmatmul.mubr.bf16.gmra.mrb[52].mxu0 %v2072_v28  ;;  %v5981_v28 = vld [vmem:[%s9192_s28 + $0x166] sm:$0xff] }
 0x24f   : > { %7079 = vmatprep.mubr.msk.bf16.mxu0 %vm8813_vm0, %v8812_v50 }
 0x251   : > { %6844 = vmatmul.mubr.bf16.gmra.mrb[48].mxu1 %v9809_v54 }
 0x252   : > { %6847 = vmatprep.mubr.msk.bf16.mxu1 %vm8813_vm0, %v8812_v50 }
 0x256   : > { %7080 = vmatmul.mubr.bf16.gmra.mrb[56].mxu0 %v2073_v38  ;;  %v2368_v38 = vpack.c.bf16 %v5981_v28, %v5980_v29  ;;  %v6003_v29 = vld [vmem:[%s9192_s28 + $0xb7] sm:$0xff] }
 0x257   : > { %7099 = vmatprep.mubr.msk.bf16.mxu0 %vm8813_vm0, %v8812_v50 }
 0x259   : > { %6848 = vmatmul.mubr.bf16.gmra.mrb[52].mxu1 %v9819_v6 }
 0x25a   : > { %6851 = vmatprep.mubr.msk.bf16.mxu1 %vm8813_vm0, %v8812_v50 }
 0x25e   : > { %7100 = vmatmul.mubr.bf16.vlgmr.msra.gmra.mrb[0].mxu0 %v2355_v45  ;;  %v2369_v45 = vpack.c.bf16 %v5983_v3, %v5982_v42 }
 0x25f   : > { %7160 = vmatpush3.bf16.msra.mxu0 %v8405_v37  ;;  %7103 = vmatprep.mubr.msk.bf16.mxu0 %vm8813_vm0, %v8812_v50  ;;  %v5992_v37 = vld [vmem:[%s9192_s28 + $0x47] sm:$0xff] }
 0x260   : > { %7161 = vmatprep.subr.bf16.mxu0 %v8812_v50 }
 0x261   : > { %6852 = vmatmul.mubr.bf16.gmra.mrb[56].mxu1 %v9830_v12 }
 0x263   : > { %7162 = vmatpush3.bf16.msra.mxu0 %v8406_v5 }
 0x264   : > { %7163 = vmatprep.subr.bf16.mxu0 %v8812_v50 }
 0x266   : > { %7104 = vmatmul.mubr.bf16.gmra.mrb[4].mxu0 %v2356_v9 }
 0x267   : > { %7107 = vmatprep.mubr.msk.bf16.mxu0 %vm8813_vm0, %v8812_v50  ;;  %7164 = vmatpush3.bf16.msra.mxu0 %v8407_v26  ;;  %v2648_v26 = vpack.c.bf16 %v5993_v60, %v5992_v37  ;;  %v6004_v37 = vld [vmem:[%s9192_s28 + $0xc7] sm:$0xff]  ;;  %v6005_v60 = vld [vmem:[%s9192_s28 + $0xcf] sm:$0xff] }
 0x268   : > { %7165 = vmatprep.subr.bf16.mxu0 %v8812_v50 }
 0x26b   : > { %7166 = vmatpush3.bf16.msra.mxu0 %v8408_v62  ;;  %v5994_v62 = vld [vmem:[%s9192_s28 + $0x57] sm:$0xff] }
 0x26c   : > { %7167 = vmatprep.subr.bf16.mxu0 %v8812_v50 }
 0x26e   : > { %7108 = vmatmul.mubr.bf16.gmra.mrb[8].mxu0 %v2357_v16  ;;  %v5995_v16 = vld [vmem:[%s9192_s28 + $0x67] sm:$0xff] }
 0x26f   : > { %7111 = vmatprep.mubr.msk.bf16.mxu0 %vm8813_vm0, %v8812_v50  ;;  %7168 = vmatpush3.bf16.msra.mxu0 %v8409_v25  ;;  %v8414_v25 = vld [vmem:[#allocation7 + $0x208] sm:$0xff]  }
 0x270   : > { %7169 = vmatprep.subr.bf16.mxu0 %v8812_v50 }
 0x273   : > { %7170 = vmatpush3.bf16.msra.mxu0 %v8410_v17 }
 0x274   : > { %7171 = vmatprep.subr.bf16.mxu0 %v8812_v50 }
 0x276   : > { %7112 = vmatmul.mubr.bf16.gmra.mrb[12].mxu0 %v2358_v61  ;;  %v2649_v61 = vpack.c.bf16 %v5995_v16, %v5994_v62  ;;  %v6006_v16 = vld [vmem:[%s9192_s28 + $0xd7] sm:$0xff] }
 0x277   : > { %7115 = vmatprep.mubr.msk.bf16.mxu0 %vm8813_vm0, %v8812_v50  ;;  %7172 = vmatpush3.bf16.msra.mxu0 %v8411_v22 }
 0x278   : > { %7173 = vmatprep.subr.bf16.mxu0 %v8812_v50 }
 0x27b   : > { %7174 = vmatpush3.bf16.msra.mxu0 %v8412_v33  ;;  %v5997_v33 = vld [vmem:[%s9192_s28 + $0x77] sm:$0xff] }
 0x27c   : > { %7235 = vmatprep.subr.bf16.mxu0 %v8812_v50  ;;  %v2650_v30 = vpack.c.bf16 %v5997_v33, %v5996_v4  ;;  %v6008_v33 = vld [vmem:[%s9192_s28 + $0xef] sm:$0xff] }
 0x27e   : > { %7116 = vmatmul.mubr.bf16.gmra.mrb[16].mxu0 %v2359_v36  ;;  %v8416_v36 = vld [vmem:[#allocation7 + $0x218] sm:$0xff]  }
 0x27f   : > { %7119 = vmatprep.mubr.msk.bf16.mxu0 %vm8813_vm0, %v8812_v50 }
 0x286   : > { %7120 = vmatmul.mubr.bf16.gmra.mrb[20].mxu0 %v2360_v19 }
 0x287   : > { %7123 = vmatprep.mubr.msk.bf16.mxu0 %vm8813_vm0, %v8812_v50 }
 0x28e   : > { %7124 = vmatmul.mubr.bf16.gmra.mrb[24].mxu0 %v2361_v40  ;;  %v8417_v40 = vld [vmem:[#allocation7 + $0x220] sm:$0xff]  }
 0x28f   : > { %7127 = vmatprep.mubr.msk.bf16.mxu0 %vm8813_vm0, %v8812_v50 }
 0x296   : > { %7128 = vmatmul.mubr.bf16.gmra.mrb[28].mxu0 %v2362_v46  ;;  %v8418_v46 = vld [vmem:[#allocation7 + $0x228] sm:$0xff]  }
 0x297   : > { %7131 = vmatprep.mubr.msk.bf16.mxu0 %vm8813_vm0, %v8812_v50 }
 0x29e   : > { %7132 = vmatmul.mubr.bf16.gmra.mrb[32].mxu0 %v2363_v51 }
 0x29f   : > { %7135 = vmatprep.mubr.msk.bf16.mxu0 %vm8813_vm0, %v8812_v50 }
 0x2a6   : > { %7136 = vmatmul.mubr.bf16.gmra.mrb[36].mxu0 %v2364_v57  ;;  %v8419_v57 = vld [vmem:[#allocation7 + $0x230] sm:$0xff]  }
 0x2a7   : > { %7139 = vmatprep.mubr.msk.bf16.mxu0 %vm8813_vm0, %v8812_v50 }
 0x2ae   : > { %7140 = vmatmul.mubr.bf16.gmra.mrb[40].mxu0 %v2365_v63  ;;  %v8420_v63 = vld [vmem:[#allocation7 + $0x238] sm:$0xff]  }
 0x2af   : > { %7143 = vmatprep.mubr.msk.bf16.mxu0 %vm8813_vm0, %v8812_v50 }
 0x2b6   : > { %7144 = vmatmul.mubr.bf16.gmra.mrb[44].mxu0 %v2366_v8 }
 0x2b7   : > { %7147 = vmatprep.mubr.msk.bf16.mxu0 %vm8813_vm0, %v8812_v50 }
 0x2be   : > { %7148 = vmatmul.mubr.bf16.gmra.mrb[48].mxu0 %v2367_v27  ;;  %v6002_v27 = vld [vmem:[%s9192_s28 + $0xaf] sm:$0xff] }
 0x2bf   : > { %7151 = vmatprep.mubr.msk.bf16.mxu0 %vm8813_vm0, %v8812_v50  ;;  %v2653_v3 = vpack.c.bf16 %v6003_v29, %v6002_v27 }
 0x2c4   : > { %v9890_v7 = vpop.f32.mrb[0].mxu1 }
 0x2c5   : > { %v6797_v5 = vpop.f32.mrb[1].mxu1 }
 0x2c6   : > { %7152 = vmatmul.mubr.bf16.gmra.mrb[52].mxu0 %v2368_v38  ;;  %v9892_v9 = vpop.f32.mrb[2].mxu1 }
 0x2c7   : > { %7155 = vmatprep.mubr.msk.bf16.mxu0 %vm8813_vm0, %v8812_v50  ;;  %v6798_v10 = vpop.f32.mrb[3].mxu1 }
 0x2cc   : > { %v9898_v21 = vpop.f32.mrb[4].mxu1 }
 0x2cd   : > { %v6801_v14 = vpop.f32.mrb[5].mxu1 }
 0x2ce   : > { %7156 = vmatmul.mubr.bf16.gmra.mrb[56].mxu0 %v2369_v45  ;;  %v9901_v17 = vpop.f32.mrb[6].mxu1 }
 0x2cf   : > { %7175 = vmatprep.mubr.msk.bf16.mxu0 %vm8813_vm0, %v8812_v50  ;;  %v6802_v22 = vpop.f32.mrb[7].mxu1 }
 0x2d4   : > { %v9908_v18 = vpop.f32.mrb[8].mxu1 }
 0x2d5   : > { %v6805_v43 = vpop.f32.mrb[9].mxu1 }
 0x2d6   : > { %7176 = vmatmul.mubr.bf16.vlgmr.msra.gmra.mrb[0].mxu0 %v2648_v26  ;;  %v9911_v19 = vpop.f32.mrb[10].mxu1 }
 0x2d7   : > { %7236 = vmatpush3.bf16.msra.mxu0 %v8413_v55  ;;  %7179 = vmatprep.mubr.msk.bf16.mxu0 %vm8813_vm0, %v8812_v50  ;;  %v6806_v31 = vpop.f32.mrb[11].mxu1  ;;  %v2654_v55 = vpack.c.bf16 %v6005_v60, %v6004_v37 }
 0x2d8   : > { %7237 = vmatprep.subr.bf16.mxu0 %v8812_v50 }
 0x2db   : > { %7238 = vmatpush3.bf16.msra.mxu0 %v8414_v25  ;;  %v6007_v25 = vld [vmem:[%s9192_s28 + $0xe7] sm:$0xff] }
 0x2dc   : > { %7239 = vmatprep.subr.bf16.mxu0 %v8812_v50  ;;  %v9918_v48 = vpop.f32.mrb[12].mxu1 }
 0x2dd   : > { %v6809_v49 = vpop.f32.mrb[13].mxu1 }
 0x2de   : > { %7180 = vmatmul.mubr.bf16.gmra.mrb[4].mxu0 %v2649_v61  ;;  %v9921_v51 = vpop.f32.mrb[14].mxu1 }
 0x2df   : > { %7183 = vmatprep.mubr.msk.bf16.mxu0 %vm8813_vm0, %v8812_v50  ;;  %7240 = vmatpush3.bf16.msra.mxu0 %v8415_v24  ;;  %v6810_v56 = vpop.f32.mrb[15].mxu1  ;;  %v2655_v24 = vpack.c.bf16 %v6007_v25, %v6006_v16  ;;  %v6017_v16 = vld [vmem:[%s9192_s28 + $0x14f] sm:$0xff] }
 0x2e0   : > { %7241 = vmatprep.subr.bf16.mxu0 %v8812_v50 }
 0x2e3   : > { %7242 = vmatpush3.bf16.msra.mxu0 %v8416_v36  ;;  %v6009_v36 = vld [vmem:[%s9192_s28 + $0xf7] sm:$0xff] }
 0x2e4   : > { %7243 = vmatprep.subr.bf16.mxu0 %v8812_v50  ;;  %v9928_v0 = vpop.f32.mrb[16].mxu1 }
 0x2e5   : > { %v6813_v1 = vpop.f32.mrb[17].mxu1 }
 0x2e6   : > { %7184 = vmatmul.mubr.bf16.gmra.mrb[8].mxu0 %v2650_v30  ;;  %v9931_v8 = vpop.f32.mrb[18].mxu1 }
 0x2e7   : > { %7187 = vmatprep.mubr.msk.bf16.mxu0 %vm8813_vm0, %v8812_v50  ;;  %7244 = vmatpush3.bf16.msra.mxu0 %v8417_v40  ;;  %v6814_v15 = vpop.f32.mrb[19].mxu1  ;;  %v2656_v40 = vpack.c.bf16 %v6009_v36, %v6008_v33  ;;  %v6018_v36 = vld [vmem:[%s9192_s28 + $0x157] sm:$0xff] }
 0x2e8   : > { %7245 = vmatprep.subr.bf16.mxu0 %v8812_v50 }
 0x2eb   : > { %7246 = vmatpush3.bf16.msra.mxu0 %v8418_v46  ;;  %v6011_v46 = vld [vmem:[%s9192_s28 + $0x10f] sm:$0xff] }
 0x2ec   : > { %7247 = vmatprep.subr.bf16.mxu0 %v8812_v50  ;;  %v9937_v28 = vpop.f32.mrb[20].mxu1 }
 0x2ed   : > { %v6817_v38 = vpop.f32.mrb[21].mxu1 }
 0x2ee   : > { %7188 = vmatmul.mubr.bf16.gmra.mrb[12].mxu0 %v2651_v52  ;;  %v9939_v42 = vpop.f32.mrb[22].mxu1  ;;  %v6014_v38 = vld [vmem:[%s9192_s28 + $0x12f] sm:$0xff] }
 0x2ef   : > { %7191 = vmatprep.mubr.msk.bf16.mxu0 %vm8813_vm0, %v8812_v50  ;;  %7248 = vmatpush3.bf16.msra.mxu0 %v8419_v57  ;;  %v6818_v45 = vpop.f32.mrb[23].mxu1  ;;  %v2657_v57 = vpack.c.bf16 %v6011_v46, %v6010_v41 }
 0x2f0   : > { %7249 = vmatprep.subr.bf16.mxu0 %v8812_v50 }
 0x2f3   : > { %7250 = vmatpush3.bf16.msra.mxu0 %v8420_v63  ;;  %v6013_v63 = vld [vmem:[%s9192_s28 + $0x127] sm:$0xff] }
 0x2f4   : > { %v9945_v5 = vpop.f32.mrb[24].mxu1  ;;  %v2658_v27 = vpack.c.bf16 %v6013_v63, %v6012_v59  ;;  %v6020_v59 = vld [vmem:[%s9192_s28 + $0x16f] sm:$0xff]  ;;  %v6021_v63 = vld [vmem:[%s9192_s28 + $0x177] sm:$0xff] }
 0x2f5   : > { %v6821_v26 = vpop.f32.mrb[25].mxu1 }
 0x2f6   : > { %7192 = vmatmul.mubr.bf16.gmra.mrb[16].mxu0 %v2652_v11  ;;  %v9947_v10 = vpop.f32.mrb[26].mxu1 }
 0x2f7   : > { %7195 = vmatprep.mubr.msk.bf16.mxu0 %vm8813_vm0, %v8812_v50  ;;  %v6822_v62 = vpop.f32.mrb[27].mxu1 }
 0x2f8   : > { %v6016_v62 = vld [vmem:[%s9192_s28 + $0x147] sm:$0xff] }
 0x2fc   : > { %v9953_v14 = vpop.f32.mrb[28].mxu1 }
 0x2fd   : > { %v6825_v61 = vpop.f32.mrb[29].mxu1 }
 0x2fe   : > { %7196 = vmatmul.mubr.bf16.gmra.mrb[20].mxu0 %v2653_v3  ;;  %v9955_v22 = vpop.f32.mrb[30].mxu1  ;;  %v6015_v3 = vld [vmem:[%s9192_s28 + $0x137] sm:$0xff] }
 0x2ff   : > { %7199 = vmatprep.mubr.msk.bf16.mxu0 %vm8813_vm0, %v8812_v50  ;;  %v6826_v4 = vpop.f32.mrb[31].mxu1  ;;  %v2659_v26 = vpack.c.bf16 %v6015_v3, %v6014_v38  ;;  %v2662_v38 = vpack.c.bf16 %v6021_v63, %v6020_v59  ;;  %v10077_v59 = vld [vmem:[%s11081_s16] ss:$0 sm:$0xff]  ;;  %s11172_s16 = sld [smem:[#allocation29_spill]] }
 0x300   : > { %v2660_v4 = vpack.c.bf16 %v6017_v16, %v6016_v62  ;;  %v6032_v16 = vld [vmem:[%s9192_s28 + $0x58] sm:$0xff] }
 0x304   : > { %v9961_v43 = vpop.f32.mrb[32].mxu1 }
 0x305   : > { %v6829_v30 = vpop.f32.mrb[33].mxu1 }
 0x306   : > { %7200 = vmatmul.mubr.bf16.gmra.mrb[24].mxu0 %v2654_v55  ;;  %v9963_v31 = vpop.f32.mrb[34].mxu1  ;;  %v6019_v30 = vld [vmem:[%s9192_s28 + $0x167] sm:$0xff] }
 0x307   : > { %7203 = vmatprep.mubr.msk.bf16.mxu0 %vm8813_vm0, %v8812_v50  ;;  %v6830_v44 = vpop.f32.mrb[35].mxu1  ;;  %v2661_v46 = vpack.c.bf16 %v6019_v30, %v6018_v36  ;;  %v6036_v30 = vld [vmem:[%s9192_s28 + $0x88] sm:$0xff] }
 0x30c   : > { %v9969_v49 = vpop.f32.mrb[36].mxu1 }
 0x30d   : > { %v6833_v52 = vpop.f32.mrb[37].mxu1 }
 0x30e   : > { %7204 = vmatmul.mubr.bf16.gmra.mrb[28].mxu0 %v2655_v24  ;;  %v9971_v56 = vpop.f32.mrb[38].mxu1 }
 0x30f   : > { %7207 = vmatprep.mubr.msk.bf16.mxu0 %vm8813_vm0, %v8812_v50  ;;  %v6834_v58 = vpop.f32.mrb[39].mxu1 }
 0x310   : > { %v8422_v58 = vld [vmem:[#allocation9 + $0x48] sm:$0xff]  }
 0x314   : > { %v9977_v1 = vpop.f32.mrb[40].mxu1 }
 0x315   : > { %v6837_v11 = vpop.f32.mrb[41].mxu1 }
 0x316   : > { %7208 = vmatmul.mubr.bf16.gmra.mrb[32].mxu0 %v2656_v40  ;;  %v9979_v15 = vpop.f32.mrb[42].mxu1 }
 0x317   : > { %7211 = vmatprep.mubr.msk.bf16.mxu0 %vm8813_vm0, %v8812_v50  ;;  %v6838_v29 = vpop.f32.mrb[43].mxu1 }
 0x31c   : > { %v9985_v45 = vpop.f32.mrb[44].mxu1 }
 0x31d   : > { %v6841_v37 = vpop.f32.mrb[45].mxu1 }
 0x31e   : > { %7212 = vmatmul.mubr.bf16.gmra.mrb[36].mxu0 %v2657_v57  ;;  %v9987_v60 = vpop.f32.mrb[46].mxu1  ;;  %v8421_v57 = vld [vmem:[#allocation9 + $0x40] sm:$0xff]   ;;  %v8423_v37 = vld [vmem:[#allocation9 + $0x50] sm:$0xff]  }
 0x31f   : > { %7215 = vmatprep.mubr.msk.bf16.mxu0 %vm8813_vm0, %v8812_v50  ;;  %v6842_v55 = vpop.f32.mrb[47].mxu1  ;;  %7311 = vmatprep.subr.bf16.mxu1 %v8421_v57 }
 0x320   : > { %7312 = vmatpush3.bf16.msra.mxu1 %v8421_v57  ;;  %v6031_v55 = vld [vmem:[%s9192_s28 + $0x50] sm:$0xff] }
 0x321   : > { %7313 = vmatprep.subr.bf16.mxu1 %v8422_v58 }
 0x324   : > { %v9993_v25 = vpop.f32.mrb[48].mxu1  ;;  %7314 = vmatpush3.bf16.msra.mxu1 %v8422_v58 }
 0x325   : > { %v6845_v61 = vpop.f32.mrb[49].mxu1  ;;  %7315 = vmatprep.subr.bf16.mxu1 %v8423_v37 }
 0x326   : > { %7216 = vmatmul.mubr.bf16.gmra.mrb[40].mxu0 %v2658_v27  ;;  %v9995_v24 = vpop.f32.mrb[50].mxu1  ;;  %v6033_v61 = vld [vmem:[%s9192_s28 + $0x68] sm:$0xff] }
 0x327   : > { %7219 = vmatprep.mubr.msk.bf16.mxu0 %vm8813_vm0, %v8812_v50  ;;  %v6846_v33 = vpop.f32.mrb[51].mxu1 }
 0x328   : > { %7316 = vmatpush3.bf16.msra.mxu1 %v8423_v37  ;;  %v6034_v33 = vld [vmem:[%s9192_s28 + $0x70] sm:$0xff] }
 0x329   : > { %v2943_v36 = vpack.c.bf16 %v9703_v13, %v6034_v33  ;;  %v2953_v13 = vpack.c.bf16 %v9793_v39, %v9782_v32  ;;  %v8426_v32 = vld [vmem:[#allocation9 + $0x68] sm:$0xff]  }
 0x32c   : > { %v10001_v40 = vpop.f32.mrb[52].mxu1 }
 0x32d   : > { %v6849_v44 = vpop.f32.mrb[53].mxu1 }
 0x32e   : > { %7220 = vmatmul.mubr.bf16.gmra.mrb[44].mxu0 %v2659_v26  ;;  %v10003_v41 = vpop.f32.mrb[54].mxu1  ;;  %v6030_v26 = vld [vmem:[%s9192_s28 + $0x48] sm:$0xff]  ;;  %v2944_v44 = vpack.c.bf16 %v9715_v23, %v6036_v30 }
 0x32f   : > { %7223 = vmatprep.mubr.msk.bf16.mxu0 %vm8813_vm0, %v8812_v50  ;;  %v6850_v52 = vpop.f32.mrb[55].mxu1  ;;  %v2941_v62 = vpack.c.bf16 %v6031_v55, %v6030_v26  ;;  %v6057_v23 = vld [vmem:[%s9192_s28 + $0x168] sm:$0xff] }
 0x334   : > { %v10009_v11 = vpop.f32.mrb[56].mxu1 }
 0x335   : > { %v6853_v27 = vpop.f32.mrb[57].mxu1 }
 0x336   : > { %7224 = vmatmul.mubr.bf16.gmra.mrb[48].mxu0 %v2660_v4  ;;  %v10011_v29 = vpop.f32.mrb[58].mxu1  ;;  %v2942_v4 = vpack.c.bf16 %v6033_v61, %v6032_v16 }
 0x337   : > { %7227 = vmatprep.mubr.msk.bf16.mxu0 %vm8813_vm0, %v8812_v50  ;;  %v6854_v3 = vpop.f32.mrb[59].mxu1 }
 0x33e   : > { %7228 = vmatmul.mubr.bf16.gmra.mrb[52].mxu0 %v2661_v46  ;;  %v6038_v46 = vld [vmem:[%s9192_s28 + $0x98] sm:$0xff] }
 0x33f   : > { %7231 = vmatprep.mubr.msk.bf16.mxu0 %vm8813_vm0, %v8812_v50  ;;  %v2945_v52 = vpack.c.bf16 %v9725_v34, %v6038_v46  ;;  %v8424_v34 = vld [vmem:[#allocation9 + $0x58] sm:$0xff]  }
 0x340   : > { %7317 = vmatprep.subr.bf16.mxu1 %v8424_v34 }
 0x341   : > { %7318 = vmatpush3.bf16.msra.mxu1 %v8424_v34 }
 0x346   : > { %7232 = vmatmul.mubr.bf16.gmra.mrb[56].mxu0 %v2662_v38  ;;  %v10085_v38 = vld [vmem:[%s11082_s1] ss:$0 sm:$0xff]  ;;  %s6173_s1 = sshll.u32 %s11173_s4, 5 }
 0x347   : > { %7251 = vmatprep.mubr.msk.bf16.mxu0 %vm8813_vm0, %v8812_v50  ;;  %s5664_s19 = sadd.s32 %s6173_s1, %s6172_s10 }
 0x348   : > { %s6174_s29 = sshll.u32 %s5664_s19, 7 }
 0x34e   : > { %7252 = vmatmul.mubr.bf16.vlgmr.msra.gmra.mrb[0].mxu0 %v2941_v62 }
 0x34f   : > { %7255 = vmatprep.mubr.msk.bf16.mxu0 %vm8813_vm0, %v8812_v50 }
 0x356   : > { %7256 = vmatmul.mubr.bf16.gmra.mrb[4].mxu0 %v2942_v4 }
 0x357   : > { %7259 = vmatprep.mubr.msk.bf16.mxu0 %vm8813_vm0, %v8812_v50 }
 0x35e   : > { %7260 = vmatmul.mubr.bf16.gmra.mrb[8].mxu0 %v2943_v36 }
 0x35f   : > { %7263 = vmatprep.mubr.msk.bf16.mxu0 %vm8813_vm0, %v8812_v50 }
 0x366   : > { %7264 = vmatmul.mubr.bf16.gmra.mrb[12].mxu0 %v2944_v44 }
 0x367   : > { %7267 = vmatprep.mubr.msk.bf16.mxu0 %vm8813_vm0, %v8812_v50 }
 0x36e   : > { %7268 = vmatmul.mubr.bf16.gmra.mrb[16].mxu0 %v2945_v52 }
 0x36f   : > { %7271 = vmatprep.mubr.msk.bf16.mxu0 %vm8813_vm0, %v8812_v50 }
 0x376   : > { %7272 = vmatmul.mubr.bf16.gmra.mrb[20].mxu0 %v9764_v2  ;;  %v2954_v2 = vpack.c.bf16 %v6057_v23, %v9796_v53  ;;  %v8428_v53 = vld [vmem:[#allocation9 + $0x78] sm:$0xff]  }
 0x377   : > { %7275 = vmatprep.mubr.msk.bf16.mxu0 %vm8813_vm0, %v8812_v50 }
 0x37e   : > { %7276 = vmatmul.mubr.bf16.gmra.mrb[24].mxu0 %v9773_v20  ;;  %v8425_v20 = vld [vmem:[#allocation9 + $0x60] sm:$0xff]  }
 0x37f   : > { %7279 = vmatprep.mubr.msk.bf16.mxu0 %vm8813_vm0, %v8812_v50  ;;  %7319 = vmatprep.subr.bf16.mxu1 %v8425_v20 }
 0x380   : > { %7320 = vmatpush3.bf16.msra.mxu1 %v8425_v20 }
 0x381   : > { %7321 = vmatprep.subr.bf16.mxu1 %v8426_v32 }
 0x384   : > { %7322 = vmatpush3.bf16.msra.mxu1 %v8426_v32  ;;  %v8455_v32 = vld [vmem:[#allocation9 + $0x110] sm:$0xff]  }
 0x386   : > { %7280 = vmatmul.mubr.bf16.gmra.mrb[28].mxu0 %v9784_v47  ;;  %v6058_v47 = vld [vmem:[%s9192_s28 + $0x170] sm:$0xff] }
 0x387   : > { %7283 = vmatprep.mubr.msk.bf16.mxu0 %vm8813_vm0, %v8812_v50 }
 0x38e   : > { %7284 = vmatmul.mubr.bf16.gmra.mrb[32].mxu0 %v9798_v35  ;;  %v6059_v35 = vld [vmem:[%s9192_s28 + $0x178] sm:$0xff] }
 0x38f   : > { %7287 = vmatprep.mubr.msk.bf16.mxu0 %vm8813_vm0, %v8812_v50  ;;  %v2955_v39 = vpack.c.bf16 %v6059_v35, %v6058_v47 }
 0x396   : > { %7288 = vmatmul.mubr.bf16.gmra.mrb[36].mxu0 %v9809_v54  ;;  %v8427_v54 = vld [vmem:[#allocation9 + $0x70] sm:$0xff]  }
 0x397   : > { %7291 = vmatprep.mubr.msk.bf16.mxu0 %vm8813_vm0, %v8812_v50  ;;  %7323 = vmatprep.subr.bf16.mxu1 %v8427_v54 }
 0x398   : > { %7324 = vmatpush3.bf16.msra.mxu1 %v8427_v54 }
 0x399   : > { %7325 = vmatprep.subr.bf16.mxu1 %v8428_v53 }
 0x39c   : > { %7326 = vmatpush3.bf16.msra.mxu1 %v8428_v53 }
 0x39e   : > { %7292 = vmatmul.mubr.bf16.gmra.mrb[40].mxu0 %v9819_v6  ;;  %v10066_v6 = vld [vmem:[#allocation9] sm:$0xff]  }
 0x39f   : > { %7295 = vmatprep.mubr.msk.bf16.mxu0 %vm8813_vm0, %v8812_v50  ;;  %7343 = vmatprep.subr.bf16.mxu1 %v10066_v6 }
 0x3a6   : > { %7296 = vmatmul.mubr.bf16.gmra.mrb[44].mxu0 %v9830_v12  ;;  %v10070_v12 = vstv %s6070_s6  ;;  %s11171_s6 = sld [smem:[#allocation27_spill]] }
 0x3a7   : > { %7299 = vmatprep.mubr.msk.bf16.mxu0 %vm8813_vm0, %v8812_v50  ;;  %vm3323_vm1 = vcmp.ge.s32.totalorder %v10070_v12, 0  ;;  %vm3333_vm2 = vcmp.lt.s32.totalorder %v10070_v12, 16  ;;  %v3314_v4 = vadd.s32 1, %v10070_v12 }
 0x3a8   : > { %vm10088_vm3 = vmand %vm3323_vm1, %vm3333_vm2 }
 0x3a9   : > { %vm3324_vm6 = vcmp.ge.s32.totalorder %v3314_v4, 0  ;;  %vm3334_vm7 = vcmp.lt.s32.totalorder %v3314_v4, 16  ;;  %v3315_v4 = vadd.s32 2, %v10070_v12 }
 0x3aa   : > { %vm10129_vm9 = vmand %vm3324_vm6, %vm3334_vm7 }
 0x3ab   : > { %vm3325_vm13 = vcmp.ge.s32.totalorder %v3315_v4, 0  ;;  %vm3335_vm14 = vcmp.lt.s32.totalorder %v3315_v4, 16 }
 0x3ac   : > { %vm10173_vm15 = vmand %vm3325_vm13, %vm3335_vm14 }
 0x3ae   : > { %7300 = vmatmul.mubr.bf16.gmra.mrb[48].mxu0 %v2953_v13 }
 0x3af   : > { %7303 = vmatprep.mubr.msk.bf16.mxu0 %vm8813_vm0, %v8812_v50 }
 0x3b6   : > { %7304 = vmatmul.mubr.bf16.gmra.mrb[52].mxu0 %v2954_v2 }
 0x3b7   : > { %7307 = vmatprep.mubr.msk.bf16.mxu0 %vm8813_vm0, %v8812_v50  ;;  %v3308_v50 = vlaneseq }
 0x3b9   : > { %v10072_v57 = vshrl.u32 %v3308_v50, 7 }
 0x3bb   : > { %vm11000_vm4 = vcmp.ge.s32.totalorder %v10072_v57, 1  ;;  %v10112_v36 = vadd.s32 16, %v10072_v57 }
 0x3bc   : > { %vm10102_vm5 = vmand %vm10088_vm3, %vm11000_vm4 }
 0x3bd   : > { %vm11003_vm8 = vcmp.le.s32.totalorder %v10112_v36, 16  ;;  %vm10144_vm11 = vmand %vm10129_vm9, %vm11000_vm4 }
 0x3be   : > { %7308 = vmatmul.mubr.bf16.gmra.mrb[56].mxu0 %v2955_v39  ;;  %vm3391_vm10 = vmand %vm10088_vm3, %vm11003_vm8 }
 0x3bf   : > { %vm3394_vm12 = vmand %vm10129_vm9, %vm11003_vm8 }
 0x3c0   : > { %vm10186_vm0 = vmand %vm10173_vm15, %vm11000_vm4 }
 0x3c1   : > { %vm3397_vm7 = vmand %vm10173_vm15, %vm11003_vm8 }
 0x421   : > { %v3055_v58 = vpop.f32.mrb[0].mxu0 }
 0x422   : > { %v7631_v63 = vadd.f32 %v3055_v58, %v9890_v7  ;;  %v7253_v27 = vpop.f32.mrb[1].mxu0 }
 0x423   : > { %v3058_v3 = vpop.f32.mrb[2].mxu0 }
 0x424   : > { %v3211_v37 = vmul.f32 %v7631_v63, %v10077_v59  ;;  %v7632_v55 = vadd.f32 %v3058_v3, %v9892_v9  ;;  %v7254_v62 = vpop.f32.mrb[3].mxu0 }
 0x426   : > { %v10095_v7 = vadd.f32 %v10085_v38, %v3211_v37  ;;  %v3212_v16 = vmul.f32 %v7632_v55, %v10077_v59 }
 0x428   : > { %v11022_v33 = vmax.f32 %v10095_v7, 0.0  ;;  %v10109_v9 = vadd.f32 %v10085_v38, %v3212_v16 }
 0x429   : > { %v3063_v30 = vpop.f32.mrb[4].mxu0 }
 0x42a   : > { %v3479_v44 = vsel %vm10102_vm5, %v11022_v33, 0.0  ;;  %v11021_v46 = vmax.f32 %v10109_v9, 0.0  ;;  %v7633_v52 = vadd.f32 %v3063_v30, %v9898_v21  ;;  %v7257_v13 = vpop.f32.mrb[5].mxu0 }
 0x42b   : > { %3509 = vst [vmem:[#allocation3] sm:$0xff] %v3479_v44  ;;  %v3066_v23 = vpop.f32.mrb[6].mxu0 }
 0x42c   : > { %v3480_v34 = vsel %vm10088_vm3, %v11021_v46, 0.0  ;;  %v3213_v2 = vmul.f32 %v7633_v52, %v10077_v59  ;;  %v7634_v20 = vadd.f32 %v3066_v23, %v9901_v17  ;;  %v7258_v47 = vpop.f32.mrb[7].mxu0  ;;  %v8456_v17 = vld [vmem:[#allocation9 + $0x118] sm:$0xff]  }
 0x42d   : > { %3510 = vst [vmem:[#allocation3 + $0x8] sm:$0xff] %v3480_v34 }
 0x42e   : > { %v3250_v21 = vadd.f32 %v10085_v38, %v3213_v2  ;;  %v3214_v35 = vmul.f32 %v7634_v20, %v10077_v59 }
 0x430   : > { %v3280_v39 = vmax.f32 %v3250_v21, 0.0  ;;  %v10138_v54 = vadd.f32 %v10085_v38, %v3214_v35 }
 0x431   : > { %v3071_v53 = vpop.f32.mrb[8].mxu0 }
 0x432   : > { %v3481_v50 = vsel %vm3391_vm10, %v3280_v39, 0.0  ;;  %v11010_v58 = vmax.f32 %v10138_v54, 0.0  ;;  %v7635_v63 = vadd.f32 %v3071_v53, %v9908_v18  ;;  %v7261_v27 = vpop.f32.mrb[9].mxu0 }
 0x433   : > { %3511 = vst [vmem:[#allocation3 + $0x10] sm:$0xff] %v3481_v50  ;;  %v3074_v3 = vpop.f32.mrb[10].mxu0  ;;  %v8457_v50 = vld [vmem:[#allocation9 + $0x120] sm:$0xff]  }
 0x434   : > { %v3482_v37 = vsel %vm10144_vm11, %v11010_v58, 0.0  ;;  %v3215_v55 = vmul.f32 %v7635_v63, %v10077_v59  ;;  %v7636_v62 = vadd.f32 %v3074_v3, %v9911_v19  ;;  %v7262_v16 = vpop.f32.mrb[11].mxu0  ;;  %v3579_v20 = vld [vmem:[#allocation3 + $0x1] sm:$0xff] }
 0x435   : > { %3512 = vst [vmem:[#allocation3 + $0x18] sm:$0xff] %v3482_v37  ;;  %v8458_v37 = vld [vmem:[#allocation9 + $0x128] sm:$0xff]  }
 0x436   : > { %v10158_v30 = vadd.f32 %v10085_v38, %v3215_v55  ;;  %v3216_v18 = vmul.f32 %v7636_v62, %v10077_v59  ;;  %v3316_v55 = vadd.s32 3, %v10070_v12 }
 0x438   : > { %v11009_v44 = vmax.f32 %v10158_v30, 0.0  ;;  %v3253_v52 = vadd.f32 %v10085_v38, %v3216_v18  ;;  %vm3326_vm1 = vcmp.ge.s32.totalorder %v3316_v55, 0  ;;  %vm3336_vm2 = vcmp.lt.s32.totalorder %v3316_v55, 16 }
 0x439   : > { %v3079_v13 = vpop.f32.mrb[12].mxu0  ;;  %vm10211_vm6 = vmand %vm3326_vm1, %vm3336_vm2 }
 0x43a   : > { %v3483_v19 = vsel %vm10129_vm9, %v11009_v44, 0.0  ;;  %v3283_v23 = vmax.f32 %v3253_v52, 0.0  ;;  %v7637_v34 = vadd.f32 %v3079_v13, %v9918_v48  ;;  %v7265_v2 = vpop.f32.mrb[13].mxu0  ;;  %v3580_v47 = vld [vmem:[#allocation3 + $0x9] sm:$0xff]  ;;  %vm10228_vm10 = vmand %vm10211_vm6, %vm11000_vm4 }
 0x43b   : > { %3513 = vst [vmem:[#allocation3 + $0x20] sm:$0xff] %v3483_v19  ;;  %v3082_v21 = vpop.f32.mrb[14].mxu0  ;;  %v3595_v35 = vpack.c.bf16 %v3580_v47, %v3579_v20 }
 0x43c   : > { %v3484_v39 = vsel %vm3394_vm12, %v3283_v23, 0.0  ;;  %v3217_v53 = vmul.f32 %v7637_v34, %v10077_v59  ;;  %v7638_v63 = vadd.f32 %v3082_v21, %v9921_v51  ;;  %v7266_v27 = vpop.f32.mrb[15].mxu0  ;;  %vm3400_vm12 = vmand %vm10211_vm6, %vm11003_vm8 }
 0x43d   : > { %3514 = vst [vmem:[#allocation3 + $0x28] sm:$0xff] %v3484_v39  ;;  %7327 = vmatprep.mubr.bf16.mxu1 %v3595_v35 }
 0x43e   : > { %v10179_v48 = vadd.f32 %v10085_v38, %v3217_v53  ;;  %v3218_v3 = vmul.f32 %v7638_v63, %v10077_v59  ;;  %v8459_v63 = vld [vmem:[#allocation9 + $0x130] sm:$0xff]  }
 0x440   : > { %v11004_v51 = vmax.f32 %v10179_v48, 0.0  ;;  %v10193_v62 = vadd.f32 %v10085_v38, %v3218_v3  ;;  %v8460_v3 = vld [vmem:[#allocation9 + $0x138] sm:$0xff]  }
 0x441   : > { %v3087_v16 = vpop.f32.mrb[16].mxu0 }
 0x442   : > { %v3485_v4 = vsel %vm10186_vm0, %v11004_v51, 0.0  ;;  %v11002_v18 = vmax.f32 %v10193_v62, 0.0  ;;  %v7639_v52 = vadd.f32 %v3087_v16, %v9928_v0  ;;  %v7269_v13 = vpop.f32.mrb[17].mxu0  ;;  %v3581_v47 = vld [vmem:[#allocation3 + $0x19] sm:$0xff] }
 0x443   : > { %3515 = vst [vmem:[#allocation3 + $0x30] sm:$0xff] %v3485_v4  ;;  %v3090_v19 = vpop.f32.mrb[18].mxu0  ;;  %v8430_v0 = vld [vmem:[#allocation9 + $0x8] sm:$0xff]   ;;  %v8431_v16 = vld [vmem:[#allocation9 + $0x10] sm:$0xff]  }
 0x444   : > { %v3486_v23 = vsel %vm10173_vm15, %v11002_v18, 0.0  ;;  %v3219_v34 = vmul.f32 %v7639_v52, %v10077_v59  ;;  %v7640_v2 = vadd.f32 %v3090_v19, %v9931_v8  ;;  %v7270_v20 = vpop.f32.mrb[19].mxu0  ;;  %v3582_v21 = vld [vmem:[#allocation3 + $0x21] sm:$0xff] }
 0x445   : > { %3516 = vst [vmem:[#allocation3 + $0x38] sm:$0xff] %v3486_v23  ;;  %v10207_v35 = vpack.c.bf16 %v3582_v21, %v3581_v47  ;;  %v3317_v47 = vadd.s32 4, %v10070_v12  ;;  %v8432_v21 = vld [vmem:[#allocation9 + $0x18] sm:$0xff]  }
 0x446   : > { %v3256_v39 = vadd.f32 %v10085_v38, %v3219_v34  ;;  %v3220_v53 = vmul.f32 %v7640_v2, %v10077_v59 }
 0x447   : > { %7328 = vmatmul.mubr.bf16.vlgmr.msra.gmra.mrb[60].mxu1 %v10207_v35  ;;  %vm3327_vm13 = vcmp.ge.s32.totalorder %v3317_v47, 0  ;;  %vm3337_vm14 = vcmp.lt.s32.totalorder %v3317_v47, 16  ;;  %v11101_v47 = vmov 0 }
 0x448   : > { %v3286_v8 = vmax.f32 %v3256_v39, 0.0  ;;  %v10221_v27 = vadd.f32 %v10085_v38, %v3220_v53  ;;  %7344 = vmatpush3.bf16.msra.mxu1 %v10066_v6  ;;  %vm10260_vm1 = vmand %vm3327_vm13, %vm3337_vm14 }
 0x449   : > { %v3095_v55 = vpop.f32.mrb[20].mxu0  ;;  %7345 = vmatprep.subr.bf16.mxu1 %v8430_v0  ;;  %vm10274_vm2 = vmand %vm10260_vm1, %vm11000_vm4 }
 0x44a   : > { %v3487_v4 = vsel %vm3397_vm7, %v3286_v8, 0.0  ;;  %v10998_v52 = vmax.f32 %v10221_v27, 0.0  ;;  %v7641_v13 = vadd.f32 %v3095_v55, %v9937_v28  ;;  %v7273_v19 = vpop.f32.mrb[21].mxu0  ;;  %v11102_v47 = vsel %vm10274_vm2, 4294967295, %v11101_v47  ;;  %vm3403_vm14 = vmand %vm10260_vm1, %vm11003_vm8 }
 0x44b   : > { %3517 = vst [vmem:[#allocation3 + $0x40] sm:$0xff] %v3487_v4  ;;  %v3098_v23 = vpop.f32.mrb[22].mxu0 }
 0x44c   : > { %v3488_v6 = vsel %vm10228_vm10, %v10998_v52, 0.0  ;;  %v3221_v34 = vmul.f32 %v7641_v13, %v10077_v59  ;;  %v7642_v2 = vadd.f32 %v3098_v23, %v9939_v42  ;;  %v7274_v20 = vpop.f32.mrb[23].mxu0  ;;  %7346 = vmatpush3.bf16.msra.mxu1 %v8430_v0  ;;  %v8433_v0 = vld [vmem:[#allocation9 + $0x20] sm:$0xff]  }
 0x44d   : > { %3518 = vst [vmem:[#allocation3 + $0x48] sm:$0xff] %v3488_v6  ;;  %7347 = vmatprep.subr.bf16.mxu1 %v8431_v16 }
 0x44e   : > { %v10242_v28 = vadd.f32 %v10085_v38, %v3221_v34  ;;  %v3222_v39 = vmul.f32 %v7642_v2, %v10077_v59 }
 0x450   : > { %v10996_v53 = vmax.f32 %v10242_v28, 0.0  ;;  %v3259_v8 = vadd.f32 %v10085_v38, %v3222_v39  ;;  %7348 = vmatpush3.bf16.msra.mxu1 %v8431_v16  ;;  %v3583_v16 = vld [vmem:[#allocation3 + $0x31] sm:$0xff]  ;;  %v11099_v39 = vmov 0 }
 0x451   : > { %v3103_v42 = vpop.f32.mrb[24].mxu0  ;;  %7349 = vmatprep.subr.bf16.mxu1 %v8432_v21  ;;  %v11100_v39 = vsel %vm10260_vm1, 4294967295, %v11099_v39 }
 0x452   : > { %v3489_v55 = vsel %vm10211_vm6, %v10996_v53, 0.0  ;;  %v3289_v4 = vmax.f32 %v3259_v8, 0.0  ;;  %v7643_v13 = vadd.f32 %v3103_v42, %v9945_v5  ;;  %v7277_v19 = vpop.f32.mrb[25].mxu0  ;;  %v3584_v23 = vld [vmem:[#allocation3 + $0x39] sm:$0xff] }
 0x453   : > { %3519 = vst [vmem:[#allocation3 + $0x50] sm:$0xff] %v3489_v55  ;;  %v3106_v6 = vpop.f32.mrb[26].mxu0  ;;  %v10256_v34 = vpack.c.bf16 %v3584_v23, %v3583_v16  ;;  %v8434_v5 = vld [vmem:[#allocation9 + $0x28] sm:$0xff]   ;;  %v8435_v19 = vld [vmem:[#allocation9 + $0x30] sm:$0xff]  }
 0x454   : > { %v3490_v2 = vsel %vm3400_vm12, %v3289_v4, 0.0  ;;  %v3223_v20 = vmul.f32 %v7643_v13, %v10077_v59  ;;  %v7644_v53 = vadd.f32 %v3106_v6, %v9947_v10  ;;  %v7278_v8 = vpop.f32.mrb[27].mxu0  ;;  %7350 = vmatpush3.bf16.msra.mxu1 %v8432_v21  ;;  %v3318_v10 = vadd.s32 5, %v10070_v12 }
 0x455   : > { %3520 = vst [vmem:[#allocation3 + $0x58] sm:$0xff] %v3490_v2  ;;  %7331 = vmatprep.mubr.bf16.mxu1 %v10256_v34  ;;  %7351 = vmatprep.subr.bf16.mxu1 %v8433_v0 }
 0x456   : > { %v10267_v42 = vadd.f32 %v10085_v38, %v3223_v20  ;;  %v3224_v55 = vmul.f32 %v7644_v53, %v10077_v59  ;;  %vm3328_vm7 = vcmp.ge.s32.totalorder %v3318_v10, 0  ;;  %vm3338_vm12 = vcmp.lt.s32.totalorder %v3318_v10, 16 }
 0x457   : > { %vm10300_vm13 = vmand %vm3328_vm7, %vm3338_vm12 }
 0x458   : > { %v10997_v21 = vmax.f32 %v10267_v42, 0.0  ;;  %v10281_v4 = vadd.f32 %v10085_v38, %v3224_v55  ;;  %7352 = vmatpush3.bf16.msra.mxu1 %v8433_v0  ;;  %vm10316_vm7 = vmand %vm10300_vm13, %vm11000_vm4 }
 0x459   : > { %v3111_v13 = vpop.f32.mrb[28].mxu0  ;;  %7353 = vmatprep.subr.bf16.mxu1 %v8434_v5  ;;  %vm3406_vm12 = vmand %vm10300_vm13, %vm11003_vm8 }
 0x45a   : > { %v3491_v53 = vsel %vm10274_vm2, %v10997_v21, 0.0  ;;  %v10999_v16 = vmax.f32 %v10281_v4, 0.0  ;;  %v7645_v23 = vadd.f32 %v3111_v13, %v9953_v14  ;;  %v7281_v6 = vpop.f32.mrb[29].mxu0  ;;  %v3585_v21 = vld [vmem:[#allocation3 + $0x49] sm:$0xff] }
 0x45b   : > { %3521 = vst [vmem:[#allocation3 + $0x60] sm:$0xff] %v3491_v53  ;;  %v3114_v2 = vpop.f32.mrb[30].mxu0  ;;  %v8436_v13 = vld [vmem:[#allocation9 + $0x38] sm:$0xff]  }
 0x45c   : > { %v3492_v0 = vsel %vm10260_vm1, %v10999_v16, 0.0  ;;  %v3225_v20 = vmul.f32 %v7645_v23, %v10077_v59  ;;  %v7646_v8 = vadd.f32 %v3114_v2, %v9955_v22  ;;  %v7282_v55 = vpop.f32.mrb[31].mxu0  ;;  %v3586_v52 = vld [vmem:[#allocation3 + $0x51] sm:$0xff]  ;;  %7354 = vmatpush3.bf16.msra.mxu1 %v8434_v5  ;;  %v11103_v16 = vmov 0 }
 0x45d   : > { %3522 = vst [vmem:[#allocation3 + $0x68] sm:$0xff] %v3492_v0  ;;  %v10295_v14 = vpack.c.bf16 %v3586_v52, %v3585_v21  ;;  %7355 = vmatprep.subr.bf16.mxu1 %v8435_v19  ;;  %v11104_v16 = vsel %vm10300_vm13, 4294967295, %v11103_v16  ;;  %v11105_v5 = vmov 0  ;;  %v10320_v21 = vld [vmem:[#allocation9 + $0x80] sm:$0xff]   ;;  %vm11115_vm1 = vcmp.ge.s32.totalorder %v10072_v57, 1 }
 0x45e   : > { %v3262_v53 = vadd.f32 %v10085_v38, %v3225_v20  ;;  %v3226_v6 = vmul.f32 %v7646_v8, %v10077_v59  ;;  %v11106_v5 = vsel %vm10316_vm7, 4294967295, %v11105_v5 }
 0x45f   : > { %7332 = vmatmul.mubr.bf16.gmra.mrb[64].mxu1 %v10295_v14 }
 0x460   : > { %v3292_v22 = vmax.f32 %v3262_v53, 0.0  ;;  %v10310_v52 = vadd.f32 %v10085_v38, %v3226_v6  ;;  %7356 = vmatpush3.bf16.msra.mxu1 %v8435_v19 }
 0x461   : > { %v3119_v10 = vpop.f32.mrb[32].mxu0  ;;  %7357 = vmatprep.subr.bf16.mxu1 %v8436_v13 }
 0x462   : > { %v3493_v23 = vsel %vm3403_vm14, %v3292_v22, 0.0  ;;  %v11001_v2 = vmax.f32 %v10310_v52, 0.0  ;;  %v7647_v0 = vadd.f32 %v3119_v10, %v9961_v43  ;;  %v7285_v20 = vpop.f32.mrb[33].mxu0  ;;  %v3319_v22 = vadd.s32 6, %v10070_v12 }
 0x463   : > { %3523 = vst [vmem:[#allocation3 + $0x70] sm:$0xff] %v3493_v23  ;;  %v3122_v19 = vpop.f32.mrb[34].mxu0 }
 0x464   : > { %v3494_v8 = vsel %vm10316_vm7, %v11001_v2, 0.0  ;;  %v3227_v55 = vmul.f32 %v7647_v0, %v10077_v59  ;;  %v7648_v53 = vadd.f32 %v3122_v19, %v9963_v31  ;;  %v7286_v6 = vpop.f32.mrb[35].mxu0  ;;  %7358 = vmatpush3.bf16.msra.mxu1 %v8436_v13  ;;  %vm3329_vm14 = vcmp.ge.s32.totalorder %v3319_v22, 0 }
 0x465   : > { %3524 = vst [vmem:[#allocation3 + $0x78] sm:$0xff] %v3494_v8  ;;  %7375 = vmatprep.subr.bf16.mxu1 %v10320_v21  ;;  %vm3339_vm4 = vcmp.lt.s32.totalorder %v3319_v22, 16  ;;  %v8463_v22 = vld [vmem:[#allocation9 + $0x150] sm:$0xff]  }
 0x466   : > { %v10333_v43 = vadd.f32 %v10085_v38, %v3227_v55  ;;  %v3228_v10 = vmul.f32 %v7648_v53, %v10077_v59  ;;  %v3587_v55 = vld [vmem:[#allocation3 + $0x61] sm:$0xff]  ;;  %vm10350_vm8 = vmand %vm3329_vm14, %vm3339_vm4 }
 0x468   : > { %v11005_v23 = vmax.f32 %v10333_v43, 0.0  ;;  %v3265_v20 = vadd.f32 %v10085_v38, %v3228_v10 }
 0x469   : > { %v3127_v31 = vpop.f32.mrb[36].mxu0 }
 0x46a   : > { %v3495_v13 = vsel %vm10300_vm13, %v11005_v23, 0.0  ;;  %v3295_v0 = vmax.f32 %v3265_v20, 0.0  ;;  %v7649_v19 = vadd.f32 %v3127_v31, %v9969_v49  ;;  %v7289_v8 = vpop.f32.mrb[37].mxu0  ;;  %v3588_v53 = vld [vmem:[#allocation3 + $0x69] sm:$0xff]  ;;  %vm11109_vm13 = vcmp.ge.s32.totalorder %v10072_v57, 1 }
 0x46b   : > { %3525 = vst [vmem:[#allocation3 + $0x80] sm:$0xff] %v3495_v13  ;;  %v3130_v6 = vpop.f32.mrb[38].mxu0  ;;  %v10347_v10 = vpack.c.bf16 %v3588_v53, %v3587_v55  ;;  %v11110_v31 = vmov 0  ;;  %v3320_v13 = vadd.s32 7, %v10070_v12 }
 0x46c   : > { %v3496_v2 = vsel %vm3406_vm12, %v3295_v0, 0.0  ;;  %v3229_v18 = vmul.f32 %v7649_v19, %v10077_v59  ;;  %v7650_v51 = vadd.f32 %v3130_v6, %v9971_v56  ;;  %v7290_v23 = vpop.f32.mrb[39].mxu0  ;;  %vm10364_vm12 = vmand %vm10350_vm8, %vm11109_vm13 }
 0x46d   : > { %3526 = vst [vmem:[#allocation3 + $0x88] sm:$0xff] %v3496_v2  ;;  %7335 = vmatprep.mubr.bf16.mxu1 %v10347_v10  ;;  %v11111_v31 = vsel %vm10364_vm12, 4294967295, %v11110_v31  ;;  %vm3330_vm4 = vcmp.ge.s32.totalorder %v3320_v13, 0  ;;  %vm3340_vm13 = vcmp.lt.s32.totalorder %v3320_v13, 16  ;;  %v11112_v13 = vmov 0 }
 0x46e   : > { %v10357_v49 = vadd.f32 %v10085_v38, %v3229_v18  ;;  %v3230_v20 = vmul.f32 %v7650_v51, %v10077_v59  ;;  %vm10389_vm14 = vmand %vm3330_vm4, %vm3340_vm13 }
 0x46f   : > { %v11113_v13 = vsel %vm10389_vm14, 4294967295, %v11112_v13  ;;  %vm10405_vm2 = vmand %vm10389_vm14, %vm11115_vm1 }
 0x470   : > { %v11008_v56 = vmax.f32 %v10357_v49, 0.0  ;;  %v10371_v2 = vadd.f32 %v10085_v38, %v3230_v20 }
 0x471   : > { %v3135_v23 = vpop.f32.mrb[40].mxu0 }
 0x472   : > { %v3497_v51 = vsel %vm10364_vm12, %v11008_v56, 0.0  ;;  %v11019_v18 = vmax.f32 %v10371_v2, 0.0  ;;  %v7651_v0 = vadd.f32 %v3135_v23, %v9977_v1  ;;  %v7293_v19 = vpop.f32.mrb[41].mxu0  ;;  %v3589_v56 = vld [vmem:[#allocation3 + $0x79] sm:$0xff]  ;;  %vm11114_vm12 = vcmp.le.s32.totalorder %v10112_v36, 16 }
 0x473   : > { %3527 = vst [vmem:[#allocation3 + $0x90] sm:$0xff] %v3497_v51  ;;  %v3138_v8 = vpop.f32.mrb[42].mxu0  ;;  %vm3409_vm7 = vmand %vm10350_vm8, %vm11114_vm12 }
 0x474   : > { %v3498_v55 = vsel %vm10350_vm8, %v11019_v18, 0.0  ;;  %v3231_v53 = vmul.f32 %v7651_v0, %v10077_v59  ;;  %v7652_v6 = vadd.f32 %v3138_v8, %v9979_v15  ;;  %v7294_v20 = vpop.f32.mrb[43].mxu0  ;;  %v3590_v44 = vld [vmem:[#allocation3 + $0x81] sm:$0xff]  ;;  %vm11118_vm1 = vmmov %vm11114_vm12 }
 0x475   : > { %3528 = vst [vmem:[#allocation3 + $0x98] sm:$0xff] %v3498_v55  ;;  %v10385_v58 = vpack.c.bf16 %v3590_v44, %v3589_v56  ;;  %v11116_v44 = vmov 0 }
 0x476   : > { %v3268_v1 = vadd.f32 %v10085_v38, %v3231_v53  ;;  %v3232_v23 = vmul.f32 %v7652_v6, %v10077_v59  ;;  %v11117_v44 = vsel %vm10405_vm2, 4294967295, %v11116_v44 }
 0x477   : > { %7336 = vmatmul.mubr.bf16.gmra.mrb[68].mxu1 %v10385_v58 }
 0x478   : > { %v3298_v15 = vmax.f32 %v3268_v1, 0.0  ;;  %v10399_v51 = vadd.f32 %v10085_v38, %v3232_v23 }
 0x479   : > { %v3143_v56 = vpop.f32.mrb[44].mxu0 }
 0x47a   : > { %v3499_v0 = vsel %vm3409_vm7, %v3298_v15, 0.0  ;;  %v11020_v19 = vmax.f32 %v10399_v51, 0.0  ;;  %v7653_v8 = vadd.f32 %v3143_v56, %v9985_v45  ;;  %v7297_v55 = vpop.f32.mrb[45].mxu0  ;;  %v3321_v15 = vadd.s32 8, %v10070_v12  ;;  %vm3412_vm7 = vmand %vm10389_vm14, %vm11118_vm1 }
 0x47b   : > { %3529 = vst [vmem:[#allocation3 + $0xa0] sm:$0xff] %v3499_v0  ;;  %v3146_v53 = vpop.f32.mrb[46].mxu0  ;;  %vm11122_vm1 = vcmp.ge.s32.totalorder %v10072_v57, 1 }
 0x47c   : > { %v3500_v6 = vsel %vm10405_vm2, %v11020_v19, 0.0  ;;  %v3233_v20 = vmul.f32 %v7653_v8, %v10077_v59  ;;  %v7654_v1 = vadd.f32 %v3146_v53, %v9987_v60  ;;  %v7298_v23 = vpop.f32.mrb[47].mxu0  ;;  %vm3331_vm12 = vcmp.ge.s32.totalorder %v3321_v15, 0  ;;  %vm8505_vm2 = vmpackc.low %vm10088_vm3, %vm10102_vm5 }
 0x47d   : > { %3530 = vst [vmem:[#allocation3 + $0xa8] sm:$0xff] %v3500_v6  ;;  %vm3341_vm4 = vcmp.lt.s32.totalorder %v3321_v15, 16  ;;  %v11120_v15 = vmov 0  ;;  %vm11034_vm3 = vmpackc.low %vm10129_vm9, %vm10144_vm11 }
 0x47e   : > { %v10419_v18 = vadd.f32 %v10085_v38, %v3233_v20  ;;  %v3234_v45 = vmul.f32 %v7654_v1, %v10077_v59  ;;  %v3591_v20 = vld [vmem:[#allocation3 + $0x91] sm:$0xff]  ;;  %vm10436_vm13 = vmand %vm3331_vm12, %vm3341_vm4 }
 0x47f   : > { %v11121_v15 = vsel %vm10436_vm13, 4294967295, %v11120_v15  ;;  %vm11033_vm5 = vmpackc.low %vm10173_vm15, %vm10186_vm0 }
 0x480   : > { %v11023_v56 = vmax.f32 %v10419_v18, 0.0  ;;  %v3271_v0 = vadd.f32 %v10085_v38, %v3234_v45 }
 0x481   : > { %v3151_v8 = vpop.f32.mrb[48].mxu0 }
 0x482   : > { %v3501_v60 = vsel %vm10389_vm14, %v11023_v56, 0.0  ;;  %v3301_v55 = vmax.f32 %v3271_v0, 0.0  ;;  %v7655_v53 = vadd.f32 %v3151_v8, %v9993_v25  ;;  %v7301_v6 = vpop.f32.mrb[49].mxu0  ;;  %v3592_v1 = vld [vmem:[#allocation3 + $0x99] sm:$0xff]  ;;  %v11123_v8 = vmov 0 }
 0x483   : > { %3531 = vst [vmem:[#allocation3 + $0xb0] sm:$0xff] %v3501_v60  ;;  %v3154_v23 = vpop.f32.mrb[50].mxu0  ;;  %v10433_v45 = vpack.c.bf16 %v3592_v1, %v3591_v20  ;;  %v3322_v60 = vadd.s32 9, %v10070_v12 }
 0x484   : > { %v3502_v19 = vsel %vm3412_vm7, %v3301_v55, 0.0  ;;  %v3235_v46 = vmul.f32 %v7655_v53, %v10077_v59  ;;  %v7656_v33 = vadd.f32 %v3154_v23, %v9995_v24  ;;  %v7302_v56 = vpop.f32.mrb[51].mxu0  ;;  %vm10450_vm7 = vmand %vm10436_vm13, %vm11122_vm1 }
 0x485   : > { %11119 = vst [vmem:[#allocation21_spill] sm:$0xff] %v10433_v45  ;;  %3532 = vst [vmem:[#allocation3 + $0xb8] sm:$0xff] %v3502_v19  ;;  %7339 = vmatprep.mubr.bf16.mxu1 %v10433_v45  ;;  %v11124_v8 = vsel %vm10450_vm7, 4294967295, %v11123_v8  ;;  %vm3332_vm12 = vcmp.ge.s32.totalorder %v3322_v60, 0  ;;  %vm3342_vm4 = vcmp.lt.s32.totalorder %v3322_v60, 16  ;;  %v11125_v60 = vmov 0 }
 0x486   : > { %v10443_v25 = vadd.f32 %v10085_v38, %v3235_v46  ;;  %v3236_v0 = vmul.f32 %v7656_v33, %v10077_v59  ;;  %vm10475_vm1 = vmand %vm3332_vm12, %vm3342_vm4  ;;  %vm11130_vm12 = vcmp.ge.s32.totalorder %v10072_v57, 1 }
 0x487   : > { %v11126_v60 = vsel %vm10475_vm1, 4294967295, %v11125_v60  ;;  %vm11032_vm4 = vmpackc.low %vm10211_vm6, %vm10228_vm10 }
 0x488   : > { %v11024_v24 = vmax.f32 %v10443_v25, 0.0  ;;  %v10457_v19 = vadd.f32 %v10085_v38, %v3236_v0 }
 0x489   : > { %v3159_v56 = vpop.f32.mrb[52].mxu0 }
 0x48a   : > { %v3503_v33 = vsel %vm10450_vm7, %v11024_v24, 0.0  ;;  %v3303_v46 = vmax.f32 %v10457_v19, 0.0  ;;  %v7657_v55 = vadd.f32 %v3159_v56, %v10001_v40  ;;  %v7305_v53 = vpop.f32.mrb[53].mxu0  ;;  %v3593_v0 = vld [vmem:[#allocation3 + $0xa9] sm:$0xff]  ;;  %vm11127_vm7 = vcmp.le.s32.totalorder %v10112_v36, 16 }
 0x48b   : > { %3533 = vst [vmem:[#allocation3 + $0xc0] sm:$0xff] %v3503_v33  ;;  %v3162_v6 = vpop.f32.mrb[54].mxu0  ;;  %vm3415_vm14 = vmand %vm10436_vm13, %vm11127_vm7 }
 0x48c   : > { %v3504_v12 = vsel %vm10436_vm13, %v3303_v46, 0.0  ;;  %v3237_v20 = vmul.f32 %v7657_v55, %v10077_v59  ;;  %v7658_v1 = vadd.f32 %v3162_v6, %v10003_v41  ;;  %v7306_v23 = vpop.f32.mrb[55].mxu0  ;;  %v3594_v24 = vld [vmem:[#allocation3 + $0xb1] sm:$0xff]  ;;  %v11129_v55 = vmax.f32 %v10109_v9, 0.0  ;;  %vm10499_vm7 = vmand %vm10475_vm1, %vm11130_vm12 }
 0x48d   : > { %3534 = vst [vmem:[#allocation3 + $0xc8] sm:$0xff] %v3504_v12  ;;  %v10471_v45 = vpack.c.bf16 %v3594_v24, %v3593_v0  ;;  %v11128_v24 = vmax.f32 %v10095_v7, 0.0  ;;  %v11131_v6 = vmov 0  ;;  %vm11140_vm12 = vnez %v11102_v47 }
 0x48e   : > { %v3274_v40 = vadd.f32 %v10085_v38, %v3237_v20  ;;  %v3238_v56 = vmul.f32 %v7658_v1, %v10077_v59  ;;  %v11132_v6 = vsel %vm10499_vm7, 4294967295, %v11131_v6 }
 0x48f   : > { %7340 = vmatmul.mubr.bf16.gmra.mrb[72].mxu1 %v10471_v45  ;;  %v8506_v53 = vpack.c.bf16 %v11129_v55, %v11128_v24  ;;  %v11134_v24 = vmax.f32 %v10158_v30, 0.0  ;;  %v11136_v30 = vmax.f32 %v10193_v62, 0.0 }
 0x490   : > { %v3304_v41 = vmax.f32 %v3274_v40, 0.0  ;;  %v10485_v33 = vadd.f32 %v10085_v38, %v3238_v56  ;;  %v8438_v40 = vld [vmem:[#allocation9 + $0x88] sm:$0xff]  }
 0x491   : > { %8507 = vmatprep.mubr.msk.bf16.mxu1 %vm8505_vm2, %v8506_v53  ;;  %v3167_v12 = vpop.f32.mrb[56].mxu0  ;;  %vm11137_vm2 = vcmp.le.s32.totalorder %v10112_v36, 16  ;;  %v11138_v36 = vmax.f32 %v10221_v27, 0.0  ;;  %v11143_v27 = vmax.f32 %v10281_v4, 0.0  ;;  %v11147_v4 = vmax.f32 %v10333_v43, 0.0  ;;  %v8443_v43 = vld [vmem:[#allocation9 + $0xb0] sm:$0xff]  }
 0x492   : > { %v3505_v20 = vsel %vm3415_vm14, %v3304_v41, 0.0  ;;  %v3305_v61 = vmax.f32 %v10485_v33, 0.0  ;;  %v7659_v26 = vadd.f32 %v3167_v12, %v10009_v11  ;;  %v7309_v1 = vpop.f32.mrb[57].mxu0  ;;  %v11133_v41 = vmax.f32 %v10138_v54, 0.0  ;;  %vm3418_vm14 = vmand %vm10475_vm1, %vm11137_vm2  ;;  %v8487_v33 = vld [vmem:[#allocation9 + $0x210] sm:$0xff]  }
 0x493   : > { %3535 = vst [vmem:[#allocation3 + $0xd0] sm:$0xff] %v3505_v20  ;;  %v3170_v7 = vpop.f32.mrb[58].mxu0  ;;  %v11135_v54 = vmax.f32 %v10179_v48, 0.0  ;;  %v8440_v20 = vld [vmem:[#allocation9 + $0x98] sm:$0xff]   ;;  %vm11141_vm2 = vnez %v11100_v39  ;;  %v11142_v1 = vmax.f32 %v10267_v42, 0.0  ;;  %v11146_v42 = vmax.f32 %v10310_v52, 0.0 }
 0x494   : > { %v3506_v57 = vsel %vm10499_vm7, %v3305_v61, 0.0  ;;  %v3239_v9 = vmul.f32 %v7659_v26, %v10077_v59  ;;  %v7660_v23 = vadd.f32 %v3170_v7, %v10011_v29  ;;  %v7310_v0 = vpop.f32.mrb[59].mxu0  ;;  %v10523_v55 = vpack.c.bf16 %v11134_v24, %v11133_v41  ;;  %v8444_v41 = vld [vmem:[#allocation9 + $0xb8] sm:$0xff]  }
 0x495   : > { %3536 = vst [vmem:[#allocation3 + $0xd8] sm:$0xff] %v3506_v57  ;;  %v10541_v53 = vpack.c.bf16 %v11136_v30, %v11135_v54  ;;  %v10582_v7 = vpack.c.bf16 %v11143_v27, %v11142_v1  ;;  %v8442_v57 = vld [vmem:[#allocation9 + $0xa8] sm:$0xff]   ;;  %v11150_v52 = vmax.f32 %v10371_v2, 0.0  ;;  %vm11152_vm7 = vnez %v11113_v13  ;;  %v8445_v54 = vld [vmem:[#allocation9 + $0xc0] sm:$0xff]   ;;  %v3913_v30 = vld [vmem:[#allocation3 + $0x22] sm:$0xff] }
 0x496   : > { %v10512_v56 = vadd.f32 %v10085_v38, %v3239_v9  ;;  %v3240_v11 = vmul.f32 %v7660_v23, %v10077_v59  ;;  %v10598_v9 = vpack.c.bf16 %v11147_v4, %v11146_v42  ;;  %v11149_v23 = vmax.f32 %v10357_v49, 0.0  ;;  %v3916_v1 = vld [vmem:[#allocation3 + $0x4a] sm:$0xff]  ;;  %v8466_v13 = vld [vmem:[#allocation9 + $0x168] sm:$0xff]  }
 0x497   : > { %8510 = vmatmul.mubr.msk.bf16.vlgmr.msra.gmra.mrb[60].mxu1 %vm11034_vm3, %v10523_v55  ;;  %v11153_v2 = vmax.f32 %v10399_v51, 0.0  ;;  %v11154_v24 = vmax.f32 %v10419_v18, 0.0  ;;  %v3914_v18 = vld [vmem:[#allocation3 + $0x32] sm:$0xff]  ;;  %v11165_v39 = vmax.f32 %v10443_v25, 0.0  ;;  %v4329_v25 = vld [vmem:[#allocation3 + $0xc1] sm:$0xff] }
 0x498   : > { %v3306_v29 = vmax.f32 %v10512_v56, 0.0  ;;  %v3277_v59 = vadd.f32 %v10085_v38, %v3240_v11  ;;  %8513 = vmatprep.mubr.msk.bf16.mxu1 %vm11033_vm5, %v10541_v53  ;;  %7376 = vmatpush3.bf16.msra.mxu1 %v10320_v21  ;;  %v8439_v38 = vld [vmem:[#allocation9 + $0x90] sm:$0xff]   ;;  %v11139_v21 = vmax.f32 %v10242_v28, 0.0  ;;  %v8441_v28 = vld [vmem:[#allocation9 + $0xa0] sm:$0xff]   ;;  %vm11145_vm5 = vnez %v11104_v16 }
 0x499   : > { %7377 = vmatprep.subr.bf16.mxu1 %v8438_v40  ;;  %v10614_v0 = vpack.c.bf16 %v11150_v52, %v11149_v23  ;;  %v3910_v11 = vld [vmem:[#allocation3 + $0x2] sm:$0xff]  ;;  %v8449_v4 = vld [vmem:[#allocation9 + $0xe0] sm:$0xff]   ;;  %v3923_v52 = vld [vmem:[#allocation3 + $0x9a] sm:$0xff]  ;;  %v10709_v47 = vpack.c.bf16 %v3303_v46, %v11165_v39 }
 0x49a   : > { %v3507_v48 = vsel %vm10475_vm1, %v3306_v29, 0.0  ;;  %v3307_v62 = vmax.f32 %v3277_v59, 0.0  ;;  %v10566_v26 = vpack.c.bf16 %v11139_v21, %v11138_v36  ;;  %v10630_v59 = vpack.c.bf16 %v11154_v24, %v11153_v2  ;;  %v3917_v36 = vld [vmem:[#allocation3 + $0x52] sm:$0xff]  ;;  %v3919_v21 = vld [vmem:[#allocation3 + $0x6a] sm:$0xff]  ;;  %v3921_v23 = vld [vmem:[#allocation3 + $0x82] sm:$0xff] }
 0x49b   : > { %3537 = vst [vmem:[#allocation3 + $0xe0] sm:$0xff] %v3507_v48  ;;  %v3912_v48 = vld [vmem:[#allocation3 + $0x1a] sm:$0xff]  ;;  %v10644_v27 = vpack.c.bf16 %v3917_v36, %v3916_v1  ;;  %v3925_v24 = vld [vmem:[#allocation3 + $0xb2] sm:$0xff]  ;;  %v8476_v36 = vld [vmem:[#allocation9 + $0x1b8] sm:$0xff]  }
 0x49c   : > { %v3508_v12 = vsel %vm3418_vm14, %v3307_v62, 0.0  ;;  %7378 = vmatpush3.bf16.msra.mxu1 %v8438_v40  ;;  %vm11035_vm14 = vmpackc.low %vm11141_vm2, %vm11140_vm12  ;;  %v3911_v40 = vld [vmem:[#allocation3 + $0xa] sm:$0xff]  ;;  %v10638_v51 = vpack.c.bf16 %v3913_v30, %v3912_v48  ;;  %v8446_v62 = vld [vmem:[#allocation9 + $0xc8] sm:$0xff]  }
 0x49d   : > { %3538 = vst [vmem:[#allocation3 + $0xe8] sm:$0xff] %v3508_v12  ;;  %7379 = vmatprep.subr.bf16.mxu1 %v8439_v38  ;;  %v3926_v49 = vpack.c.bf16 %v3911_v40, %v3910_v11  ;;  %v3922_v11 = vld [vmem:[#allocation3 + $0x92] sm:$0xff]  ;;  %v8451_v2 = vld [vmem:[#allocation9 + $0xf0] sm:$0xff]  }
 0x49e   : > { %v8453_v48 = vld [vmem:[#allocation9 + $0x100] sm:$0xff]   ;;  %v8470_v46 = vld [vmem:[#allocation9 + $0x188] sm:$0xff]   ;;  %v8483_v39 = vld [vmem:[#allocation9 + $0x1f0] sm:$0xff]  }
 0x49f   : > { %8516 = vmatmul.mubr.msk.bf16.gmra.mrb[64].mxu1 %vm11032_vm4, %v10566_v26  ;;  %vm11144_vm4 = vnez %v11106_v5  ;;  %v8461_v16 = vld [vmem:[#allocation9 + $0x140] sm:$0xff]   ;;  %v8462_v5 = vld [vmem:[#allocation9 + $0x148] sm:$0xff]  }
 0x4a0   : > { %8519 = vmatprep.mubr.msk.bf16.mxu1 %vm11035_vm14, %v10582_v7  ;;  %7380 = vmatpush3.bf16.msra.mxu1 %v8439_v38  ;;  %vm11037_vm3 = vmpackc.low %vm11145_vm5, %vm11144_vm4  ;;  %vm11148_vm14 = vnez %v11111_v31  ;;  %v3915_v38 = vld [vmem:[#allocation3 + $0x3a] sm:$0xff]  ;;  %v8464_v31 = vld [vmem:[#allocation9 + $0x158] sm:$0xff]  }
 0x4a1   : > { %7381 = vmatprep.subr.bf16.mxu1 %v8440_v20  ;;  %vm11042_vm1 = vmpackc.low %vm10350_vm8, %vm11148_vm14  ;;  %v10640_v12 = vpack.c.bf16 %v3915_v38, %v3914_v18  ;;  %v8452_v38 = vld [vmem:[#allocation9 + $0xf8] sm:$0xff]   ;;  %v8454_v18 = vld [vmem:[#allocation9 + $0x108] sm:$0xff]  }
 0x4a2   : > { %v8477_v1 = vld [vmem:[#allocation9 + $0x1c0] sm:$0xff]   ;;  %v4931_v56 = vld [vmem:[#allocation3 + $0x99] sm:$0xff] }
 0x4a4   : > { %7382 = vmatpush3.bf16.msra.mxu1 %v8440_v20  ;;  %v8447_v20 = vld [vmem:[#allocation9 + $0xd0] sm:$0xff]  }
 0x4a5   : > { %7383 = vmatprep.subr.bf16.mxu1 %v8441_v28 }
 0x4a7   : > { %8522 = vmatmul.mubr.msk.bf16.gmra.mrb[68].mxu1 %vm11037_vm3, %v10598_v9  ;;  %vm11151_vm3 = vnez %v11117_v44 }
 0x4a8   : > { %8525 = vmatprep.mubr.msk.bf16.mxu1 %vm11042_vm1, %v10614_v0  ;;  %7384 = vmatpush3.bf16.msra.mxu1 %v8441_v28  ;;  %vm11041_vm13 = vmpackc.low %vm11152_vm7, %vm11151_vm3  ;;  %v3918_v28 = vld [vmem:[#allocation3 + $0x62] sm:$0xff] }
 0x4a9   : > { %7385 = vmatprep.subr.bf16.mxu1 %v8442_v57  ;;  %v10646_v42 = vpack.c.bf16 %v3919_v21, %v3918_v28  ;;  %vm11156_vm1 = vmpackc.low %vm10173_vm15, %vm10186_vm0  ;;  %vm11161_vm0 = vnez %v11117_v44  ;;  %v11166_v44 = vld [vmem:[#allocation21_spill] sm:$0xff] }
 0x4aa   : > { %vm11157_vm3 = vmpackc.low %vm10211_vm6, %vm10228_vm10  ;;  %vm11163_vm10 = vnez %v11124_v8  ;;  %v4723_v28 = vld [vmem:[#allocation3 + $0x50] sm:$0xff] }
 0x4ab   : > { %vm11160_vm15 = vmpackc.low %vm10350_vm8, %vm11148_vm14  ;;  %vm11167_vm8 = vnez %v11132_v6  ;;  %v8485_v8 = vld [vmem:[#allocation9 + $0x200] sm:$0xff]   ;;  %v4926_v6 = vld [vmem:[#allocation3 + $0x61] sm:$0xff] }
 0x4ac   : > { %7386 = vmatpush3.bf16.msra.mxu1 %v8442_v57  ;;  %v8448_v57 = vld [vmem:[#allocation9 + $0xd8] sm:$0xff]   ;;  %vm11162_vm6 = vmpackc.low %vm11152_vm7, %vm11161_vm0  ;;  %vm11168_vm7 = vnez %v11126_v60 }
 0x4ad   : > { %7387 = vmatprep.subr.bf16.mxu1 %v8443_v43 }
 0x4af   : > { %8528 = vmatmul.mubr.msk.bf16.gmra.mrb[72].mxu1 %vm11041_vm13, %v10630_v59  ;;  %vm11155_vm13 = vmpackc.low %vm10129_vm9, %vm10144_vm11 }
 0x4b0   : > { %7388 = vmatpush3.bf16.msra.mxu1 %v8443_v43  ;;  %7391 = vmatprep.mubr.bf16.mxu1 %v3926_v49  ;;  %v3920_v43 = vld [vmem:[#allocation3 + $0x7a] sm:$0xff]  ;;  %v10652_v49 = vpack.c.bf16 %v3923_v52, %v3922_v11  ;;  %vm11158_vm9 = vmpackc.low %vm11141_vm2, %vm11140_vm12 }
 0x4b1   : > { %7389 = vmatprep.subr.bf16.mxu1 %v8444_v41  ;;  %v10650_v40 = vpack.c.bf16 %v3921_v23, %v3920_v43  ;;  %vm11159_vm11 = vmpackc.low %vm11145_vm5, %vm11144_vm4  ;;  %v4724_v52 = vld [vmem:[#allocation3 + $0x60] sm:$0xff]  ;;  %v8478_v43 = vld [vmem:[#allocation9 + $0x1c8] sm:$0xff]  }
 0x4b4   : > { %7390 = vmatpush3.bf16.msra.mxu1 %v8444_v41  ;;  %v8450_v41 = vld [vmem:[#allocation9 + $0xe8] sm:$0xff]  }
 0x4b5   : > { %7407 = vmatprep.subr.bf16.mxu1 %v8445_v54 }
 0x4b7   : > { %7392 = vmatmul.mubr.bf16.vlgmr.msra.gmra.mrb[60].mxu1 %v10638_v51 }
 0x4b8   : > { %7395 = vmatprep.mubr.bf16.mxu1 %v10640_v12  ;;  %7408 = vmatpush3.bf16.msra.mxu1 %v8445_v54  ;;  %v3924_v54 = vld [vmem:[#allocation3 + $0xaa] sm:$0xff] }
 0x4b9   : > { %7409 = vmatprep.subr.bf16.mxu1 %v8446_v62  ;;  %v10656_v30 = vpack.c.bf16 %v3925_v24, %v3924_v54  ;;  %v4729_v24 = vld [vmem:[#allocation3 + $0x98] sm:$0xff] }
 0x4ba   : > { %v4726_v54 = vld [vmem:[#allocation3 + $0x78] sm:$0xff] }
 0x4bc   : > { %7410 = vmatpush3.bf16.msra.mxu1 %v8446_v62 }
 0x4bd   : > { %7411 = vmatprep.subr.bf16.mxu1 %v8447_v20 }
 0x4bf   : > { %7396 = vmatmul.mubr.bf16.gmra.mrb[64].mxu1 %v10644_v27 }
 0x4c0   : > { %7399 = vmatprep.mubr.bf16.mxu1 %v10646_v42  ;;  %7412 = vmatpush3.bf16.msra.mxu1 %v8447_v20  ;;  %v4720_v20 = vld [vmem:[#allocation3 + $0x30] sm:$0xff] }
 0x4c1   : > { %7413 = vmatprep.subr.bf16.mxu1 %v8448_v57 }
 0x4c4   : > { %7414 = vmatpush3.bf16.msra.mxu1 %v8448_v57  ;;  %v4725_v57 = vld [vmem:[#allocation3 + $0x68] sm:$0xff] }
 0x4c5   : > { %7415 = vmatprep.subr.bf16.mxu1 %v8449_v4  ;;  %v4738_v11 = vpack.c.bf16 %v4725_v57, %v4724_v52  ;;  %v6149_v57 = vld [vmem:[%s9192_s28 + $0x88] sm:$0xff] }
 0x4c7   : > { %7400 = vmatmul.mubr.bf16.gmra.mrb[68].mxu1 %v10650_v40 }
 0x4c8   : > { %7403 = vmatprep.mubr.bf16.mxu1 %v10652_v49  ;;  %7416 = vmatpush3.bf16.msra.mxu1 %v8449_v4  ;;  %v4722_v4 = vld [vmem:[#allocation3 + $0x48] sm:$0xff] }
 0x4c9   : > { %7417 = vmatprep.subr.bf16.mxu1 %v8450_v41  ;;  %v4737_v23 = vpack.c.bf16 %v4723_v28, %v4722_v4  ;;  %v6148_v28 = vld [vmem:[%s9192_s28 + $0x70] sm:$0xff] }
 0x4ca   : > { %v6150_v4 = vld [vmem:[%s9192_s28 + $0x90] sm:$0xff] }
 0x4cb   : > { %v5390_v52 = vpack.c.bf16 %v6150_v4, %v6149_v57 }
 0x4cc   : > { %7418 = vmatpush3.bf16.msra.mxu1 %v8450_v41  ;;  %v8479_v41 = vld [vmem:[#allocation9 + $0x1d0] sm:$0xff]  }
 0x4cd   : > { %7419 = vmatprep.subr.bf16.mxu1 %v8451_v2 }
 0x4cf   : > { %7404 = vmatmul.mubr.bf16.gmra.mrb[72].mxu1 %v10656_v30 }
 0x4d0   : > { %7420 = vmatpush3.bf16.msra.mxu1 %v8451_v2  ;;  %8531 = vmatprep.mubr.msk.bf16.mxu1 %vm11155_vm13, %v10523_v55  ;;  %vm11164_vm13 = vnez %v11121_v15  ;;  %v8471_v55 = vld [vmem:[#allocation9 + $0x190] sm:$0xff]   ;;  %v8557_v15 = vpack.c.bf16 %v3306_v29, %v3305_v61 }
 0x4d1   : > { %7421 = vmatprep.subr.bf16.mxu1 %v8452_v38  ;;  %v4727_v2 = vld [vmem:[#allocation3 + $0x80] sm:$0xff] }
 0x4d2   : > { %v4929_v61 = vld [vmem:[#allocation3 + $0x81] sm:$0xff]  ;;  %v4928_v29 = vld [vmem:[#allocation3 + $0x79] sm:$0xff] }
 0x4d4   : > { %7422 = vmatpush3.bf16.msra.mxu1 %v8452_v38  ;;  %v4739_v38 = vpack.c.bf16 %v4727_v2, %v4726_v54  ;;  %v6154_v2 = vld [vmem:[%s9192_s28 + $0xd0] sm:$0xff] }
 0x4d5   : > { %7439 = vmatprep.subr.bf16.mxu1 %v8453_v48 }
 0x4d7   : > { %8534 = vmatmul.mubr.msk.bf16.vlgmr.msra.gmra.mrb[60].mxu1 %vm11156_vm1, %v10541_v53  ;;  %vm8550_vm1 = vmpackc.low %vm11164_vm13, %vm11163_vm10  ;;  %v8472_v53 = vld [vmem:[#allocation9 + $0x198] sm:$0xff]  }
 0x4d8   : > { %8537 = vmatprep.mubr.msk.bf16.mxu1 %vm11157_vm3, %v10566_v26  ;;  %7440 = vmatpush3.bf16.msra.mxu1 %v8453_v48  ;;  %v8473_v26 = vld [vmem:[#allocation9 + $0x1a0] sm:$0xff]   ;;  %vm8556_vm3 = vmpackc.low %vm11168_vm7, %vm11167_vm8 }
 0x4d9   : > { %7441 = vmatprep.subr.bf16.mxu1 %v8454_v18  ;;  %v4728_v48 = vld [vmem:[#allocation3 + $0x90] sm:$0xff] }
 0x4dc   : > { %7442 = vmatpush3.bf16.msra.mxu1 %v8454_v18  ;;  %v8480_v18 = vld [vmem:[#allocation9 + $0x1d8] sm:$0xff]  }
 0x4dd   : > { %7443 = vmatprep.subr.bf16.mxu1 %v8455_v32 }
 0x4df   : > { %8540 = vmatmul.mubr.msk.bf16.gmra.mrb[64].mxu1 %vm11158_vm9, %v10582_v7  ;;  %v8474_v7 = vld [vmem:[#allocation9 + $0x1a8] sm:$0xff]  }
 0x4e0   : > { %8543 = vmatprep.mubr.msk.bf16.mxu1 %vm11159_vm11, %v10598_v9  ;;  %7444 = vmatpush3.bf16.msra.mxu1 %v8455_v32  ;;  %v8475_v9 = vld [vmem:[#allocation9 + $0x1b0] sm:$0xff]   ;;  %v4740_v32 = vpack.c.bf16 %v4729_v24, %v4728_v48  ;;  %v6156_v48 = vld [vmem:[%s9192_s28 + $0xf0] sm:$0xff] }
 0x4e1   : > { %7445 = vmatprep.subr.bf16.mxu1 %v8456_v17 }
 0x4e4   : > { %7446 = vmatpush3.bf16.msra.mxu1 %v8456_v17  ;;  %v8481_v17 = vld [vmem:[#allocation9 + $0x1e0] sm:$0xff]  }
 0x4e5   : > { %7447 = vmatprep.subr.bf16.mxu1 %v8457_v50 }
 0x4e7   : > { %8546 = vmatmul.mubr.msk.bf16.gmra.mrb[68].mxu1 %vm11160_vm15, %v10614_v0  ;;  %v4532_v0 = vld [vmem:[#allocation3 + $0xca] sm:$0xff] }
 0x4e8   : > { %8549 = vmatprep.mubr.msk.bf16.mxu1 %vm11162_vm6, %v10630_v59  ;;  %7448 = vmatpush3.bf16.msra.mxu1 %v8457_v50  ;;  %v4721_v59 = vld [vmem:[#allocation3 + $0x38] sm:$0xff]  ;;  %v4731_v50 = vld [vmem:[#allocation3 + $0xb0] sm:$0xff] }
 0x4e9   : > { %7449 = vmatprep.subr.bf16.mxu1 %v8458_v37  ;;  %v4736_v21 = vpack.c.bf16 %v4721_v59, %v4720_v20  ;;  %v8493_v59 = vld [vmem:[#allocation10] sm:$0xff]   ;;  %v6145_v20 = vld [vmem:[%s9192_s28 + $0x48] sm:$0xff] }
 0x4ec   : > { %7450 = vmatpush3.bf16.msra.mxu1 %v8458_v37  ;;  %v4730_v37 = vld [vmem:[#allocation3 + $0xa8] sm:$0xff] }
 0x4ed   : > { %7451 = vmatprep.subr.bf16.mxu1 %v8459_v63 }
 0x4ef   : > { %8552 = vmatmul.mubr.msk.bf16.gmra.mrb[72].mxu1 %vm8550_vm1, %v10709_v47 }
 0x4f0   : > { %7452 = vmatpush3.bf16.msra.mxu1 %v8459_v63  ;;  %7455 = vmatprep.mubr.bf16.mxu1 %v10207_v35  ;;  %v8465_v35 = vld [vmem:[#allocation9 + $0x160] sm:$0xff]   ;;  %v4741_v63 = vpack.c.bf16 %v4731_v50, %v4730_v37  ;;  %v6159_v37 = vld [vmem:[%s9192_s28 + $0x128] sm:$0xff] }
 0x4f1   : > { %7453 = vmatprep.subr.bf16.mxu1 %v8460_v3 }
 0x4f4   : > { %7454 = vmatpush3.bf16.msra.mxu1 %v8460_v3  ;;  %v8482_v3 = vld [vmem:[#allocation9 + $0x1e8] sm:$0xff]  }
 0x4f5   : > { %7471 = vmatprep.subr.bf16.mxu1 %v8461_v16 }
 0x4f7   : > { %7456 = vmatmul.mubr.bf16.vlgmr.msra.gmra.mrb[60].mxu1 %v10256_v34  ;;  %v8467_v34 = vld [vmem:[#allocation9 + $0x170] sm:$0xff]  }
 0x4f8   : > { %7459 = vmatprep.mubr.bf16.mxu1 %v10295_v14  ;;  %7472 = vmatpush3.bf16.msra.mxu1 %v8461_v16  ;;  %v4330_v14 = vld [vmem:[#allocation3 + $0xc9] sm:$0xff]  ;;  %v4923_v16 = vld [vmem:[#allocation3 + $0x39] sm:$0xff] }
 0x4f9   : > { %7473 = vmatprep.subr.bf16.mxu1 %v8462_v5  ;;  %v10724_v19 = vpack.c.bf16 %v4330_v14, %v4329_v25  ;;  %v4941_v14 = vpack.c.bf16 %v4929_v61, %v4928_v29  ;;  %v4930_v25 = vld [vmem:[#allocation3 + $0x91] sm:$0xff]  ;;  %v10800_v29 = vld [vmem:[%s11170_s26] ss:$0 sm:$0xff]  ;;  %s11175_s26 = sld [smem:[#allocation30_spill]] }
 0x4fc   : > { %7474 = vmatpush3.bf16.msra.mxu1 %v8462_v5  ;;  %v4922_v5 = vld [vmem:[#allocation3 + $0x31] sm:$0xff] }
 0x4fd   : > { %7475 = vmatprep.subr.bf16.mxu1 %v8463_v22 }
 0x4ff   : > { %7460 = vmatmul.mubr.bf16.gmra.mrb[64].mxu1 %v10347_v10  ;;  %v8469_v10 = vld [vmem:[#allocation9 + $0x180] sm:$0xff]  }
 0x500   : > { %7463 = vmatprep.mubr.bf16.mxu1 %v10385_v58  ;;  %7476 = vmatpush3.bf16.msra.mxu1 %v8463_v22  ;;  %v8468_v58 = vld [vmem:[#allocation9 + $0x178] sm:$0xff]  }
 0x501   : > { %7477 = vmatprep.subr.bf16.mxu1 %v8464_v31  ;;  %v8484_v22 = vld [vmem:[#allocation9 + $0x1f8] sm:$0xff]  }
 0x504   : > { %7478 = vmatpush3.bf16.msra.mxu1 %v8464_v31  ;;  %v4938_v31 = vpack.c.bf16 %v4923_v16, %v4922_v5 }
 0x505   : > { %7479 = vmatprep.subr.bf16.mxu1 %v8465_v35 }
 0x507   : > { %7464 = vmatmul.mubr.bf16.gmra.mrb[68].mxu1 %v11166_v44 }
 0x508   : > { %7467 = vmatprep.mubr.bf16.mxu1 %v10471_v45  ;;  %7480 = vmatpush3.bf16.msra.mxu1 %v8465_v35  ;;  %v4927_v35 = vld [vmem:[#allocation3 + $0x69] sm:$0xff] }
 0x509   : > { %7481 = vmatprep.subr.bf16.mxu1 %v8466_v13  ;;  %v4940_v60 = vpack.c.bf16 %v4927_v35, %v4926_v6 }
 0x50c   : > { %7482 = vmatpush3.bf16.msra.mxu1 %v8466_v13  ;;  %v4924_v13 = vld [vmem:[#allocation3 + $0x49] sm:$0xff] }
 0x50d   : > { %7483 = vmatprep.subr.bf16.mxu1 %v8467_v34 }
 0x50f   : > { %7468 = vmatmul.mubr.bf16.gmra.mrb[72].mxu1 %v10724_v19 }
 0x510   : > { %7484 = vmatpush3.bf16.msra.mxu1 %v8467_v34  ;;  %7487 = vmatprep.mubr.bf16.mxu1 %v10638_v51  ;;  %v4531_v51 = vld [vmem:[#allocation3 + $0xc2] sm:$0xff]  ;;  %v8486_v34 = vld [vmem:[#allocation9 + $0x208] sm:$0xff]  }
 0x511   : > { %7485 = vmatprep.subr.bf16.mxu1 %v8468_v58  ;;  %v10734_v62 = vpack.c.bf16 %v4532_v0, %v4531_v51  ;;  %v8492_v0 = vld [vmem:[#allocation9 + $0x238] sm:$0xff]  }
 0x512   : > { %v8496_v51 = vld [vmem:[#allocation10 + $0x18] sm:$0xff]  }
 0x514   : > { %7486 = vmatpush3.bf16.msra.mxu1 %v8468_v58  ;;  %v8488_v58 = vld [vmem:[#allocation9 + $0x218] sm:$0xff]  }
 0x515   : > { %7503 = vmatprep.subr.bf16.mxu1 %v8469_v10 }
 0x517   : > { %7488 = vmatmul.mubr.bf16.vlgmr.msra.gmra.mrb[60].mxu1 %v10640_v12 }
 0x518   : > { %7491 = vmatprep.mubr.bf16.mxu1 %v10644_v27  ;;  %7504 = vmatpush3.bf16.msra.mxu1 %v8469_v10  ;;  %v4942_v10 = vpack.c.bf16 %v4931_v56, %v4930_v25  ;;  %v10795_v56 = vld [vmem:[%s11169_s12] ss:$0 sm:$0xff]  ;;  %s11174_s12 = sld [smem:[#allocation19_spill]] }
 0x519   : > { %7505 = vmatprep.subr.bf16.mxu1 %v8470_v46  ;;  %v10806_v25 = vld [vmem:[%s11171_s6] ss:$0 sm:$0xff]  ;;  %s8673_s6 = scalar_lea.vmem %s10905_s13, 2048 }
 0x51a   : > { %p8674_p2 = scmp.ne.s32.totalorder %s10905_s13, %s8673_s6 }
 0x51c   : > { %7506 = vmatpush3.bf16.msra.mxu1 %v8470_v46  ;;  %v8489_v46 = vld [vmem:[#allocation9 + $0x220] sm:$0xff]  }
 0x51d   : > { %7507 = vmatprep.subr.bf16.mxu1 %v8471_v55 }
 0x51e   : > { %p11176_p9 = scmp.ne.s32.totalorder %s11174_s12, 0 }
 0x51f   : > { %7492 = vmatmul.mubr.bf16.gmra.mrb[64].mxu1 %v10646_v42 }
 0x520   : > { %7495 = vmatprep.mubr.bf16.mxu1 %v10650_v40  ;;  %7508 = vmatpush3.bf16.msra.mxu1 %v8471_v55  ;;  %v8490_v55 = vld [vmem:[#allocation9 + $0x228] sm:$0xff]   ;;  %p8675_p5 = pnand %p8674_p2, %p11176_p9 }
 0x521   : > { %7509 = vmatprep.subr.bf16.mxu1 %v8472_v53 }
 0x522   : > { %p8676_p13 = pneg %p8675_p5 }
 0x524   : > { %7510 = vmatpush3.bf16.msra.mxu1 %v8472_v53  ;;  %v8491_v53 = vld [vmem:[#allocation9 + $0x230] sm:$0xff]  }
 0x525   : > { %7511 = vmatprep.subr.bf16.mxu1 %v8473_v26 }
 0x527   : > { %7496 = vmatmul.mubr.bf16.gmra.mrb[68].mxu1 %v10652_v49 }
 0x528   : > { %7499 = vmatprep.mubr.bf16.mxu1 %v10656_v30  ;;  %7512 = vmatpush3.bf16.msra.mxu1 %v8473_v26  ;;  %v4937_v26 = vld [vmem:[#allocation3 + $0xe1] sm:$0xff] }
 0x529   : > { %7513 = vmatprep.subr.bf16.mxu1 %v8474_v7 }
 0x52c   : > { %7514 = vmatpush3.bf16.msra.mxu1 %v8474_v7  ;;  %v4936_v7 = vld [vmem:[#allocation3 + $0xd9] sm:$0xff] }
 0x52d   : > { %7515 = vmatprep.subr.bf16.mxu1 %v8475_v9 }
 0x52f   : > { %7500 = vmatmul.mubr.bf16.gmra.mrb[72].mxu1 %v10734_v62 }
 0x530   : > { %7516 = vmatpush3.bf16.msra.mxu1 %v8475_v9  ;;  %7519 = vmatprep.mubr.bf16.mxu1 %v4736_v21  ;;  %v4945_v9 = vpack.c.bf16 %v4937_v26, %v4936_v7 }
 0x531   : > { %7517 = vmatprep.subr.bf16.mxu1 %v8476_v36 }
 0x534   : > { %7518 = vmatpush3.bf16.msra.mxu1 %v8476_v36  ;;  %v5138_v36 = vld [vmem:[#allocation3 + $0xda] sm:$0xff] }
 0x535   : > { %7535 = vmatprep.subr.bf16.mxu1 %v8477_v1 }
 0x537   : > { %7520 = vmatmul.mubr.bf16.vlgmr.msra.gmra.mrb[60].mxu1 %v4737_v23 }
 0x538   : > { %7523 = vmatprep.mubr.bf16.mxu1 %v4738_v11  ;;  %7536 = vmatpush3.bf16.msra.mxu1 %v8477_v1  ;;  %v6152_v11 = vld [vmem:[%s9192_s28 + $0xb0] sm:$0xff] }
 0x539   : > { %7537 = vmatprep.subr.bf16.mxu1 %v8478_v43 }
 0x53c   : > { %7538 = vmatpush3.bf16.msra.mxu1 %v8478_v43  ;;  %v6151_v43 = vld [vmem:[%s9192_s28 + $0xa8] sm:$0xff] }
 0x53d   : > { %7539 = vmatprep.subr.bf16.mxu1 %v8479_v41  ;;  %v5391_v24 = vpack.c.bf16 %v6152_v11, %v6151_v43 }
 0x53f   : > { %7524 = vmatmul.mubr.bf16.gmra.mrb[64].mxu1 %v4739_v38  ;;  %v6155_v38 = vld [vmem:[%s9192_s28 + $0xe8] sm:$0xff] }
 0x540   : > { %7527 = vmatprep.mubr.bf16.mxu1 %v4740_v32  ;;  %7540 = vmatpush3.bf16.msra.mxu1 %v8479_v41  ;;  %v6153_v41 = vld [vmem:[%s9192_s28 + $0xc8] sm:$0xff]  ;;  %v6158_v32 = vld [vmem:[%s9192_s28 + $0x110] sm:$0xff] }
 0x541   : > { %7541 = vmatprep.subr.bf16.mxu1 %v8480_v18  ;;  %v5392_v54 = vpack.c.bf16 %v6154_v2, %v6153_v41 }
 0x544   : > { %7542 = vmatpush3.bf16.msra.mxu1 %v8480_v18  ;;  %v6157_v18 = vld [vmem:[%s9192_s28 + $0x108] sm:$0xff] }
 0x545   : > { %7543 = vmatprep.subr.bf16.mxu1 %v8481_v17  ;;  %v5394_v50 = vpack.c.bf16 %v6158_v32, %v6157_v18 }
 0x547   : > { %7528 = vmatmul.mubr.bf16.gmra.mrb[68].mxu1 %v4741_v63  ;;  %v6160_v63 = vld [vmem:[%s9192_s28 + $0x130] sm:$0xff] }
 0x548   : > { %8555 = vmatprep.mubr.msk.bf16.mxu1 %vm8550_vm1, %v10709_v47  ;;  %7544 = vmatpush3.bf16.msra.mxu1 %v8481_v17  ;;  %v4925_v47 = vld [vmem:[#allocation3 + $0x51] sm:$0xff]  ;;  %v5393_v17 = vpack.c.bf16 %v6156_v48, %v6155_v38 }
 0x549   : > { %7545 = vmatprep.subr.bf16.mxu1 %v8482_v3  ;;  %v4939_v44 = vpack.c.bf16 %v4925_v47, %v4924_v13 }
 0x54c   : > { %7546 = vmatpush3.bf16.msra.mxu1 %v8482_v3  ;;  %v5395_v3 = vpack.c.bf16 %v6160_v63, %v6159_v37 }
 0x54d   : > { %7547 = vmatprep.subr.bf16.mxu1 %v8483_v39 }
 0x54f   : > { %8558 = vmatmul.mubr.msk.bf16.gmra.mrb[72].mxu1 %vm8556_vm3, %v8557_v15 }
 0x550   : > { %7548 = vmatpush3.bf16.msra.mxu1 %v8483_v39  ;;  %7551 = vmatprep.mubr.bf16.mxu1 %v4938_v31 }
 0x551   : > { %7549 = vmatprep.subr.bf16.mxu1 %v8484_v22 }
 0x554   : > { %7550 = vmatpush3.bf16.msra.mxu1 %v8484_v22 }
 0x555   : > { %7567 = vmatprep.subr.bf16.mxu1 %v8485_v8 }
 0x557   : > { %7552 = vmatmul.mubr.bf16.vlgmr.msra.gmra.mrb[60].mxu1 %v4939_v44 }
 0x558   : > { %7555 = vmatprep.mubr.bf16.mxu1 %v4940_v60  ;;  %7568 = vmatpush3.bf16.msra.mxu1 %v8485_v8 }
 0x559   : > { %7569 = vmatprep.subr.bf16.mxu1 %v8486_v34 }
 0x55c   : > { %7570 = vmatpush3.bf16.msra.mxu1 %v8486_v34 }
 0x55d   : > { %7571 = vmatprep.subr.bf16.mxu1 %v8487_v33 }
 0x55f   : > { %7556 = vmatmul.mubr.bf16.gmra.mrb[64].mxu1 %v4941_v14 }
 0x560   : > { %7559 = vmatprep.mubr.bf16.mxu1 %v4942_v10  ;;  %7572 = vmatpush3.bf16.msra.mxu1 %v8487_v33 }
 0x561   : > { %7573 = vmatprep.subr.bf16.mxu1 %v8488_v58 }
 0x564   : > { %7574 = vmatpush3.bf16.msra.mxu1 %v8488_v58 }
 0x565   : > { %7575 = vmatprep.subr.bf16.mxu1 %v8489_v46 }
 0x567   : > { %7560 = vmatmul.mubr.bf16.gmra.mrb[68].mxu1 %v10471_v45  ;;  %v8494_v45 = vld [vmem:[#allocation10 + $0x8] sm:$0xff]  }
 0x568   : > { %7563 = vmatprep.mubr.bf16.mxu1 %v10724_v19  ;;  %7576 = vmatpush3.bf16.msra.mxu1 %v8489_v46  ;;  %v8495_v19 = vld [vmem:[#allocation10 + $0x10] sm:$0xff]  }
 0x569   : > { %7577 = vmatprep.subr.bf16.mxu1 %v8490_v55  ;;  %v10812_v46 = vld [vmem:[%s11172_s16] ss:$0 sm:$0xff]  ;;  %s8679_s16 = scalar_lea.vmem %s8678_s30, 4096 }
 0x56a   : > { %p8681_p8 = scmp.lt.s32.totalorder %s8679_s16, %s8673_s6 }
 0x56c   : > { %7578 = vmatpush3.bf16.msra.mxu1 %v8490_v55  ;;  %p8682_p12 = por %p8681_p8, %p8680_p6 }
 0x56d   : > { %7579 = vmatprep.subr.bf16.mxu1 %v8491_v53 }
 0x56e   : > { %p8683_p4 = pnand %p8682_p12, %p8676_p13 }
 0x56f   : > { %7564 = vmatmul.mubr.bf16.gmra.mrb[72].mxu1 %v4945_v9 }
 0x570   : > { %7580 = vmatpush3.bf16.msra.mxu1 %v8491_v53  ;;  %7583 = vmatprep.mubr.bf16.mxu1 %v10640_v12  ;;  %v8497_v12 = vld [vmem:[#allocation10 + $0x20] sm:$0xff]  }
 0x571   : > { %7581 = vmatprep.subr.bf16.mxu1 %v8492_v0 }
 0x574   : > { %7582 = vmatpush3.bf16.msra.mxu1 %v8492_v0 }
 0x575   : > { %7599 = vmatprep.subr.bf16.mxu1 %v8493_v59 }
 0x577   : > { %7584 = vmatmul.mubr.bf16.vlgmr.msra.gmra.mrb[60].mxu1 %v10644_v27  ;;  %v8498_v27 = vld [vmem:[#allocation10 + $0x28] sm:$0xff]  }
 0x578   : > { %7587 = vmatprep.mubr.bf16.mxu1 %v10646_v42  ;;  %7600 = vmatpush3.bf16.msra.mxu1 %v8493_v59  ;;  %v8499_v42 = vld [vmem:[#allocation10 + $0x30] sm:$0xff]  }
 0x579   : > { %7601 = vmatprep.subr.bf16.mxu1 %v8494_v45 }
 0x57c   : > { %7602 = vmatpush3.bf16.msra.mxu1 %v8494_v45 }
 0x57d   : > { %7603 = vmatprep.subr.bf16.mxu1 %v8495_v19 }
 0x57f   : > { %7588 = vmatmul.mubr.bf16.gmra.mrb[64].mxu1 %v10650_v40  ;;  %v6146_v40 = vld [vmem:[%s9192_s28 + $0x50] sm:$0xff] }
 0x580   : > { %7591 = vmatprep.mubr.bf16.mxu1 %v10652_v49  ;;  %7604 = vmatpush3.bf16.msra.mxu1 %v8495_v19  ;;  %v5139_v49 = vld [vmem:[#allocation3 + $0xe2] sm:$0xff]  ;;  %v5388_v21 = vpack.c.bf16 %v6146_v40, %v6145_v20 }
 0x581   : > { %7605 = vmatprep.subr.bf16.mxu1 %v8496_v51  ;;  %v5147_v1 = vpack.c.bf16 %v5139_v49, %v5138_v36 }
 0x584   : > { %7606 = vmatpush3.bf16.msra.mxu1 %v8496_v51 }
 0x585   : > { %7607 = vmatprep.subr.bf16.mxu1 %v8497_v12 }
 0x587   : > { %7592 = vmatmul.mubr.bf16.gmra.mrb[68].mxu1 %v10656_v30  ;;  %v8500_v30 = vld [vmem:[#allocation10 + $0x38] sm:$0xff]  }
 0x588   : > { %7595 = vmatprep.mubr.bf16.mxu1 %v10734_v62  ;;  %7608 = vmatpush3.bf16.msra.mxu1 %v8497_v12  ;;  %v6147_v62 = vld [vmem:[%s9192_s28 + $0x68] sm:$0xff]  ;;  %s10903_s28 = scalar_lea.hbm %s11175_s26, %s6174_s29 }
 0x589   : > { %7609 = vmatprep.subr.bf16.mxu1 %v8498_v27  ;;  %v5389_v23 = vpack.c.bf16 %v6148_v28, %v6147_v62 }
 0x58c   : > { %7610 = vmatpush3.bf16.msra.mxu1 %v8498_v27 }
 0x58d   : > { %7611 = vmatprep.subr.bf16.mxu1 %v8499_v42 }
 0x58f   : > { %7596 = vmatmul.mubr.bf16.gmra.mrb[72].mxu1 %v5147_v1 }
 0x590   : > { %7612 = vmatpush3.bf16.msra.mxu1 %v8499_v42  ;;  %7615 = vmatprep.mubr.bf16.mxu1 %v5388_v21 }
 0x591   : > { %7613 = vmatprep.subr.bf16.mxu1 %v8500_v30 }
 0x594   : > { %7614 = vmatpush3.bf16.msra.mxu1 %v8500_v30 }
 0x597   : > { %7616 = vmatmul.mubr.bf16.vlgmr.msra.gmra.mrb[76].mxu1 %v5389_v23 }
 0x598   : > { %7619 = vmatprep.mubr.bf16.mxu1 %v5390_v52 }
 0x59f   : > { %7620 = vmatmul.mubr.bf16.gmra.mrb[80].mxu1 %v5391_v24 }
 0x5a0   : > { %7623 = vmatprep.mubr.bf16.mxu1 %v5392_v54 }
 0x5a7   : > { %7624 = vmatmul.mubr.bf16.gmra.mrb[84].mxu1 %v5393_v17 }
 0x5a8   : > { %7627 = vmatprep.mubr.bf16.mxu1 %v5394_v50 }
 0x5af   : > { %7628 = vmatmul.mubr.bf16.gmra.mrb[88].mxu1 %v5395_v3 }
 0x64a   : > { %v7585_v39 = vpop.f32.mrb[60].mxu1 }
 0x64b   : > { %v5247_v16 = vpop.f32.mrb[61].mxu1  ;;  %v5335_v14 = vmul.f32 %v7585_v39, %v10795_v56 }
 0x64c   : > { %v7586_v5 = vpop.f32.mrb[62].mxu1  ;;  %v5333_v58 = vmul.f32 %v10795_v56, %v5247_v16 }
 0x64d   : > { %v5250_v22 = vpop.f32.mrb[63].mxu1  ;;  %v5336_v55 = vmul.f32 %v7586_v5, %v10795_v56  ;;  %v5358_v59 = vadd.f32 %v10806_v25, %v5335_v14 }
 0x64e   : > { %v5334_v7 = vmul.f32 %v10795_v56, %v5250_v22  ;;  %v5356_v12 = vadd.f32 %v10806_v25, %v5333_v58 }
 0x64f   : > { %v5359_v20 = vadd.f32 %v10806_v25, %v5336_v55 }
 0x650   : > { %v5357_v36 = vadd.f32 %v10806_v25, %v5334_v7 }
 0x652   : > { %v7589_v31 = vpop.f32.mrb[64].mxu1 }
 0x653   : > { %v5263_v15 = vpop.f32.mrb[65].mxu1  ;;  %v5339_v30 = vmul.f32 %v7589_v31, %v10795_v56 }
 0x654   : > { %v7590_v8 = vpop.f32.mrb[66].mxu1  ;;  %v5337_v57 = vmul.f32 %v10795_v56, %v5263_v15 }
 0x655   : > { %v5266_v47 = vpop.f32.mrb[67].mxu1  ;;  %v5340_v43 = vmul.f32 %v7590_v8, %v10795_v56  ;;  %v5362_v18 = vadd.f32 %v10806_v25, %v5339_v30 }
 0x656   : > { %v5338_v24 = vmul.f32 %v10795_v56, %v5266_v47  ;;  %v5360_v37 = vadd.f32 %v10806_v25, %v5337_v57 }
 0x657   : > { %v5363_v39 = vadd.f32 %v10806_v25, %v5340_v43 }
 0x658   : > { %v5361_v22 = vadd.f32 %v10806_v25, %v5338_v24 }
 0x65a   : > { %v10776_v35 = vpop.f32.mrb[68].mxu1 }
 0x65b   : > { %v10778_v13 = vpop.f32.mrb[69].mxu1  ;;  %v5343_v8 = vmul.f32 %v10776_v35, %v10795_v56 }
 0x65c   : > { %v10780_v44 = vpop.f32.mrb[70].mxu1  ;;  %v5341_v58 = vmul.f32 %v10795_v56, %v10778_v13 }
 0x65d   : > { %v10782_v6 = vpop.f32.mrb[71].mxu1 }
 0x65e   : > { %v5342_v35 = vmul.f32 %v10795_v56, %v10782_v6 }
 0x662   : > { %v10784_v34 = vpop.f32.mrb[72].mxu1 }
 0x663   : > { %v10786_v60 = vpop.f32.mrb[73].mxu1  ;;  %v5347_v30 = vmul.f32 %v10784_v34, %v10795_v56 }
 0x664   : > { %v10788_v33 = vpop.f32.mrb[74].mxu1  ;;  %v5345_v57 = vmul.f32 %v10795_v56, %v10786_v60 }
 0x665   : > { %v10790_v61 = vpop.f32.mrb[75].mxu1  ;;  %v5348_v43 = vmul.f32 %v10788_v33, %v10795_v56 }
 0x66a   : > { %v7617_v10 = vpop.f32.mrb[76].mxu1 }
 0x66b   : > { %v5566_v53 = vmul.f32 %v7617_v10, %v10800_v29  ;;  %v5494_v26 = vpop.f32.mrb[77].mxu1 }
 0x66c   : > { %v5564_v9 = vmul.f32 %v10800_v29, %v5494_v26  ;;  %v7618_v0 = vpop.f32.mrb[78].mxu1  ;;  %v5344_v26 = vmul.f32 %v10780_v44, %v10795_v56 }
 0x66d   : > { %v5589_v45 = vadd.f32 %v10812_v46, %v5566_v53  ;;  %v5567_v19 = vmul.f32 %v7618_v0, %v10800_v29  ;;  %v5497_v51 = vpop.f32.mrb[79].mxu1 }
 0x66e   : > { %v5587_v27 = vadd.f32 %v10812_v46, %v5564_v9  ;;  %v5565_v42 = vmul.f32 %v10800_v29, %v5497_v51 }
 0x66f   : > { %v5605_v40 = vadd.f32 %v5589_v45, %v5358_v59  ;;  %v5590_v49 = vadd.f32 %v10812_v46, %v5567_v19  ;;  %v5366_v19 = vadd.f32 %v10806_v25, %v5343_v8 }
 0x670   : > { %v5603_v21 = vadd.f32 %v5587_v27, %v5356_v12  ;;  %v5588_v1 = vadd.f32 %v10812_v46, %v5565_v42  ;;  %v5364_v27 = vadd.f32 %v10806_v25, %v5341_v58 }
 0x671   : > { %v5621_v62 = vmax.f32 %v5605_v40, 0.0  ;;  %v5606_v28 = vadd.f32 %v5590_v49, %v5359_v20  ;;  %v5367_v20 = vadd.f32 %v10806_v25, %v5344_v26 }
 0x672   : > { %v5619_v4 = vmax.f32 %v5603_v21, 0.0  ;;  %v5604_v23 = vadd.f32 %v5588_v1, %v5357_v36  ;;  %v7621_v52 = vpop.f32.mrb[80].mxu1  ;;  %v5365_v36 = vadd.f32 %v10806_v25, %v5342_v35 }
 0x673   : > { %5637 = vst [vmem:[%s9147_s20 + $0x10] sm:$0xff] %v5621_v62  ;;  %v5622_v11 = vmax.f32 %v5606_v28, 0.0  ;;  %v5570_v41 = vmul.f32 %v7621_v52, %v10800_v29  ;;  %v5510_v2 = vpop.f32.mrb[81].mxu1 }
 0x674   : > { %5635 = vst [vmem:[%s9147_s20] sm:$0xff] %v5619_v4  ;;  %v5620_v54 = vmax.f32 %v5604_v23, 0.0  ;;  %v5568_v38 = vmul.f32 %v10800_v29, %v5510_v2  ;;  %v7622_v48 = vpop.f32.mrb[82].mxu1  ;;  %v5346_v2 = vmul.f32 %v10795_v56, %v10790_v61 }
 0x675   : > { %5638 = vst [vmem:[%s9147_s20 + $0x18] sm:$0xff] %v5622_v11  ;;  %v5593_v32 = vadd.f32 %v10812_v46, %v5570_v41  ;;  %v5571_v17 = vmul.f32 %v7622_v48, %v10800_v29  ;;  %v5513_v50 = vpop.f32.mrb[83].mxu1 }
 0x676   : > { %5636 = vst [vmem:[%s9147_s20 + $0x8] sm:$0xff] %v5620_v54  ;;  %v5591_v63 = vadd.f32 %v10812_v46, %v5568_v38  ;;  %v5569_v3 = vmul.f32 %v10800_v29, %v5513_v50  ;;  %v5370_v38 = vadd.f32 %v10806_v25, %v5347_v30 }
 0x677   : > { %v5609_v16 = vadd.f32 %v5593_v32, %v5362_v18  ;;  %v5594_v5 = vadd.f32 %v10812_v46, %v5571_v17  ;;  %v5368_v32 = vadd.f32 %v10806_v25, %v5345_v57  ;;  %v5371_v17 = vadd.f32 %v10806_v25, %v5348_v43 }
 0x678   : > { %v5607_v31 = vadd.f32 %v5591_v63, %v5360_v37  ;;  %v5592_v15 = vadd.f32 %v10812_v46, %v5569_v3  ;;  %v5369_v63 = vadd.f32 %v10806_v25, %v5346_v2 }
 0x679   : > { %v5625_v47 = vmax.f32 %v5609_v16, 0.0  ;;  %v5610_v14 = vadd.f32 %v5594_v5, %v5363_v39 }
 0x67a   : > { %v5623_v10 = vmax.f32 %v5607_v31, 0.0  ;;  %v5608_v55 = vadd.f32 %v5592_v15, %v5361_v22  ;;  %v7625_v53 = vpop.f32.mrb[84].mxu1 }
 0x67b   : > { %5641 = vst [vmem:[%s9147_s20 + $0x30] sm:$0xff] %v5625_v47  ;;  %v5626_v7 = vmax.f32 %v5610_v14, 0.0  ;;  %v5574_v9 = vmul.f32 %v7625_v53, %v10800_v29  ;;  %v5526_v0 = vpop.f32.mrb[85].mxu1 }
 0x67c   : > { %5639 = vst [vmem:[%s9147_s20 + $0x20] sm:$0xff] %v5623_v10  ;;  %v5624_v59 = vmax.f32 %v5608_v55, 0.0  ;;  %v5572_v45 = vmul.f32 %v10800_v29, %v5526_v0  ;;  %v7626_v13 = vpop.f32.mrb[86].mxu1 }
 0x67d   : > { %5642 = vst [vmem:[%s9147_s20 + $0x38] sm:$0xff] %v5626_v7  ;;  %v5597_v51 = vadd.f32 %v10812_v46, %v5574_v9  ;;  %v5575_v44 = vmul.f32 %v7626_v13, %v10800_v29  ;;  %v5529_v12 = vpop.f32.mrb[87].mxu1 }
 0x67e   : > { %5640 = vst [vmem:[%s9147_s20 + $0x28] sm:$0xff] %v5624_v59  ;;  %v5595_v42 = vadd.f32 %v10812_v46, %v5572_v45  ;;  %v5573_v6 = vmul.f32 %v10800_v29, %v5529_v12 }
 0x67f   : > { %v5613_v40 = vadd.f32 %v5597_v51, %v5366_v19  ;;  %v5598_v49 = vadd.f32 %v10812_v46, %v5575_v44 }
 0x680   : > { %v5611_v21 = vadd.f32 %v5595_v42, %v5364_v27  ;;  %v5596_v1 = vadd.f32 %v10812_v46, %v5573_v6 }
 0x681   : > { %v5629_v62 = vmax.f32 %v5613_v40, 0.0  ;;  %v5614_v28 = vadd.f32 %v5598_v49, %v5367_v20 }
 0x682   : > { %v5627_v4 = vmax.f32 %v5611_v21, 0.0  ;;  %v5612_v23 = vadd.f32 %v5596_v1, %v5365_v36  ;;  %v7629_v52 = vpop.f32.mrb[88].mxu1 }
 0x683   : > { %5645 = vst [vmem:[%s9147_s20 + $0x50] sm:$0xff] %v5629_v62  ;;  %v5630_v11 = vmax.f32 %v5614_v28, 0.0  ;;  %v5578_v41 = vmul.f32 %v7629_v52, %v10800_v29  ;;  %v5542_v34 = vpop.f32.mrb[89].mxu1 }
 0x684   : > { %5643 = vst [vmem:[%s9147_s20 + $0x40] sm:$0xff] %v5627_v4  ;;  %v5628_v60 = vmax.f32 %v5612_v23, 0.0  ;;  %v5576_v24 = vmul.f32 %v10800_v29, %v5542_v34  ;;  %v7630_v54 = vpop.f32.mrb[90].mxu1 }
 0x685   : > { %5646 = vst [vmem:[%s9147_s20 + $0x58] sm:$0xff] %v5630_v11  ;;  %v5601_v33 = vadd.f32 %v10812_v46, %v5578_v41  ;;  %v5579_v48 = vmul.f32 %v7630_v54, %v10800_v29  ;;  %v5545_v18 = vpop.f32.mrb[91].mxu1 }
 0x686   : > { %5644 = vst [vmem:[%s9147_s20 + $0x48] sm:$0xff] %v5628_v60  ;;  %v5599_v61 = vadd.f32 %v10812_v46, %v5576_v24  ;;  %v5577_v56 = vmul.f32 %v10800_v29, %v5545_v18 }
 0x687   : > { %v5617_v50 = vadd.f32 %v5601_v33, %v5370_v38  ;;  %v5602_v37 = vadd.f32 %v10812_v46, %v5579_v48 }
 0x688   : > { %v5615_v3 = vadd.f32 %v5599_v61, %v5368_v32  ;;  %v5600_v39 = vadd.f32 %v10812_v46, %v5577_v56 }
 0x689   : > { %v5633_v16 = vmax.f32 %v5617_v50, 0.0  ;;  %v5618_v5 = vadd.f32 %v5602_v37, %v5371_v17 }
 0x68a   : > { %v5631_v29 = vmax.f32 %v5615_v3, 0.0  ;;  %v5616_v22 = vadd.f32 %v5600_v39, %v5369_v63 }
 0x68b   : > { %5649 = vst [vmem:[%s9147_s20 + $0x70] sm:$0xff] %v5633_v16  ;;  %v5634_v31 = vmax.f32 %v5618_v5, 0.0 }
 0x68c   : > { %5647 = vst [vmem:[%s9147_s20 + $0x60] sm:$0xff] %v5631_v29  ;;  %v5632_v25 = vmax.f32 %v5616_v22, 0.0 }
 0x68d   : > { %5650 = vst [vmem:[%s9147_s20 + $0x78] sm:$0xff] %v5634_v31 }
 0x68e   : > { %5648 = vst [vmem:[%s9147_s20 + $0x68] sm:$0xff] %v5632_v25 }
 0x68f   : > { %8686 = shalt.err (!%p8683_p4)
}
 0x690   : > { %s8687_s2 = scalar_lea.hbm %s10903_s28, 2048  ;;  %s8691_s10 = scalar_lea.hbm %s11175_s26, 8192 }
 0x691   : > { %p8688_p7 = scmp.ne.s32.totalorder %s10903_s28, %s8687_s2  ;;  %p8692_p1 = scmp.lt.u32.totalorder %s10903_s28, %s11175_s26 }
 0x692   : > { %p8693_p11 = scmp.lt.u32.totalorder %s8691_s10, %s8687_s2  ;;  %p8695_p2 = scmp.lt.u32.totalorder %s8687_s2, %s10903_s28 }
 0x693   : > { %p8689_p3 = pnand %p8688_p7, %p11176_p9 }
 0x694   : > { %p8694_p10 = por %p8693_p11, %p8692_p1 }
 0x695   : > { %p8690_p0 = pneg %p8689_p3 }
 0x696   : > { %p8696_p5 = por %p8695_p2, %p8694_p10 }
 0x698   : > { %p8697_p13 = pnand %p8696_p5, %p8690_p0 }
 0x69a   : > { %8700 = shalt.err (!%p8697_p13)
}
 0x69b   : > { %s8815_s29 = smov 128   ;;  %s8816_s25 = smov 8  }
 0x69c   : > { %8223 = dma.vmem_to_hbm [thread:$0]  (%p11176_p9), %s10905_s13, 2048, %s10903_s28, %s10912_s5, %s8815_s29, %s8815_s29, %s8816_s25  }
 0x69d PF: > { %s11177_s11 = sld [smem:[#allocation17_spill]]  ;;  %s11178_s6 = sld [smem:[#allocation20_spill]] }
 0x69e   : > { %p8250_p6 = scmp.ge.s32.totalorder %s8803_s23, 2 }
 0x6a3   : > { %s5682_s8 = sand.u32 1, %s11177_s11   ;;  %p11179_p8 = scmp.ne.s32.totalorder %s11178_s6, 0 }
 0x6a4   : > { %s5683_s30 = scalar_lea.sflag [#allocation6], %s5682_s8 }
 0x6a5   : > { %p8240_p12 = pnand %p8250_p6, %p11179_p8 }
 0x6a7   : > { %8758 = dma.done.wait (!%p8240_p12), %s5683_s30, 2048  }
 0x6a8   : > { %8760 = vsyncadd (!%p8240_p12), %s5683_s30, 4294965248  ;;  %s28_s23 = sadd.s32 1, %s8803_s23   ;;  %s11180_s13 = smov %s8767_s14 }
 0x6a9   : > { %p25_p4 = scmp.ge.s32.totalorder %s28_s23, 6   ;;  %s11181_s14 = smov %s8771_s15 }
 0x6aa   : > { %s11182_s15 = smov %s9079_s27  ;;  %s11183_s16 = smov %s8779_s17 }
 0x6ab   : > { %s11184_s17 = smov %s8783_s18  ;;  %s11185_s18 = smov %s9074_s9 }
 0x6ac   : > { %s11186_s19 = smov %s8795_s21  ;;  %s11187_s20 = smov %s8799_s22 }
 0x6ad   : > { %s11188_s21 = smov %s11191_s7  ;;  %s11189_s22 = smov %s11195_s24 }
 0x6ae   :  { %27 = sbr.rel (!%p25_p4) target bundleno = 21 (0x15), region = 143 }
 0x6b5   :  { %5688 = vsyncpa [#allocation5], 1 }
 0x6b6   :  { %5690 = vsyncpa [#allocation5 + $0x1], 1 }
 0x6b7   :  { %5691 = vsyncpa [#allocation8], 1 }
 0x6b8   :  { %5692 = vsyncpa [#allocation11], 1 }
 0x6b9   :  { %5693 = vsyncpa [#allocation6], 1 }
 0x6ba   :  { %5695 = vsyncpa [#allocation6 + $0x1], 1 }

</bundles_post_ra>
